<compile_context>
chip_gen: v5e
topology: v5e:2x2
jax: 0.10.0
libtpu: 0.0.40
codegen_flags: <defaults>
</compile_context>

<pallas_src>
import functools

import jax
import jax.numpy as jnp
from jax import lax
from jax.experimental import pallas as pl
from jax.experimental.pallas import tpu as pltpu


# ----------------------------------------------------------------------------
# Device / tiling heuristics
# ----------------------------------------------------------------------------
def _device_hints():
    try:
        kind = jax.devices()[0].device_kind.lower()
    except Exception:  # pragma: no cover - defensive
        kind = ""
    # Single-TensorCore parts: v5e / v6e ("lite") -> no megacore sharding gain.
    single_core = any(s in kind for s in ("v5e", "v5 lite", "v5lite",
                                          "v6e", "v6 lite", "v6lite"))
    # v6e/v7x MXU rows are 256; v5e-class (and older) MXUs are 128-row.
    target_m = 256 if any(s in kind for s in ("v6", "v7")) else 128
    prefer_split = not single_core
    return target_m, prefer_split, kind


def _pick_batch_block(B, HW, target_m, prefer_split):
    """Largest divisor Bb of B with Bb*HW <= target_m (MXU rows); on multi-core
    parts additionally require nb = B//Bb >= 2 so the parallel axis shards."""
    best = 1
    for d in range(1, B + 1):
        if B % d:
            continue
        if d * HW > target_m:
            continue
        if prefer_split and B >= 2 and B // d < 2:
            continue
        best = max(best, d)
    return best


def _vmem_limit_bytes(Bb, HW, Cout, KH, KW, kind):
    C4 = 4 * Cout
    K = KH * KW * Cout
    blk = Bb * HW * C4 * 4 + Bb * HW * Cout * 4 + 2 * Cout * 4   # one buffer set
    weights = K * C4 * 2 + HW * 3 * Cout * 4 + HW * Cout * 4
    scratch = Bb * HW * K * 2 + Bb * HW * Cout * 4
    need = 2 * blk + 2 * weights + scratch                        # double buffers
    cap = (56 << 20) if "v7" in kind else (100 << 20)
    return int(min(max(2 * need, 32 << 20), cap))


# ----------------------------------------------------------------------------
# Recurrence kernel: one (batch block, timestep) per grid program.
# Scratch (taps buffer, cell state) persists across the serial T axis.
# ----------------------------------------------------------------------------
def _make_recurrence_kernel(Bb, H, W, Cout, KH, KW, activation):
    if activation not in ("tanh", "sigmoid", "relu"):
        raise ValueError(f"unsupported activation: {activation}")
    HW = H * W
    M = Bb * HW
    C = Cout
    C4 = 4 * C
    K = KH * KW * C
    ph, pw = (KH - 1) // 2, (KW - 1) // 2

    def kernel(convx_ref, whf_ref, wcif3_ref, wco_ref,
               h_ref, stats_ref, taps_ref, c_ref):
        # convx_ref:  (1, Bb, HW, 4C) f32  streamed X-path conv (pre-scaled)
        # whf_ref:    (KH*KW*C, 4C)   bf16 flattened H-path weights (pre-scaled)
        # wcif3_ref:  (HW, 3C)        f32  0.5*[W_ci | W_cf | 0] peephole
        # wco_ref:    (HW, C)         f32  0.5*W_co peephole
        # h_ref:      (1, Bb, HW, C)  f32  H_t output block for this step
        # stats_ref:  (1, 2, C)       f32  resident [sum, sumsq] accumulator
        # taps_ref:   (Bb, H, W, K)   bf16 persistent im2col taps of H_{t-1}
        # c_ref:      (Bb, HW, C)     f32  persistent cell state
        t = pl.program_id(1)

        @pl.when(t == 0)
        def _():
            taps_ref[...] = jnp.zeros_like(taps_ref)
            c_ref[...] = jnp.zeros_like(c_ref)
            stats_ref[...] = jnp.zeros_like(stats_ref)

        # ---- H-path conv for this step: ONE fused matmul, K = KH*KW*Cout ----
        taps = taps_ref[...].reshape(M, K)                       # bf16, contiguous
        acc = convx_ref[0] + jnp.dot(
            taps, whf_ref[...],
            preferred_element_type=jnp.float32).reshape(Bb, HW, C4)

        c_prev = c_ref[...]                                      # (Bb, HW, C) f32
        wpe = wcif3_ref[...]                                     # (HW, 3C)
        wco_v = wco_ref[...]                                     # (HW, C)

        # ---- Gates.  Pre-activations were pre-scaled (wrapper) so that
        #      sigmoid(x) == 0.5*tanh(acc_part) + 0.5; i/f/g share one wide
        #      tanh push and {o, act(C_t)} share another. ----
        if activation == "relu":
            pre_if = acc[..., :2 * C] + wpe[None, :, :2 * C] * jnp.concatenate(
                [c_prev, c_prev], axis=-1)
            t2 = jnp.tanh(pre_if)
            i_g = 0.5 * t2[..., :C] + 0.5
            f_g = 0.5 * t2[..., C:] + 0.5
            g_a = jnp.maximum(acc[..., 2 * C:3 * C], 0.0)
            c_new = f_g * c_prev + i_g * g_a
            o_g = 0.5 * jnp.tanh(acc[..., 3 * C:] + wco_v[None] * c_new) + 0.5
            h_new = o_g * jnp.maximum(c_new, 0.0)
        else:
            c3 = jnp.concatenate([c_prev, c_prev, c_prev], axis=-1)
            t3 = jnp.tanh(acc[..., :3 * C] + wpe[None] * c3)
            i_g = 0.5 * t3[..., :C] + 0.5
            f_g = 0.5 * t3[..., C:2 * C] + 0.5
            if activation == "tanh":
                g_a = t3[..., 2 * C:]
            else:  # sigmoid
                g_a = 0.5 * t3[..., 2 * C:] + 0.5
            c_new = f_g * c_prev + i_g * g_a
            s_c = 0.5 if activation == "sigmoid" else 1.0
            z = jnp.tanh(jnp.concatenate(
                [acc[..., 3 * C:] + wco_v[None] * c_new, s_c * c_new], axis=-1))
            o_g = 0.5 * z[..., :C] + 0.5
            a_c = (0.5 * z[..., C:] + 0.5) if activation == "sigmoid" else z[..., C:]
            h_new = o_g * a_c

        c_ref[...] = c_new
        h_ref[0] = h_new

        # ---- Scatter H_t into the 9 shifted tap column groups for step t+1
        #      (static offsets; border entries stay zero == 'same' padding). ----
        hb = h_new.reshape(Bb, H, W, C).astype(taps_ref.dtype)
        for kh in range(KH):
            dh = kh - ph
            r0, r1 = max(0, -dh), H - max(0, dh)
            for kw in range(KW):
                dw = kw - pw
                c0, c1 = max(0, -dw), W - max(0, dw)
                g = kh * KW + kw
                taps_ref[:, r0:r1, c0:c1, g * C:(g + 1) * C] = (
                    hb[:, r0 + dh:r1 + dh, c0 + dw:c1 + dw, :])

        # ---- Incremental BatchNorm statistics (sum, sum of squares). ----
        h2 = h_new.reshape(M, C)
        stats_ref[0, 0:1, :] = stats_ref[0, 0:1, :] + jnp.sum(
            h2, axis=0, keepdims=True)
        stats_ref[0, 1:2, :] = stats_ref[0, 1:2, :] + jnp.sum(
            h2 * h2, axis=0, keepdims=True)

    return kernel


# ----------------------------------------------------------------------------
# One ConvLSTM layer (+ folded preceding BatchNorm affine)
# ----------------------------------------------------------------------------
def convlstm_layer(x, params, activation, in_scale=None, in_shift=None):
    """x: (T, B, H, W, Cin) f32 — RAW output of the previous layer; the previous
    BatchNorm (if any) is the per-channel affine (in_scale, in_shift), applied
    here before the conv (exactly matching the reference ordering).
    Returns (h_seq (T, B, H, W, Cout) f32, stats (2, Cout) = [sum, sumsq])."""
    T, B, H, W, Cin = x.shape
    wx, wh, b, wci, wcf, wco = params
    KH, KW, _, C4 = wx.shape
    Cout = C4 // 4
    HW = H * W

    if in_scale is not None:
        x = x * in_scale + in_shift            # BN affine; XLA fuses into conv

    # Gate pre-scales so each sigmoid becomes 0.5*tanh(pre)+0.5 in-kernel.
    s_g = 0.5 if activation == "sigmoid" else 1.0
    gate_scale = jnp.concatenate([
        jnp.full((2 * Cout,), 0.5, jnp.float32),
        jnp.full((Cout,), s_g, jnp.float32),
        jnp.full((Cout,), 0.5, jnp.float32)])

    # ---- X-path conv for ALL timesteps: hoisted off the serial critical path ----
    convx = lax.conv_general_dilated(
        x.reshape(T * B, H, W, Cin),
        wx * gate_scale,
        window_strides=(1, 1), padding="SAME",
        dimension_numbers=("NHWC", "HWIO", "NHWC"))
    convx = convx + (b.reshape(C4) * gate_scale)
    convx = convx.reshape(T, B, HW, C4).astype(jnp.float32)

    # ---- H-path operands (bf16 MXU weights, f32 accumulation in-kernel) ----
    wh_f = (wh * gate_scale).reshape(KH * KW * Cout, C4).astype(jnp.bfloat16)
    wcif3 = 0.5 * jnp.concatenate(
        [wci, wcf, jnp.zeros_like(wci)], axis=-1).astype(jnp.float32)
    wco_s = (0.5 * wco).astype(jnp.float32)

    target_m, prefer_split, kind = _device_hints()
    Bb = _pick_batch_block(B, HW, target_m, prefer_split)
    nb = B // Bb

    kernel = _make_recurrence_kernel(Bb, H, W, Cout, KH, KW, activation)

    h_seq, stats = pl.pallas_call(
        kernel,
        out_shape=(jax.ShapeDtypeStruct((T, B, HW, Cout), jnp.float32),
                   jax.ShapeDtypeStruct((nb, 2, Cout), jnp.float32)),
        grid_spec=pltpu.PrefetchScalarGridSpec(
            num_scalar_prefetch=0,
            grid=(nb, T),                       # serial time axis last
            in_specs=[
                pl.BlockSpec((1, Bb, HW, C4), lambda bi, t: (t, bi, 0, 0)),
                pl.BlockSpec(wh_f.shape, lambda bi, t: (0, 0)),
                pl.BlockSpec(wcif3.shape, lambda bi, t: (0, 0)),
                pl.BlockSpec(wco_s.shape, lambda bi, t: (0, 0)),
            ],
            out_specs=[
                pl.BlockSpec((1, Bb, HW, Cout), lambda bi, t: (t, bi, 0, 0)),
                pl.BlockSpec((1, 2, Cout), lambda bi, t: (bi, 0, 0)),
            ],
            scratch_shapes=[
                pltpu.VMEM((Bb, H, W, KH * KW * Cout), jnp.bfloat16),  # taps
                pltpu.VMEM((Bb, HW, Cout), jnp.float32),               # cell state
            ],
        ),
        compiler_params=pltpu.CompilerParams(
            dimension_semantics=("parallel", "arbitrary"),
            vmem_limit_bytes=_vmem_limit_bytes(Bb, HW, Cout, KH, KW, kind)),
    )(convx, wh_f, wcif3, wco_s)

    stats = jnp.sum(stats, axis=0)              # (2, Cout) over batch blocks
    return h_seq.reshape(T, B, H, W, Cout), stats


# ----------------------------------------------------------------------------
# Parameter init (deterministic, synthetic)
# ----------------------------------------------------------------------------
def init_convlstm_params(key, Cin, Cout, K, H, W):
    k1, k2, k3 = jax.random.split(key, 3)
    scale = 0.1
    wx = jax.random.normal(k1, (K, K, Cin, 4 * Cout), jnp.float32) * scale
    wh = jax.random.normal(k2, (K, K, Cout, 4 * Cout), jnp.float32) * scale
    b = jax.random.normal(k3, (1, 4 * Cout), jnp.float32) * scale
    HW = H * W
    # WeightsInitializer.Zeros -> peephole (Hadamard) weights start at zero.
    # NOTE: real PyTorch peepholes are stored (Cout, H, W); here they are kept
    # flattened as (HW, Cout) — transpose order must match if importing weights.
    wci = jnp.zeros((HW, Cout), jnp.float32)
    wcf = jnp.zeros((HW, Cout), jnp.float32)
    wco = jnp.zeros((HW, Cout), jnp.float32)
    return (wx, wh, b, wci, wcf, wco)


def init_seq2seq_params(key, num_channels, num_kernels, kernel_size, frame_size,
                        num_layers):
    H, W = frame_size
    keys = jax.random.split(key, num_layers + 1)
    layer_params, bn_params = [], []
    layer_params.append(
        init_convlstm_params(keys[0], num_channels, num_kernels, kernel_size, H, W))
    bn_params.append((jnp.ones((num_kernels,), jnp.float32),
                      jnp.zeros((num_kernels,), jnp.float32)))
    for li in range(1, num_layers):
        layer_params.append(
            init_convlstm_params(keys[li], num_kernels, num_kernels, kernel_size, H, W))
        bn_params.append((jnp.ones((num_kernels,), jnp.float32),
                          jnp.zeros((num_kernels,), jnp.float32)))
    layer_params.append(
        init_convlstm_params(keys[num_layers], num_kernels, num_channels,
                             kernel_size, H, W))
    return {"convlstm": layer_params, "batchnorm": bn_params}


# ----------------------------------------------------------------------------
# Seq2Seq forward
# ----------------------------------------------------------------------------
def seq2seq_forward(x_ncthw, params, activation="tanh", return_sequences=False,
                    eps=1e-5):
    """x_ncthw: (B, C, T, H, W) — same layout as the PyTorch module."""
    x = jnp.transpose(x_ncthw, (2, 0, 3, 4, 1)).astype(jnp.float32)  # (T,B,H,W,C)
    T, B, H, W, _ = x.shape
    layer_params = params["convlstm"]
    bn_params = params["batchnorm"]

    scale, shift = None, None
    n_hidden = len(layer_params) - 1
    for li in range(n_hidden):
        x, stats = convlstm_layer(x, layer_params[li], activation, scale, shift)
        # BatchNorm3d (training-mode batch statistics): the normalize-apply is
        # folded into the NEXT layer's input affine instead of a separate
        # HBM-round-trip kernel.
        gamma, beta = bn_params[li]
        n = float(T * B * H * W)
        mean = stats[0] / n
        var = stats[1] / n - mean * mean        # biased variance (PyTorch train)
        scale = gamma * lax.rsqrt(var + eps)
        shift = beta - mean * scale
    # Final ConvLSTM (sigmoid activation) consumes the last BN via the affine.
    x, _ = convlstm_layer(x, layer_params[-1], "sigmoid", scale, shift)

    out = jnp.transpose(x, (1, 4, 0, 2, 3))     # (B, C, T, H, W)
    if return_sequences:
        return out
    out = out[:, :, -1, :, :]                   # (B, C, H, W)
    Bo, Co, Ho, Wo = out.shape
    return out.reshape(Bo, Co, 1, Ho, Wo)
    # TODO(synk): BatchNorm3d running-stat buffer updates (training bookkeeping)
    # are not modeled; they do not affect the forward output in training mode.


if __name__ == "__main__":
    key = jax.random.PRNGKey(0)
    kx, kp = jax.random.split(key)

    # Small shapes consistent with the module's forward.
    B, C, T, H, W = 2, 4, 8, 8, 8            # batch, channels, seq, height, width
    num_kernels, kernel_size, num_layers = 32, 3, 2

    x = jax.random.normal(kx, (B, C, T, H, W), jnp.float32)
    params = init_seq2seq_params(kp, C, num_kernels, kernel_size, (H, W), num_layers)

    fwd = jax.jit(functools.partial(seq2seq_forward, activation="tanh",
                                    return_sequences=False))
    out = fwd(x, params)
    out = jax.block_until_ready(out)

    assert out.shape == (B, C, 1, H, W), out.shape
    assert bool(jnp.all(jnp.isfinite(out)))
    print("KERNEL_OK")
</pallas_src>

<mosaic_0001>
module attributes {stable_mosaic.version = 11 : i64} {
  func.func @kernel(%arg0: i32, %arg1: i32, %arg2: memref<1x1x64x128xf32, #tpu.memory_space<vmem>>, %arg3: memref<288x128xbf16, #tpu.memory_space<vmem>>, %arg4: memref<64x96xf32, #tpu.memory_space<vmem>>, %arg5: memref<64x32xf32, #tpu.memory_space<vmem>>, %arg6: memref<1x1x64x32xf32, #tpu.memory_space<vmem>>, %arg7: memref<1x2x32xf32, #tpu.memory_space<vmem>>, %arg8: memref<1x8x8x288xbf16, #tpu.memory_space<vmem>>, %arg9: memref<1x64x32xf32, #tpu.memory_space<vmem>>) attributes {dimension_semantics = [#tpu.dimension_semantics<parallel>, #tpu.dimension_semantics<arbitrary>], iteration_bounds = array<i64: 2, 8>, scalar_prefetch = 0 : i64, scratch_operands = 2 : i64, tpu.core_type = #tpu.core_type<tc>, window_params = [{transform_indices = @transform_0, window_bounds = array<i64: 1, 1, 64, 128>}, {pipeline_mode = #tpu.pipeline_mode<synchronous>, transform_indices = @transform_1, window_bounds = array<i64: 288, 128>}, {pipeline_mode = #tpu.pipeline_mode<synchronous>, transform_indices = @transform_2, window_bounds = array<i64: 64, 96>}, {pipeline_mode = #tpu.pipeline_mode<synchronous>, transform_indices = @transform_3, window_bounds = array<i64: 64, 32>}, {transform_indices = @transform_4, window_bounds = array<i64: 1, 1, 64, 32>}, {transform_indices = @transform_5, window_bounds = array<i64: 1, 2, 32>}]} {
    %c0_i32 = arith.constant 0 : i32
    %0 = arith.cmpi eq, %arg1, %c0_i32 : i32
    %1 = arith.extui %0 : i1 to i32
    %c0_i32_0 = arith.constant 0 : i32
    %2 = arith.cmpi ne, %1, %c0_i32_0 : i32
    scf.if %2 {
      %cst_72 = arith.constant 0.000000e+00 : bf16
      %90 = vector.broadcast %cst_72 : bf16 to vector<1x8x8x288xbf16>
      %c0_73 = arith.constant 0 : index
      %c0_74 = arith.constant 0 : index
      %c0_75 = arith.constant 0 : index
      %c0_76 = arith.constant 0 : index
      %91 = vector.load %arg8[%c0_73, %c0_74, %c0_75, %c0_76] : memref<1x8x8x288xbf16, #tpu.memory_space<vmem>>, vector<1x8x8x288xbf16>
      tpu.vector_store %arg8[%c0_73, %c0_74, %c0_75, %c0_76], %90 {strides = array<i32>} : memref<1x8x8x288xbf16, #tpu.memory_space<vmem>>, vector<1x8x8x288xbf16>,
      %cst_77 = arith.constant 0.000000e+00 : f32
      %92 = vector.broadcast %cst_77 : f32 to vector<1x64x32xf32>
      %c0_78 = arith.constant 0 : index
      %c0_79 = arith.constant 0 : index
      %c0_80 = arith.constant 0 : index
      %93 = vector.load %arg9[%c0_78, %c0_79, %c0_80] : memref<1x64x32xf32, #tpu.memory_space<vmem>>, vector<1x64x32xf32>
      tpu.vector_store %arg9[%c0_78, %c0_79, %c0_80], %92 {strides = array<i32>} : memref<1x64x32xf32, #tpu.memory_space<vmem>>, vector<1x64x32xf32>,
      %cst_81 = arith.constant 0.000000e+00 : f32
      %94 = vector.broadcast %cst_81 : f32 to vector<1x2x32xf32>
      %c0_82 = arith.constant 0 : index
      %c0_83 = arith.constant 0 : index
      %c0_84 = arith.constant 0 : index
      %95 = vector.load %arg7[%c0_82, %c0_83, %c0_84] : memref<1x2x32xf32, #tpu.memory_space<vmem>>, vector<1x2x32xf32>
      tpu.vector_store %arg7[%c0_82, %c0_83, %c0_84], %94 {strides = array<i32>} : memref<1x2x32xf32, #tpu.memory_space<vmem>>, vector<1x2x32xf32>,
    } else {
    }
    %c0 = arith.constant 0 : index
    %c0_1 = arith.constant 0 : index
    %c0_2 = arith.constant 0 : index
    %c0_3 = arith.constant 0 : index
    %3 = vector.load %arg8[%c0, %c0_1, %c0_2, %c0_3] : memref<1x8x8x288xbf16, #tpu.memory_space<vmem>>, vector<1x8x8x288xbf16>
    %4 = vector.shape_cast %3 : vector<1x8x8x288xbf16> to vector<64x288xbf16>
    %c0_4 = arith.constant 0 : index
    %c0_5 = arith.constant 0 : index
    %c0_6 = arith.constant 0 : index
    %c0_7 = arith.constant 0 : index
    %5 = vector.load %arg2[%c0_4, %c0_5, %c0_6, %c0_7] : memref<1x1x64x128xf32, #tpu.memory_space<vmem>>, vector<1x1x64x128xf32>
    %6 = vector.shape_cast %5 : vector<1x1x64x128xf32> to vector<1x64x128xf32>
    %c0_8 = arith.constant 0 : index
    %c0_9 = arith.constant 0 : index
    %7 = vector.load %arg3[%c0_8, %c0_9] : memref<288x128xbf16, #tpu.memory_space<vmem>>, vector<288x128xbf16>
    %cst = arith.constant dense<0.000000e+00> : vector<64x128xf32>
    %8 = tpu.matmul %4, %7, %cst {dimension_numbers = #tpu.dot_dimension_numbers<[1], [0], [0], [1], [0, 0, 1, 1], [], []>} : vector<64x288xbf16>, vector<288x128xbf16>, vector<64x128xf32> -> vector<64x128xf32>
    %9 = vector.shape_cast %8 : vector<64x128xf32> to vector<1x64x128xf32>
    %10 = arith.addf %6, %9 : vector<1x64x128xf32>
    %c0_10 = arith.constant 0 : index
    %c0_11 = arith.constant 0 : index
    %c0_12 = arith.constant 0 : index
    %11 = vector.load %arg9[%c0_10, %c0_11, %c0_12] : memref<1x64x32xf32, #tpu.memory_space<vmem>>, vector<1x64x32xf32>
    %c0_13 = arith.constant 0 : index
    %c0_14 = arith.constant 0 : index
    %12 = vector.load %arg4[%c0_13, %c0_14] : memref<64x96xf32, #tpu.memory_space<vmem>>, vector<64x96xf32>
    %c0_15 = arith.constant 0 : index
    %c0_16 = arith.constant 0 : index
    %13 = vector.load %arg5[%c0_15, %c0_16] : memref<64x32xf32, #tpu.memory_space<vmem>>, vector<64x32xf32>
    %14 = tpu.concatenate %11, %11, %11 in 2 : vector<1x64x32xf32>, vector<1x64x32xf32>, vector<1x64x32xf32> -> vector<1x64x96xf32>
    %15 = vector.extract_strided_slice %10 {offsets = [0, 0, 0], sizes = [1, 64, 96], strides = [1, 1, 1]} : vector<1x64x128xf32> to vector<1x64x96xf32>
    %16 = vector.shape_cast %12 : vector<64x96xf32> to vector<1x64x96xf32>
    %17 = arith.mulf %16, %14 : vector<1x64x96xf32>
    %18 = arith.addf %15, %17 : vector<1x64x96xf32>
    %19 = math.tanh %18 : vector<1x64x96xf32>
    %20 = vector.extract_strided_slice %19 {offsets = [0, 0, 0], sizes = [1, 64, 32], strides = [1, 1, 1]} : vector<1x64x96xf32> to vector<1x64x32xf32>
    %cst_17 = arith.constant 5.000000e-01 : f32
    %21 = vector.broadcast %cst_17 : f32 to vector<1x64x32xf32>
    %22 = arith.mulf %21, %20 : vector<1x64x32xf32>
    %cst_18 = arith.constant 5.000000e-01 : f32
    %23 = vector.broadcast %cst_18 : f32 to vector<1x64x32xf32>
    %24 = arith.addf %22, %23 : vector<1x64x32xf32>
    %25 = vector.extract_strided_slice %19 {offsets = [0, 0, 32], sizes = [1, 64, 32], strides = [1, 1, 1]} : vector<1x64x96xf32> to vector<1x64x32xf32>
    %cst_19 = arith.constant 5.000000e-01 : f32
    %26 = vector.broadcast %cst_19 : f32 to vector<1x64x32xf32>
    %27 = arith.mulf %26, %25 : vector<1x64x32xf32>
    %cst_20 = arith.constant 5.000000e-01 : f32
    %28 = vector.broadcast %cst_20 : f32 to vector<1x64x32xf32>
    %29 = arith.addf %27, %28 : vector<1x64x32xf32>
    %30 = vector.extract_strided_slice %19 {offsets = [0, 0, 64], sizes = [1, 64, 32], strides = [1, 1, 1]} : vector<1x64x96xf32> to vector<1x64x32xf32>
    %31 = arith.mulf %29, %11 : vector<1x64x32xf32>
    %32 = arith.mulf %24, %30 : vector<1x64x32xf32>
    %33 = arith.addf %31, %32 : vector<1x64x32xf32>
    %34 = vector.extract_strided_slice %10 {offsets = [0, 0, 96], sizes = [1, 64, 32], strides = [1, 1, 1]} : vector<1x64x128xf32> to vector<1x64x32xf32>
    %35 = vector.shape_cast %13 : vector<64x32xf32> to vector<1x64x32xf32>
    %36 = arith.mulf %35, %33 : vector<1x64x32xf32>
    %37 = arith.addf %34, %36 : vector<1x64x32xf32>
    %cst_21 = arith.constant 1.000000e+00 : f32
    %38 = vector.broadcast %cst_21 : f32 to vector<1x64x32xf32>
    %39 = arith.mulf %38, %33 : vector<1x64x32xf32>
    %40 = tpu.concatenate %37, %39 in 2 : vector<1x64x32xf32>, vector<1x64x32xf32> -> vector<1x64x64xf32>
    %41 = math.tanh %40 : vector<1x64x64xf32>
    %42 = vector.extract_strided_slice %41 {offsets = [0, 0, 0], sizes = [1, 64, 32], strides = [1, 1, 1]} : vector<1x64x64xf32> to vector<1x64x32xf32>
    %cst_22 = arith.constant 5.000000e-01 : f32
    %43 = vector.broadcast %cst_22 : f32 to vector<1x64x32xf32>
    %44 = arith.mulf %43, %42 : vector<1x64x32xf32>
    %cst_23 = arith.constant 5.000000e-01 : f32
    %45 = vector.broadcast %cst_23 : f32 to vector<1x64x32xf32>
    %46 = arith.addf %44, %45 : vector<1x64x32xf32>
    %47 = vector.extract_strided_slice %41 {offsets = [0, 0, 32], sizes = [1, 64, 32], strides = [1, 1, 1]} : vector<1x64x64xf32> to vector<1x64x32xf32>
    %48 = arith.mulf %46, %47 : vector<1x64x32xf32>
    %c0_24 = arith.constant 0 : index
    %c0_25 = arith.constant 0 : index
    %c0_26 = arith.constant 0 : index
    %49 = vector.load %arg9[%c0_24, %c0_25, %c0_26] : memref<1x64x32xf32, #tpu.memory_space<vmem>>, vector<1x64x32xf32>
    tpu.vector_store %arg9[%c0_24, %c0_25, %c0_26], %33 {strides = array<i32>} : memref<1x64x32xf32, #tpu.memory_space<vmem>>, vector<1x64x32xf32>,
    %c0_27 = arith.constant 0 : index
    %c0_28 = arith.constant 0 : index
    %c0_29 = arith.constant 0 : index
    %c0_30 = arith.constant 0 : index
    %50 = vector.load %arg6[%c0_27, %c0_28, %c0_29, %c0_30] : memref<1x1x64x32xf32, #tpu.memory_space<vmem>>, vector<1x1x64x32xf32>
    %51 = vector.shape_cast %50 : vector<1x1x64x32xf32> to vector<1x64x32xf32>
    %52 = vector.shape_cast %48 : vector<1x64x32xf32> to vector<1x1x64x32xf32>
    tpu.vector_store %arg6[%c0_27, %c0_28, %c0_29, %c0_30], %52 {strides = array<i32>} : memref<1x1x64x32xf32, #tpu.memory_space<vmem>>, vector<1x1x64x32xf32>,
    %53 = vector.shape_cast %48 : vector<1x64x32xf32> to vector<1x8x8x32xf32>
    %54 = arith.truncf %53 : vector<1x8x8x32xf32> to vector<1x8x8x32xbf16>
    %55 = vector.extract_strided_slice %54 {offsets = [0, 0, 0, 0], sizes = [1, 7, 7, 32], strides = [1, 1, 1, 1]} : vector<1x8x8x32xbf16> to vector<1x7x7x32xbf16>
    %c0_31 = arith.constant 0 : index
    %c1 = arith.constant 1 : index
    %c1_32 = arith.constant 1 : index
    %c0_33 = arith.constant 0 : index
    %56 = vector.load %arg8[%c0_31, %c1, %c1_32, %c0_33] : memref<1x8x8x288xbf16, #tpu.memory_space<vmem>>, vector<1x7x7x32xbf16>
    tpu.vector_store %arg8[%c0_31, %c1, %c1_32, %c0_33], %55 {strides = array<i32>} : memref<1x8x8x288xbf16, #tpu.memory_space<vmem>>, vector<1x7x7x32xbf16>,
    %57 = vector.extract_strided_slice %54 {offsets = [0, 0, 0, 0], sizes = [1, 7, 8, 32], strides = [1, 1, 1, 1]} : vector<1x8x8x32xbf16> to vector<1x7x8x32xbf16>
    %c0_34 = arith.constant 0 : index
    %c1_35 = arith.constant 1 : index
    %c0_36 = arith.constant 0 : index
    %c32 = arith.constant 32 : index
    %58 = vector.load %arg8[%c0_34, %c1_35, %c0_36, %c32] : memref<1x8x8x288xbf16, #tpu.memory_space<vmem>>, vector<1x7x8x32xbf16>
    tpu.vector_store %arg8[%c0_34, %c1_35, %c0_36, %c32], %57 {strides = array<i32>} : memref<1x8x8x288xbf16, #tpu.memory_space<vmem>>, vector<1x7x8x32xbf16>,
    %59 = vector.extract_strided_slice %54 {offsets = [0, 0, 1, 0], sizes = [1, 7, 7, 32], strides = [1, 1, 1, 1]} : vector<1x8x8x32xbf16> to vector<1x7x7x32xbf16>
    %c0_37 = arith.constant 0 : index
    %c1_38 = arith.constant 1 : index
    %c0_39 = arith.constant 0 : index
    %c64 = arith.constant 64 : index
    %60 = vector.load %arg8[%c0_37, %c1_38, %c0_39, %c64] : memref<1x8x8x288xbf16, #tpu.memory_space<vmem>>, vector<1x7x7x32xbf16>
    tpu.vector_store %arg8[%c0_37, %c1_38, %c0_39, %c64], %59 {strides = array<i32>} : memref<1x8x8x288xbf16, #tpu.memory_space<vmem>>, vector<1x7x7x32xbf16>,
    %61 = vector.extract_strided_slice %54 {offsets = [0, 0, 0, 0], sizes = [1, 8, 7, 32], strides = [1, 1, 1, 1]} : vector<1x8x8x32xbf16> to vector<1x8x7x32xbf16>
    %c0_40 = arith.constant 0 : index
    %c0_41 = arith.constant 0 : index
    %c1_42 = arith.constant 1 : index
    %c96 = arith.constant 96 : index
    %62 = vector.load %arg8[%c0_40, %c0_41, %c1_42, %c96] : memref<1x8x8x288xbf16, #tpu.memory_space<vmem>>, vector<1x8x7x32xbf16>
    tpu.vector_store %arg8[%c0_40, %c0_41, %c1_42, %c96], %61 {strides = array<i32>} : memref<1x8x8x288xbf16, #tpu.memory_space<vmem>>, vector<1x8x7x32xbf16>,
    %c0_43 = arith.constant 0 : index
    %c0_44 = arith.constant 0 : index
    %c0_45 = arith.constant 0 : index
    %c128 = arith.constant 128 : index
    %63 = vector.load %arg8[%c0_43, %c0_44, %c0_45, %c128] : memref<1x8x8x288xbf16, #tpu.memory_space<vmem>>, vector<1x8x8x32xbf16>
    tpu.vector_store %arg8[%c0_43, %c0_44, %c0_45, %c128], %54 {strides = array<i32>} : memref<1x8x8x288xbf16, #tpu.memory_space<vmem>>, vector<1x8x8x32xbf16>,
    %64 = vector.extract_strided_slice %54 {offsets = [0, 0, 1, 0], sizes = [1, 8, 7, 32], strides = [1, 1, 1, 1]} : vector<1x8x8x32xbf16> to vector<1x8x7x32xbf16>
    %c0_46 = arith.constant 0 : index
    %c0_47 = arith.constant 0 : index
    %c0_48 = arith.constant 0 : index
    %c160 = arith.constant 160 : index
    %65 = vector.load %arg8[%c0_46, %c0_47, %c0_48, %c160] : memref<1x8x8x288xbf16, #tpu.memory_space<vmem>>, vector<1x8x7x32xbf16>
    tpu.vector_store %arg8[%c0_46, %c0_47, %c0_48, %c160], %64 {strides = array<i32>} : memref<1x8x8x288xbf16, #tpu.memory_space<vmem>>, vector<1x8x7x32xbf16>,
    %66 = vector.extract_strided_slice %54 {offsets = [0, 1, 0, 0], sizes = [1, 7, 7, 32], strides = [1, 1, 1, 1]} : vector<1x8x8x32xbf16> to vector<1x7x7x32xbf16>
    %c0_49 = arith.constant 0 : index
    %c0_50 = arith.constant 0 : index
    %c1_51 = arith.constant 1 : index
    %c192 = arith.constant 192 : index
    %67 = vector.load %arg8[%c0_49, %c0_50, %c1_51, %c192] : memref<1x8x8x288xbf16, #tpu.memory_space<vmem>>, vector<1x7x7x32xbf16>
    tpu.vector_store %arg8[%c0_49, %c0_50, %c1_51, %c192], %66 {strides = array<i32>} : memref<1x8x8x288xbf16, #tpu.memory_space<vmem>>, vector<1x7x7x32xbf16>,
    %68 = vector.extract_strided_slice %54 {offsets = [0, 1, 0, 0], sizes = [1, 7, 8, 32], strides = [1, 1, 1, 1]} : vector<1x8x8x32xbf16> to vector<1x7x8x32xbf16>
    %c0_52 = arith.constant 0 : index
    %c0_53 = arith.constant 0 : index
    %c0_54 = arith.constant 0 : index
    %c224 = arith.constant 224 : index
    %69 = vector.load %arg8[%c0_52, %c0_53, %c0_54, %c224] : memref<1x8x8x288xbf16, #tpu.memory_space<vmem>>, vector<1x7x8x32xbf16>
    tpu.vector_store %arg8[%c0_52, %c0_53, %c0_54, %c224], %68 {strides = array<i32>} : memref<1x8x8x288xbf16, #tpu.memory_space<vmem>>, vector<1x7x8x32xbf16>,
    %70 = vector.extract_strided_slice %54 {offsets = [0, 1, 1, 0], sizes = [1, 7, 7, 32], strides = [1, 1, 1, 1]} : vector<1x8x8x32xbf16> to vector<1x7x7x32xbf16>
    %c0_55 = arith.constant 0 : index
    %c0_56 = arith.constant 0 : index
    %c0_57 = arith.constant 0 : index
    %c256 = arith.constant 256 : index
    %71 = vector.load %arg8[%c0_55, %c0_56, %c0_57, %c256] : memref<1x8x8x288xbf16, #tpu.memory_space<vmem>>, vector<1x7x7x32xbf16>
    tpu.vector_store %arg8[%c0_55, %c0_56, %c0_57, %c256], %70 {strides = array<i32>} : memref<1x8x8x288xbf16, #tpu.memory_space<vmem>>, vector<1x7x7x32xbf16>,
    %72 = vector.shape_cast %48 : vector<1x64x32xf32> to vector<64x32xf32>
    %c0_58 = arith.constant 0 : index
    %c0_59 = arith.constant 0 : index
    %c0_60 = arith.constant 0 : index
    %73 = vector.load %arg7[%c0_58, %c0_59, %c0_60] : memref<1x2x32xf32, #tpu.memory_space<vmem>>, vector<1x1x32xf32>
    %74 = vector.shape_cast %73 : vector<1x1x32xf32> to vector<1x32xf32>
    %cst_61 = arith.constant dense<0.000000e+00> : vector<32xf32>
    %75 = vector.multi_reduction <add>, %72, %cst_61 [0] : vector<64x32xf32> to vector<32xf32>
    %76 = vector.shape_cast %75 : vector<32xf32> to vector<1x32xf32>
    %77 = arith.addf %74, %76 : vector<1x32xf32>
    %c0_62 = arith.constant 0 : index
    %c0_63 = arith.constant 0 : index
    %c0_64 = arith.constant 0 : index
    %78 = vector.load %arg7[%c0_62, %c0_63, %c0_64] : memref<1x2x32xf32, #tpu.memory_space<vmem>>, vector<1x1x32xf32>
    %79 = vector.shape_cast %78 : vector<1x1x32xf32> to vector<1x32xf32>
    %80 = vector.shape_cast %77 : vector<1x32xf32> to vector<1x1x32xf32>
    tpu.vector_store %arg7[%c0_62, %c0_63, %c0_64], %80 {strides = array<i32>} : memref<1x2x32xf32, #tpu.memory_space<vmem>>, vector<1x1x32xf32>,
    %c0_65 = arith.constant 0 : index
    %c1_66 = arith.constant 1 : index
    %c0_67 = arith.constant 0 : index
    %81 = vector.load %arg7[%c0_65, %c1_66, %c0_67] : memref<1x2x32xf32, #tpu.memory_space<vmem>>, vector<1x1x32xf32>
    %82 = vector.shape_cast %81 : vector<1x1x32xf32> to vector<1x32xf32>
    %83 = arith.mulf %72, %72 : vector<64x32xf32>
    %cst_68 = arith.constant dense<0.000000e+00> : vector<32xf32>
    %84 = vector.multi_reduction <add>, %83, %cst_68 [0] : vector<64x32xf32> to vector<32xf32>
    %85 = vector.shape_cast %84 : vector<32xf32> to vector<1x32xf32>
    %86 = arith.addf %82, %85 : vector<1x32xf32>
    %c0_69 = arith.constant 0 : index
    %c1_70 = arith.constant 1 : index
    %c0_71 = arith.constant 0 : index
    %87 = vector.load %arg7[%c0_69, %c1_70, %c0_71] : memref<1x2x32xf32, #tpu.memory_space<vmem>>, vector<1x1x32xf32>
    %88 = vector.shape_cast %87 : vector<1x1x32xf32> to vector<1x32xf32>
    %89 = vector.shape_cast %86 : vector<1x32xf32> to vector<1x1x32xf32>
    tpu.vector_store %arg7[%c0_69, %c1_70, %c0_71], %89 {strides = array<i32>} : memref<1x2x32xf32, #tpu.memory_space<vmem>>, vector<1x1x32xf32>,
    return
  }
  func.func @transform_0(%arg0: i32, %arg1: i32) -> (i32, i32, i32, i32) {
    %c0_i32 = arith.constant 0 : i32
    %c0_i32_0 = arith.constant 0 : i32
    %c0_i32_1 = arith.constant 0 : i32
    return %arg1, %arg0, %c0_i32, %c0_i32_0 : i32, i32, i32, i32
  }
  func.func @transform_1(%arg0: i32, %arg1: i32) -> (i32, i32) {
    %c0_i32 = arith.constant 0 : i32
    %c0_i32_0 = arith.constant 0 : i32
    %c0_i32_1 = arith.constant 0 : i32
    return %c0_i32, %c0_i32_0 : i32, i32
  }
  func.func @transform_2(%arg0: i32, %arg1: i32) -> (i32, i32) {
    %c0_i32 = arith.constant 0 : i32
    %c0_i32_0 = arith.constant 0 : i32
    %c0_i32_1 = arith.constant 0 : i32
    return %c0_i32, %c0_i32_0 : i32, i32
  }
  func.func @transform_3(%arg0: i32, %arg1: i32) -> (i32, i32) {
    %c0_i32 = arith.constant 0 : i32
    %c0_i32_0 = arith.constant 0 : i32
    %c0_i32_1 = arith.constant 0 : i32
    return %c0_i32, %c0_i32_0 : i32, i32
  }
  func.func @transform_4(%arg0: i32, %arg1: i32) -> (i32, i32, i32, i32) {
    %c0_i32 = arith.constant 0 : i32
    %c0_i32_0 = arith.constant 0 : i32
    %c0_i32_1 = arith.constant 0 : i32
    return %arg1, %arg0, %c0_i32, %c0_i32_0 : i32, i32, i32, i32
  }
  func.func @transform_5(%arg0: i32, %arg1: i32) -> (i32, i32, i32) {
    %c0_i32 = arith.constant 0 : i32
    %c0_i32_0 = arith.constant 0 : i32
    %c0_i32_1 = arith.constant 0 : i32
    return %arg0, %c0_i32, %c0_i32_0 : i32, i32, i32
  }
}

module attributes {stable_mosaic.version = 11 : i64} {
  func.func @kernel(%arg0: i32, %arg1: i32, %arg2: memref<1x1x64x16xf32, #tpu.memory_space<vmem>>, %arg3: memref<36x16xbf16, #tpu.memory_space<vmem>>, %arg4: memref<64x12xf32, #tpu.memory_space<vmem>>, %arg5: memref<64x4xf32, #tpu.memory_space<vmem>>, %arg6: memref<1x1x64x4xf32, #tpu.memory_space<vmem>>, %arg7: memref<1x2x4xf32, #tpu.memory_space<vmem>>, %arg8: memref<1x8x8x36xbf16, #tpu.memory_space<vmem>>, %arg9: memref<1x64x4xf32, #tpu.memory_space<vmem>>) attributes {dimension_semantics = [#tpu.dimension_semantics<parallel>, #tpu.dimension_semantics<arbitrary>], iteration_bounds = array<i64: 2, 8>, scalar_prefetch = 0 : i64, scratch_operands = 2 : i64, tpu.core_type = #tpu.core_type<tc>, window_params = [{transform_indices = @transform_0, window_bounds = array<i64: 1, 1, 64, 16>}, {pipeline_mode = #tpu.pipeline_mode<synchronous>, transform_indices = @transform_1, window_bounds = array<i64: 36, 16>}, {pipeline_mode = #tpu.pipeline_mode<synchronous>, transform_indices = @transform_2, window_bounds = array<i64: 64, 12>}, {pipeline_mode = #tpu.pipeline_mode<synchronous>, transform_indices = @transform_3, window_bounds = array<i64: 64, 4>}, {transform_indices = @transform_4, window_bounds = array<i64: 1, 1, 64, 4>}, {transform_indices = @transform_5, window_bounds = array<i64: 1, 2, 4>}]} {
    %c0_i32 = arith.constant 0 : i32
    %0 = arith.cmpi eq, %arg1, %c0_i32 : i32
    %1 = arith.extui %0 : i1 to i32
    %c0_i32_0 = arith.constant 0 : i32
    %2 = arith.cmpi ne, %1, %c0_i32_0 : i32
    scf.if %2 {
      %cst_76 = arith.constant 0.000000e+00 : bf16
      %98 = vector.broadcast %cst_76 : bf16 to vector<1x8x8x36xbf16>
      %c0_77 = arith.constant 0 : index
      %c0_78 = arith.constant 0 : index
      %c0_79 = arith.constant 0 : index
      %c0_80 = arith.constant 0 : index
      %99 = vector.load %arg8[%c0_77, %c0_78, %c0_79, %c0_80] : memref<1x8x8x36xbf16, #tpu.memory_space<vmem>>, vector<1x8x8x36xbf16>
      tpu.vector_store %arg8[%c0_77, %c0_78, %c0_79, %c0_80], %98 {strides = array<i32>} : memref<1x8x8x36xbf16, #tpu.memory_space<vmem>>, vector<1x8x8x36xbf16>,
      %cst_81 = arith.constant 0.000000e+00 : f32
      %100 = vector.broadcast %cst_81 : f32 to vector<1x64x4xf32>
      %c0_82 = arith.constant 0 : index
      %c0_83 = arith.constant 0 : index
      %c0_84 = arith.constant 0 : index
      %101 = vector.load %arg9[%c0_82, %c0_83, %c0_84] : memref<1x64x4xf32, #tpu.memory_space<vmem>>, vector<1x64x4xf32>
      tpu.vector_store %arg9[%c0_82, %c0_83, %c0_84], %100 {strides = array<i32>} : memref<1x64x4xf32, #tpu.memory_space<vmem>>, vector<1x64x4xf32>,
      %cst_85 = arith.constant 0.000000e+00 : f32
      %102 = vector.broadcast %cst_85 : f32 to vector<1x2x4xf32>
      %c0_86 = arith.constant 0 : index
      %c0_87 = arith.constant 0 : index
      %c0_88 = arith.constant 0 : index
      %103 = vector.load %arg7[%c0_86, %c0_87, %c0_88] : memref<1x2x4xf32, #tpu.memory_space<vmem>>, vector<1x2x4xf32>
      tpu.vector_store %arg7[%c0_86, %c0_87, %c0_88], %102 {strides = array<i32>} : memref<1x2x4xf32, #tpu.memory_space<vmem>>, vector<1x2x4xf32>,
    } else {
    }
    %c0 = arith.constant 0 : index
    %c0_1 = arith.constant 0 : index
    %c0_2 = arith.constant 0 : index
    %c0_3 = arith.constant 0 : index
    %3 = vector.load %arg8[%c0, %c0_1, %c0_2, %c0_3] : memref<1x8x8x36xbf16, #tpu.memory_space<vmem>>, vector<1x8x8x36xbf16>
    %4 = vector.shape_cast %3 : vector<1x8x8x36xbf16> to vector<64x36xbf16>
    %c0_4 = arith.constant 0 : index
    %c0_5 = arith.constant 0 : index
    %c0_6 = arith.constant 0 : index
    %c0_7 = arith.constant 0 : index
    %5 = vector.load %arg2[%c0_4, %c0_5, %c0_6, %c0_7] : memref<1x1x64x16xf32, #tpu.memory_space<vmem>>, vector<1x1x64x16xf32>
    %6 = vector.shape_cast %5 : vector<1x1x64x16xf32> to vector<1x64x16xf32>
    %c0_8 = arith.constant 0 : index
    %c0_9 = arith.constant 0 : index
    %7 = vector.load %arg3[%c0_8, %c0_9] : memref<36x16xbf16, #tpu.memory_space<vmem>>, vector<36x16xbf16>
    %cst = arith.constant dense<0.000000e+00> : vector<64x16xf32>
    %8 = tpu.matmul %4, %7, %cst {dimension_numbers = #tpu.dot_dimension_numbers<[1], [0], [0], [1], [0, 0, 1, 1], [], []>} : vector<64x36xbf16>, vector<36x16xbf16>, vector<64x16xf32> -> vector<64x16xf32>
    %9 = vector.shape_cast %8 : vector<64x16xf32> to vector<1x64x16xf32>
    %10 = arith.addf %6, %9 : vector<1x64x16xf32>
    %c0_10 = arith.constant 0 : index
    %c0_11 = arith.constant 0 : index
    %c0_12 = arith.constant 0 : index
    %11 = vector.load %arg9[%c0_10, %c0_11, %c0_12] : memref<1x64x4xf32, #tpu.memory_space<vmem>>, vector<1x64x4xf32>
    %c0_13 = arith.constant 0 : index
    %c0_14 = arith.constant 0 : index
    %12 = vector.load %arg4[%c0_13, %c0_14] : memref<64x12xf32, #tpu.memory_space<vmem>>, vector<64x12xf32>
    %c0_15 = arith.constant 0 : index
    %c0_16 = arith.constant 0 : index
    %13 = vector.load %arg5[%c0_15, %c0_16] : memref<64x4xf32, #tpu.memory_space<vmem>>, vector<64x4xf32>
    %14 = tpu.concatenate %11, %11, %11 in 2 : vector<1x64x4xf32>, vector<1x64x4xf32>, vector<1x64x4xf32> -> vector<1x64x12xf32>
    %15 = vector.extract_strided_slice %10 {offsets = [0, 0, 0], sizes = [1, 64, 12], strides = [1, 1, 1]} : vector<1x64x16xf32> to vector<1x64x12xf32>
    %16 = vector.shape_cast %12 : vector<64x12xf32> to vector<1x64x12xf32>
    %17 = arith.mulf %16, %14 : vector<1x64x12xf32>
    %18 = arith.addf %15, %17 : vector<1x64x12xf32>
    %19 = math.tanh %18 : vector<1x64x12xf32>
    %20 = vector.extract_strided_slice %19 {offsets = [0, 0, 0], sizes = [1, 64, 4], strides = [1, 1, 1]} : vector<1x64x12xf32> to vector<1x64x4xf32>
    %cst_17 = arith.constant 5.000000e-01 : f32
    %21 = vector.broadcast %cst_17 : f32 to vector<1x64x4xf32>
    %22 = arith.mulf %21, %20 : vector<1x64x4xf32>
    %cst_18 = arith.constant 5.000000e-01 : f32
    %23 = vector.broadcast %cst_18 : f32 to vector<1x64x4xf32>
    %24 = arith.addf %22, %23 : vector<1x64x4xf32>
    %25 = vector.extract_strided_slice %19 {offsets = [0, 0, 4], sizes = [1, 64, 4], strides = [1, 1, 1]} : vector<1x64x12xf32> to vector<1x64x4xf32>
    %cst_19 = arith.constant 5.000000e-01 : f32
    %26 = vector.broadcast %cst_19 : f32 to vector<1x64x4xf32>
    %27 = arith.mulf %26, %25 : vector<1x64x4xf32>
    %cst_20 = arith.constant 5.000000e-01 : f32
    %28 = vector.broadcast %cst_20 : f32 to vector<1x64x4xf32>
    %29 = arith.addf %27, %28 : vector<1x64x4xf32>
    %30 = vector.extract_strided_slice %19 {offsets = [0, 0, 8], sizes = [1, 64, 4], strides = [1, 1, 1]} : vector<1x64x12xf32> to vector<1x64x4xf32>
    %cst_21 = arith.constant 5.000000e-01 : f32
    %31 = vector.broadcast %cst_21 : f32 to vector<1x64x4xf32>
    %32 = arith.mulf %31, %30 : vector<1x64x4xf32>
    %cst_22 = arith.constant 5.000000e-01 : f32
    %33 = vector.broadcast %cst_22 : f32 to vector<1x64x4xf32>
    %34 = arith.addf %32, %33 : vector<1x64x4xf32>
    %35 = arith.mulf %29, %11 : vector<1x64x4xf32>
    %36 = arith.mulf %24, %34 : vector<1x64x4xf32>
    %37 = arith.addf %35, %36 : vector<1x64x4xf32>
    %38 = vector.extract_strided_slice %10 {offsets = [0, 0, 12], sizes = [1, 64, 4], strides = [1, 1, 1]} : vector<1x64x16xf32> to vector<1x64x4xf32>
    %39 = vector.shape_cast %13 : vector<64x4xf32> to vector<1x64x4xf32>
    %40 = arith.mulf %39, %37 : vector<1x64x4xf32>
    %41 = arith.addf %38, %40 : vector<1x64x4xf32>
    %cst_23 = arith.constant 5.000000e-01 : f32
    %42 = vector.broadcast %cst_23 : f32 to vector<1x64x4xf32>
    %43 = arith.mulf %42, %37 : vector<1x64x4xf32>
    %44 = tpu.concatenate %41, %43 in 2 : vector<1x64x4xf32>, vector<1x64x4xf32> -> vector<1x64x8xf32>
    %45 = math.tanh %44 : vector<1x64x8xf32>
    %46 = vector.extract_strided_slice %45 {offsets = [0, 0, 0], sizes = [1, 64, 4], strides = [1, 1, 1]} : vector<1x64x8xf32> to vector<1x64x4xf32>
    %cst_24 = arith.constant 5.000000e-01 : f32
    %47 = vector.broadcast %cst_24 : f32 to vector<1x64x4xf32>
    %48 = arith.mulf %47, %46 : vector<1x64x4xf32>
    %cst_25 = arith.constant 5.000000e-01 : f32
    %49 = vector.broadcast %cst_25 : f32 to vector<1x64x4xf32>
    %50 = arith.addf %48, %49 : vector<1x64x4xf32>
    %51 = vector.extract_strided_slice %45 {offsets = [0, 0, 4], sizes = [1, 64, 4], strides = [1, 1, 1]} : vector<1x64x8xf32> to vector<1x64x4xf32>
    %cst_26 = arith.constant 5.000000e-01 : f32
    %52 = vector.broadcast %cst_26 : f32 to vector<1x64x4xf32>
    %53 = arith.mulf %52, %51 : vector<1x64x4xf32>
    %cst_27 = arith.constant 5.000000e-01 : f32
    %54 = vector.broadcast %cst_27 : f32 to vector<1x64x4xf32>
    %55 = arith.addf %53, %54 : vector<1x64x4xf32>
    %56 = arith.mulf %50, %55 : vector<1x64x4xf32>
    %c0_28 = arith.constant 0 : index
    %c0_29 = arith.constant 0 : index
    %c0_30 = arith.constant 0 : index
    %57 = vector.load %arg9[%c0_28, %c0_29, %c0_30] : memref<1x64x4xf32, #tpu.memory_space<vmem>>, vector<1x64x4xf32>
    tpu.vector_store %arg9[%c0_28, %c0_29, %c0_30], %37 {strides = array<i32>} : memref<1x64x4xf32, #tpu.memory_space<vmem>>, vector<1x64x4xf32>,
    %c0_31 = arith.constant 0 : index
    %c0_32 = arith.constant 0 : index
    %c0_33 = arith.constant 0 : index
    %c0_34 = arith.constant 0 : index
    %58 = vector.load %arg6[%c0_31, %c0_32, %c0_33, %c0_34] : memref<1x1x64x4xf32, #tpu.memory_space<vmem>>, vector<1x1x64x4xf32>
    %59 = vector.shape_cast %58 : vector<1x1x64x4xf32> to vector<1x64x4xf32>
    %60 = vector.shape_cast %56 : vector<1x64x4xf32> to vector<1x1x64x4xf32>
    tpu.vector_store %arg6[%c0_31, %c0_32, %c0_33, %c0_34], %60 {strides = array<i32>} : memref<1x1x64x4xf32, #tpu.memory_space<vmem>>, vector<1x1x64x4xf32>,
    %61 = vector.shape_cast %56 : vector<1x64x4xf32> to vector<1x8x8x4xf32>
    %62 = arith.truncf %61 : vector<1x8x8x4xf32> to vector<1x8x8x4xbf16>
    %63 = vector.extract_strided_slice %62 {offsets = [0, 0, 0, 0], sizes = [1, 7, 7, 4], strides = [1, 1, 1, 1]} : vector<1x8x8x4xbf16> to vector<1x7x7x4xbf16>
    %c0_35 = arith.constant 0 : index
    %c1 = arith.constant 1 : index
    %c1_36 = arith.constant 1 : index
    %c0_37 = arith.constant 0 : index
    %64 = vector.load %arg8[%c0_35, %c1, %c1_36, %c0_37] : memref<1x8x8x36xbf16, #tpu.memory_space<vmem>>, vector<1x7x7x4xbf16>
    tpu.vector_store %arg8[%c0_35, %c1, %c1_36, %c0_37], %63 {strides = array<i32>} : memref<1x8x8x36xbf16, #tpu.memory_space<vmem>>, vector<1x7x7x4xbf16>,
    %65 = vector.extract_strided_slice %62 {offsets = [0, 0, 0, 0], sizes = [1, 7, 8, 4], strides = [1, 1, 1, 1]} : vector<1x8x8x4xbf16> to vector<1x7x8x4xbf16>
    %c0_38 = arith.constant 0 : index
    %c1_39 = arith.constant 1 : index
    %c0_40 = arith.constant 0 : index
    %c4 = arith.constant 4 : index
    %66 = vector.load %arg8[%c0_38, %c1_39, %c0_40, %c4] : memref<1x8x8x36xbf16, #tpu.memory_space<vmem>>, vector<1x7x8x4xbf16>
    tpu.vector_store %arg8[%c0_38, %c1_39, %c0_40, %c4], %65 {strides = array<i32>} : memref<1x8x8x36xbf16, #tpu.memory_space<vmem>>, vector<1x7x8x4xbf16>,
    %67 = vector.extract_strided_slice %62 {offsets = [0, 0, 1, 0], sizes = [1, 7, 7, 4], strides = [1, 1, 1, 1]} : vector<1x8x8x4xbf16> to vector<1x7x7x4xbf16>
    %c0_41 = arith.constant 0 : index
    %c1_42 = arith.constant 1 : index
    %c0_43 = arith.constant 0 : index
    %c8 = arith.constant 8 : index
    %68 = vector.load %arg8[%c0_41, %c1_42, %c0_43, %c8] : memref<1x8x8x36xbf16, #tpu.memory_space<vmem>>, vector<1x7x7x4xbf16>
    tpu.vector_store %arg8[%c0_41, %c1_42, %c0_43, %c8], %67 {strides = array<i32>} : memref<1x8x8x36xbf16, #tpu.memory_space<vmem>>, vector<1x7x7x4xbf16>,
    %69 = vector.extract_strided_slice %62 {offsets = [0, 0, 0, 0], sizes = [1, 8, 7, 4], strides = [1, 1, 1, 1]} : vector<1x8x8x4xbf16> to vector<1x8x7x4xbf16>
    %c0_44 = arith.constant 0 : index
    %c0_45 = arith.constant 0 : index
    %c1_46 = arith.constant 1 : index
    %c12 = arith.constant 12 : index
    %70 = vector.load %arg8[%c0_44, %c0_45, %c1_46, %c12] : memref<1x8x8x36xbf16, #tpu.memory_space<vmem>>, vector<1x8x7x4xbf16>
    tpu.vector_store %arg8[%c0_44, %c0_45, %c1_46, %c12], %69 {strides = array<i32>} : memref<1x8x8x36xbf16, #tpu.memory_space<vmem>>, vector<1x8x7x4xbf16>,
    %c0_47 = arith.constant 0 : index
    %c0_48 = arith.constant 0 : index
    %c0_49 = arith.constant 0 : index
    %c16 = arith.constant 16 : index
    %71 = vector.load %arg8[%c0_47, %c0_48, %c0_49, %c16] : memref<1x8x8x36xbf16, #tpu.memory_space<vmem>>, vector<1x8x8x4xbf16>
    tpu.vector_store %arg8[%c0_47, %c0_48, %c0_49, %c16], %62 {strides = array<i32>} : memref<1x8x8x36xbf16, #tpu.memory_space<vmem>>, vector<1x8x8x4xbf16>,
    %72 = vector.extract_strided_slice %62 {offsets = [0, 0, 1, 0], sizes = [1, 8, 7, 4], strides = [1, 1, 1, 1]} : vector<1x8x8x4xbf16> to vector<1x8x7x4xbf16>
    %c0_50 = arith.constant 0 : index
    %c0_51 = arith.constant 0 : index
    %c0_52 = arith.constant 0 : index
    %c20 = arith.constant 20 : index
    %73 = vector.load %arg8[%c0_50, %c0_51, %c0_52, %c20] : memref<1x8x8x36xbf16, #tpu.memory_space<vmem>>, vector<1x8x7x4xbf16>
    tpu.vector_store %arg8[%c0_50, %c0_51, %c0_52, %c20], %72 {strides = array<i32>} : memref<1x8x8x36xbf16, #tpu.memory_space<vmem>>, vector<1x8x7x4xbf16>,
    %74 = vector.extract_strided_slice %62 {offsets = [0, 1, 0, 0], sizes = [1, 7, 7, 4], strides = [1, 1, 1, 1]} : vector<1x8x8x4xbf16> to vector<1x7x7x4xbf16>
    %c0_53 = arith.constant 0 : index
    %c0_54 = arith.constant 0 : index
    %c1_55 = arith.constant 1 : index
    %c24 = arith.constant 24 : index
    %75 = vector.load %arg8[%c0_53, %c0_54, %c1_55, %c24] : memref<1x8x8x36xbf16, #tpu.memory_space<vmem>>, vector<1x7x7x4xbf16>
    tpu.vector_store %arg8[%c0_53, %c0_54, %c1_55, %c24], %74 {strides = array<i32>} : memref<1x8x8x36xbf16, #tpu.memory_space<vmem>>, vector<1x7x7x4xbf16>,
    %76 = vector.extract_strided_slice %62 {offsets = [0, 1, 0, 0], sizes = [1, 7, 8, 4], strides = [1, 1, 1, 1]} : vector<1x8x8x4xbf16> to vector<1x7x8x4xbf16>
    %c0_56 = arith.constant 0 : index
    %c0_57 = arith.constant 0 : index
    %c0_58 = arith.constant 0 : index
    %c28 = arith.constant 28 : index
    %77 = vector.load %arg8[%c0_56, %c0_57, %c0_58, %c28] : memref<1x8x8x36xbf16, #tpu.memory_space<vmem>>, vector<1x7x8x4xbf16>
    tpu.vector_store %arg8[%c0_56, %c0_57, %c0_58, %c28], %76 {strides = array<i32>} : memref<1x8x8x36xbf16, #tpu.memory_space<vmem>>, vector<1x7x8x4xbf16>,
    %78 = vector.extract_strided_slice %62 {offsets = [0, 1, 1, 0], sizes = [1, 7, 7, 4], strides = [1, 1, 1, 1]} : vector<1x8x8x4xbf16> to vector<1x7x7x4xbf16>
    %c0_59 = arith.constant 0 : index
    %c0_60 = arith.constant 0 : index
    %c0_61 = arith.constant 0 : index
    %c32 = arith.constant 32 : index
    %79 = vector.load %arg8[%c0_59, %c0_60, %c0_61, %c32] : memref<1x8x8x36xbf16, #tpu.memory_space<vmem>>, vector<1x7x7x4xbf16>
    tpu.vector_store %arg8[%c0_59, %c0_60, %c0_61, %c32], %78 {strides = array<i32>} : memref<1x8x8x36xbf16, #tpu.memory_space<vmem>>, vector<1x7x7x4xbf16>,
    %80 = vector.shape_cast %56 : vector<1x64x4xf32> to vector<64x4xf32>
    %c0_62 = arith.constant 0 : index
    %c0_63 = arith.constant 0 : index
    %c0_64 = arith.constant 0 : index
    %81 = vector.load %arg7[%c0_62, %c0_63, %c0_64] : memref<1x2x4xf32, #tpu.memory_space<vmem>>, vector<1x1x4xf32>
    %82 = vector.shape_cast %81 : vector<1x1x4xf32> to vector<1x4xf32>
    %cst_65 = arith.constant dense<0.000000e+00> : vector<4xf32>
    %83 = vector.multi_reduction <add>, %80, %cst_65 [0] : vector<64x4xf32> to vector<4xf32>
    %84 = vector.shape_cast %83 : vector<4xf32> to vector<1x4xf32>
    %85 = arith.addf %82, %84 : vector<1x4xf32>
    %c0_66 = arith.constant 0 : index
    %c0_67 = arith.constant 0 : index
    %c0_68 = arith.constant 0 : index
    %86 = vector.load %arg7[%c0_66, %c0_67, %c0_68] : memref<1x2x4xf32, #tpu.memory_space<vmem>>, vector<1x1x4xf32>
    %87 = vector.shape_cast %86 : vector<1x1x4xf32> to vector<1x4xf32>
    %88 = vector.shape_cast %85 : vector<1x4xf32> to vector<1x1x4xf32>
    tpu.vector_store %arg7[%c0_66, %c0_67, %c0_68], %88 {strides = array<i32>} : memref<1x2x4xf32, #tpu.memory_space<vmem>>, vector<1x1x4xf32>,
    %c0_69 = arith.constant 0 : index
    %c1_70 = arith.constant 1 : index
    %c0_71 = arith.constant 0 : index
    %89 = vector.load %arg7[%c0_69, %c1_70, %c0_71] : memref<1x2x4xf32, #tpu.memory_space<vmem>>, vector<1x1x4xf32>
    %90 = vector.shape_cast %89 : vector<1x1x4xf32> to vector<1x4xf32>
    %91 = arith.mulf %80, %80 : vector<64x4xf32>
    %cst_72 = arith.constant dense<0.000000e+00> : vector<4xf32>
    %92 = vector.multi_reduction <add>, %91, %cst_72 [0] : vector<64x4xf32> to vector<4xf32>
    %93 = vector.shape_cast %92 : vector<4xf32> to vector<1x4xf32>
    %94 = arith.addf %90, %93 : vector<1x4xf32>
    %c0_73 = arith.constant 0 : index
    %c1_74 = arith.constant 1 : index
    %c0_75 = arith.constant 0 : index
    %95 = vector.load %arg7[%c0_73, %c1_74, %c0_75] : memref<1x2x4xf32, #tpu.memory_space<vmem>>, vector<1x1x4xf32>
    %96 = vector.shape_cast %95 : vector<1x1x4xf32> to vector<1x4xf32>
    %97 = vector.shape_cast %94 : vector<1x4xf32> to vector<1x1x4xf32>
    tpu.vector_store %arg7[%c0_73, %c1_74, %c0_75], %97 {strides = array<i32>} : memref<1x2x4xf32, #tpu.memory_space<vmem>>, vector<1x1x4xf32>,
    return
  }
  func.func @transform_0(%arg0: i32, %arg1: i32) -> (i32, i32, i32, i32) {
    %c0_i32 = arith.constant 0 : i32
    %c0_i32_0 = arith.constant 0 : i32
    %c0_i32_1 = arith.constant 0 : i32
    return %arg1, %arg0, %c0_i32, %c0_i32_0 : i32, i32, i32, i32
  }
  func.func @transform_1(%arg0: i32, %arg1: i32) -> (i32, i32) {
    %c0_i32 = arith.constant 0 : i32
    %c0_i32_0 = arith.constant 0 : i32
    %c0_i32_1 = arith.constant 0 : i32
    return %c0_i32, %c0_i32_0 : i32, i32
  }
  func.func @transform_2(%arg0: i32, %arg1: i32) -> (i32, i32) {
    %c0_i32 = arith.constant 0 : i32
    %c0_i32_0 = arith.constant 0 : i32
    %c0_i32_1 = arith.constant 0 : i32
    return %c0_i32, %c0_i32_0 : i32, i32
  }
  func.func @transform_3(%arg0: i32, %arg1: i32) -> (i32, i32) {
    %c0_i32 = arith.constant 0 : i32
    %c0_i32_0 = arith.constant 0 : i32
    %c0_i32_1 = arith.constant 0 : i32
    return %c0_i32, %c0_i32_0 : i32, i32
  }
  func.func @transform_4(%arg0: i32, %arg1: i32) -> (i32, i32, i32, i32) {
    %c0_i32 = arith.constant 0 : i32
    %c0_i32_0 = arith.constant 0 : i32
    %c0_i32_1 = arith.constant 0 : i32
    return %arg1, %arg0, %c0_i32, %c0_i32_0 : i32, i32, i32, i32
  }
  func.func @transform_5(%arg0: i32, %arg1: i32) -> (i32, i32, i32) {
    %c0_i32 = arith.constant 0 : i32
    %c0_i32_0 = arith.constant 0 : i32
    %c0_i32_1 = arith.constant 0 : i32
    return %arg0, %c0_i32, %c0_i32_0 : i32, i32, i32
  }
}

</mosaic_0001>

<bundles_post_ra>
// kernel: seq2seq_forward.3
= control target key start
LH: loop header
LB: loop body
LE: loop exit
PB: predicated region body
PF: predicated region fallthrough
CT: control target
= control target key end

     0   :  { %s2006_s18 = smov 0   ;;  %s2008_s19 = smov 0   ;;  %s2832_s0 = inlined_call_operand.vmem [shape: f32[8,2,64,128], index: 0, kind: input, shape index: {}]   ;;  %s2833_s1 = inlined_call_operand.vmem [shape: bf16[288,128], index: 1, kind: input, shape index: {}]   ;;  %s2834_s2 = inlined_call_operand.vmem [shape: f32[64,96], index: 2, kind: input, shape index: {}]   ;;  %s2835_s3 = inlined_call_operand.vmem [shape: f32[64,32], index: 3, kind: input, shape index: {}]   ;;  %s2836_s4 = inlined_call_operand.vmem [shape: f32[8,2,64,32], index: 4, kind: output, shape index: {0}]   ;;  %s2837_s5 = inlined_call_operand.vmem [shape: f32[2,2,32], index: 5, kind: output, shape index: {1}]  }
   0x1   :  { %s2010_s20 = smov 0   ;;  %s2012_s21 = smov 0  }
   0x2   :  { %s2014_s22 = smov 0  }
   0x3 LB: > { %s25_s23 = sadd.s32 1, %s1961_s20  ;;  %s28_s24 = sadd.s32 1, %s1965_s21  ;;  %s1969_s22 = sphi %s2014_s22, %s16_s22   ;;  %s1965_s21 = sphi %s2012_s21, %s2853_s21   ;;  %s1961_s20 = sphi %s2010_s20, %s2852_s20   ;;  %s1957_s19 = sphi %s2008_s19, %s2851_s19   ;;  %s1953_s18 = sphi %s2006_s18, %s2850_s18  }
   0x4   : > { %p26_p0 = scmp.ge.s32.totalorder %s25_s23, 8  ;;  %p1673_p1 = scmp.ge.s32.totalorder %s1969_s22, 1 }
   0x5   : > { %p210_p2 = scmp.lt.s32.totalorder %s1969_s22, 17 }
   0x6   : > { %s2855_s23 = smov (%p26_p0, %s25_s23), 0  ;;  %s2857_s24 = smov (!%p26_p0, %s28_s24), %s1965_s21 }
   0x7   : > { %p211_p3 = pnand %p1673_p1, %p210_p2  ;;  %p30_p4 = scmp.ge.s32.totalorder %s2857_s24, 2 }
   0x8   : > { %p250_p5 = scmp.lt.s32.totalorder (!%p211_p3), %s1953_s18, 7  ;;  %p252_p6 = scmp.lt.s32.totalorder (!%p211_p3), %s1957_s19, 1 }
   0x9   : > { %s2859_s24 = smov (%p30_p4, %s2857_s24), 0  ;;  %214 = sbr.rel (%p211_p3) target bundleno = 1123 (0x463), region = 36 }
   0xa   : > { %p1681_p7 = scmp.ne.s32.totalorder (!%p211_p3), %s1953_s18, 0 }
   0xe   : > { %s251_s25 = scalar_select %p250_p5, %s1953_s18, 7 }
   0xf   : > { %s2861_s19 = smov (!%p252_p6, %s1957_s19), 1  ;;  %276 = sbr.rel (%p1681_p7) target bundleno = 46 (0x2e), region = 40 }
  0x10   : > { %s1675_s26 = sshll.u32 %s251_s25, 4  ;;  %s1674_s27 = sshll.u32 %s2861_s19, 3 }
  0x11   : > { %s1680_s28 = sshll.u32 %s2861_s19, 1  ;;  %s256_s29 = sadd.s32 %s1675_s26, %s1674_s27 }
  0x12   : > { %s2039_s7 = scalar_lea.vmem %s2837_s5, %s1680_s28  ;;  %s1676_s8 = sshll.u32 %s256_s29, 3 }
  0x13   : > { %s2044_s11 = scalar_lea.vmem %s2832_s0, %s1676_s8  ;;  %s2049_s14 = scalar_lea.vmem %s2836_s4, %s1676_s8 }
  0x14   : > { %v1971_v0 = vmov 0   ;;  %vm278_vm0 = vcmask 257024   ;;  %vm294_vm1 = vcmask 261120   ;;  %v1972_v1 = vmov 0.0  }
  0x15   : > { %277 = vst [vmem:[#allocation2] sm:$0xff] %v1971_v0  ;;  %vm303_vm2 = vcmask 254976  }
  0x16   : > { %280 = vst [vmem:[#allocation2 + $0xc] sm:$0xff] %v1971_v0 }
  0x17   : > { %282 = vst [vmem:[#allocation2 + $0x18] sm:$0xff] %v1971_v0 }
  0x18   : > { %284 = vst [vmem:[#allocation2 + $0x24] sm:$0xff] %v1971_v0 }
  0x19   : > { %286 = vst [vmem:[#allocation2 + $0x30] sm:$0xff] %v1971_v0 }
  0x1a   : > { %288 = vst [vmem:[#allocation2 + $0x3c] sm:$0xff] %v1971_v0 }
  0x1b   : > { %290 = vst [vmem:[#allocation2 + $0x48] sm:$0xff] %v1971_v0 }
  0x1c   : > { %292 = vst [vmem:[#allocation2 + $0x54] sm:$0xff] %v1971_v0 }
  0x1d   : > { %279 = vst.msk [vmem:[#allocation2 + $0x8] sm:$0xf] %vm278_vm0, %v1971_v0 }
  0x1e   : > { %281 = vst.msk [vmem:[#allocation2 + $0x14] sm:$0xf] %vm278_vm0, %v1971_v0 }
  0x1f   : > { %283 = vst.msk [vmem:[#allocation2 + $0x20] sm:$0xf] %vm278_vm0, %v1971_v0 }
  0x20   : > { %285 = vst.msk [vmem:[#allocation2 + $0x2c] sm:$0xf] %vm278_vm0, %v1971_v0 }
  0x21   : > { %287 = vst.msk [vmem:[#allocation2 + $0x38] sm:$0xf] %vm278_vm0, %v1971_v0 }
  0x22   : > { %289 = vst.msk [vmem:[#allocation2 + $0x44] sm:$0xf] %vm278_vm0, %v1971_v0 }
  0x23   : > { %291 = vst.msk [vmem:[#allocation2 + $0x50] sm:$0xf] %vm278_vm0, %v1971_v0 }
  0x24   : > { %293 = vst.msk [vmem:[#allocation2 + $0x5c] sm:$0xf] %vm278_vm0, %v1971_v0 }
  0x25   : > { %295 = vst.msk [vmem:[#allocation3] sm:$0xff] %vm294_vm1, %v1972_v1 }
  0x26   : > { %296 = vst.msk [vmem:[#allocation3 + $0x8] sm:$0xff] %vm294_vm1, %v1972_v1 }
  0x27   : > { %297 = vst.msk [vmem:[#allocation3 + $0x10] sm:$0xff] %vm294_vm1, %v1972_v1 }
  0x28   : > { %298 = vst.msk [vmem:[#allocation3 + $0x18] sm:$0xff] %vm294_vm1, %v1972_v1 }
  0x29   : > { %299 = vst.msk [vmem:[#allocation3 + $0x20] sm:$0xff] %vm294_vm1, %v1972_v1 }
  0x2a   : > { %300 = vst.msk [vmem:[#allocation3 + $0x28] sm:$0xff] %vm294_vm1, %v1972_v1 }
  0x2b   : > { %301 = vst.msk [vmem:[#allocation3 + $0x30] sm:$0xff] %vm294_vm1, %v1972_v1 }
  0x2c   : > { %302 = vst.msk [vmem:[#allocation3 + $0x38] sm:$0xff] %vm294_vm1, %v1972_v1 }
  0x2d   : > { %304 = vst.msk [vmem:[%s2039_s7] sm:$0x3] %vm303_vm2, %v1972_v1 }
  0x2e PF: > { %v1827_v2 = vld [vmem:[%s2833_s1 + $0x38] sm:$0xff]  ;;  %v1837_v4 = vld [vmem:[%s2833_s1 + $0x88] sm:$0xff]  ;;  %v1826_v5 = vld [vmem:[%s2833_s1 + $0x30] sm:$0xff]  ;;  %s1973_s8 = smov 32   ;;  %vm533_vm3 = vcmask 261120   ;;  %s1974_s15 = smov 64  }
  0x2f   : > { %v2058_v3 = vld [vmem:[%s2833_s1 + $0x78] sm:$0xff]  ;;  %546 = vmatpush.bf16.msra.mxu0 %v1827_v2  ;;  %1838 = vmatpush.bf16.msra.mxu3 %v1827_v2  ;;  %v2070_v6 = vld [vmem:[%s2833_s1 + $0x70] sm:$0xff]  ;;  %v1836_v7 = vld [vmem:[%s2833_s1 + $0x80] sm:$0xff]  ;;  %vm729_vm4 = vcmask 523264   ;;  %vm1131_vm5 = vcmask 257024   ;;  %vm1509_vm10 = vcmask 253952  }
  0x30   : > { %1846 = vmatpush.bf16.msra.mxu1 %v2058_v3  ;;  %610 = vmatpush.bf16.msra.mxu2 %v1837_v4  ;;  %v2075_v8 = vld [vmem:[#allocation3] sm:$0xff]  ;;  %v1692_v9 = vld [vmem:[#allocation2 + $0x8] sm:$0xf]  ;;  %v1810_v10 = vld [vmem:[#allocation2 + $0x10] sm:$0xf0]  ;;  %vm1183_vm11 = vcmask 519424  }
  0x31   : > { %673 = vrot.lane.b32.xlu0 %v2075_v8, %s1973_s8  ;;  %v2079_v11 = vld [vmem:[#allocation3 + $0x10] sm:$0xff]  ;;  %v1825_v12 = vld [vmem:[%s2833_s1 + $0x28] sm:$0xff]  ;;  %v1693_v14 = vor.u32 %v1810_v10, %v1692_v9  ;;  %v1824_v16 = vld [vmem:[%s2833_s1 + $0x20] sm:$0xff]  ;;  %vm1132_vm6 = vsmask.f32 7938  ;;  %vm1240_vm12 = vcmask 781824  }
  0x32   : > { %v2088_v13 = vld [vmem:[%s2833_s1 + $0x68] sm:$0xff]  ;;  %677 = vrot.lane.b32.xlu1 %v2079_v11, %s1973_s8  ;;  %v2102_v17 = vld [vmem:[%s2833_s1 + $0x60] sm:$0xff]  ;;  %v2106_v18 = vld [vmem:[#allocation3 + $0x18] sm:$0xff]  ;;  %vm1241_vm8 = vsmask.f32 3328  ;;  %vm1295_vm14 = vcmask 1044224  }
  0x33   : > { %547 = vmatpush.bf16.msra.mxu0 %v1826_v5  ;;  %1839 = vmatpush.bf16.msra.mxu3 %v1826_v5  ;;  %v2092_v15 = vld [vmem:[#allocation3 + $0x8] sm:$0xff]  ;;  %v1823_v19 = vld [vmem:[%s2833_s1 + $0x18] sm:$0xff]  ;;  %v2119_v21 = vld [vmem:[#allocation3 + $0x30] sm:$0xff] }
  0x34   : > { %1847 = vmatpush.bf16.msra.mxu1 %v2070_v6  ;;  %611 = vmatpush.bf16.msra.mxu2 %v1836_v7  ;;  %v2115_v20 = vld [vmem:[%s2833_s1 + $0x58] sm:$0xff]  ;;  %v1822_v22 = vld [vmem:[%s2833_s1 + $0x10] sm:$0xff]  ;;  %v2128_v24 = vld [vmem:[#allocation3 + $0x20] sm:$0xff] }
  0x35   : > { %v1830_v23 = vld [vmem:[%s2833_s1 + $0x50] sm:$0xff]  ;;  %v1704_v25 = vld [vmem:[#allocation2 + $0x20] sm:$0xf]  ;;  %v1813_v26 = vld [vmem:[#allocation2 + $0x28] sm:$0xf0]  ;;  %681 = vrot.lane.b32.xlu2 %v2128_v24, %s1973_s8 }
  0x36   : > { %v1821_v27 = vld [vmem:[%s2833_s1 + $0x8] sm:$0xff]  ;;  %v1705_v29 = vor.u32 %v1813_v26, %v1704_v25  ;;  %v1820_v30 = vld [vmem:[%s2833_s1] sm:$0xff]  ;;  %v1696_v32 = vld [vmem:[#allocation2 + $0x18] sm:$0xf] }
  0x37   : > { %548 = vmatpush.bf16.msra.mxu0 %v1825_v12  ;;  %1840 = vmatpush.bf16.msra.mxu3 %v1825_v12  ;;  %v1829_v28 = vld [vmem:[%s2833_s1 + $0x48] sm:$0xff]  ;;  %v1828_v31 = vld [vmem:[%s2833_s1 + $0x40] sm:$0xff]  ;;  %v1811_v36 = vld [vmem:[#allocation2 + $0x1c] sm:$0xf] }
  0x38   : > { %1848 = vmatpush.bf16.msra.mxu1 %v2088_v13  ;;  %1802 = vmatmul.msk.bf16.vlgmr.msra.gmra.mxu2 %vm533_vm3, %v1693_v14  ;;  %v1812_v33 = vld [vmem:[#allocation2 + $0x20] sm:$0xf0]  ;;  %v1684_v34 = vld [vmem:[#allocation2] sm:$0xf]  ;;  %v1809_v35 = vld [vmem:[#allocation2 + $0x8] sm:$0xf0] }
  0x39   : > { %675 = vrot.lane.b32.xlu0 %v2092_v15, %s1973_s8  ;;  %v1698_v37 = vld [vmem:[#allocation2 + $0x24] sm:$0xf0]  ;;  %v1697_v39 = vor.u32 %v1812_v33, %v1696_v32  ;;  %v1685_v40 = vor.u32 %v1809_v35, %v1684_v34  ;;  %v1716_v42 = vld [vmem:[#allocation2 + $0x38] sm:$0xf]  ;;  %v1816_v43 = vld [vmem:[#allocation2 + $0x40] sm:$0xf0] }
  0x3a   : > { %679 = vrot.lane.b32.xlu1 %v2106_v18, %s1973_s8  ;;  %v2149_v38 = vld [vmem:[#allocation3 + $0x28] sm:$0xff]  ;;  %v1701_v41 = vor.u32 %v1811_v36, %v1698_v37  ;;  %v1717_v44 = vor.u32 %v1816_v43, %v1716_v42  ;;  %v2166_v45 = vld [vmem:[#allocation3 + $0x38] sm:$0xff]  ;;  %v1708_v46 = vld [vmem:[#allocation2 + $0x30] sm:$0xf] }
  0x3b   : > { %549 = vmatpush.bf16.msra.mxu0 %v1824_v16  ;;  %1841 = vmatpush.bf16.msra.mxu3 %v1824_v16  ;;  %v1815_v47 = vld [vmem:[#allocation2 + $0x38] sm:$0xf0]  ;;  %v1814_v48 = vld [vmem:[#allocation2 + $0x34] sm:$0xf]  ;;  %v1710_v49 = vld [vmem:[#allocation2 + $0x3c] sm:$0xf0] }
  0x3c   : > { %1849 = vmatpush.bf16.msra.mxu1 %v2102_v17  ;;  %v1709_v50 = vor.u32 %v1815_v47, %v1708_v46  ;;  %v1713_v51 = vor.u32 %v1814_v48, %v1710_v49  ;;  %v1728_v52 = vld [vmem:[#allocation2 + $0x50] sm:$0xf]  ;;  %v1819_v53 = vld [vmem:[#allocation2 + $0x58] sm:$0xf0]  ;;  %v1808_v54 = vld [vmem:[#allocation2 + $0x4] sm:$0xf] }
  0x3d   : > { %683 = vrot.lane.b32.xlu2 %v2149_v38, %s1973_s8  ;;  %v1686_v55 = vld [vmem:[#allocation2 + $0xc] sm:$0xf0]  ;;  %v1729_v56 = vor.u32 %v1819_v53, %v1728_v52  ;;  %v1720_v58 = vld [vmem:[#allocation2 + $0x48] sm:$0xf]  ;;  %v1818_v59 = vld [vmem:[#allocation2 + $0x50] sm:$0xf0] }
  0x3e   : > { %v1689_v57 = vor.u32 %v1808_v54, %v1686_v55  ;;  %v1817_v60 = vld [vmem:[#allocation2 + $0x4c] sm:$0xf]  ;;  %v1722_v61 = vld [vmem:[#allocation2 + $0x54] sm:$0xf0]  ;;  %v1721_v62 = vor.u32 %v1818_v59, %v1720_v58  ;;  %v649_v59 = vld [vmem:[%s2834_s2] sm:$0xff] }
  0x3f   : > { %550 = vmatpush.bf16.msra.mxu0 %v1823_v19  ;;  %1842 = vmatpush.bf16.msra.mxu3 %v1823_v19  ;;  %v1725_v63 = vor.u32 %v1817_v60, %v1722_v61  ;;  %v651_v19 = vld [vmem:[%s2834_s2 + $0x10] sm:$0xff]  ;;  %v652_v34 = vld [vmem:[%s2834_s2 + $0x18] sm:$0xff]  ;;  %v321_v60 = vld [vmem:[%s2044_s11] sm:$0xff] }
  0x40   : > { %1850 = vmatpush.bf16.msra.mxu1 %v2115_v20  ;;  %v324_v36 = vld [vmem:[%s2044_s11 + $0x18] sm:$0xff]  ;;  %vm2455_vm7 = vmand %vm1131_vm5, %vm1132_vm6 }
  0x41   : > { %685 = vrot.lane.b32.xlu0 %v2119_v21, %s1973_s8  ;;  %vm2473_vm9 = vmand %vm1131_vm5, %vm1241_vm8 }
  0x42   : > { %697 = vrot.lane.b32.xlu1 %v2075_v8, %s1974_s15  ;;  %vm2718_vm13 = vmand %vm1240_vm12, %vm1241_vm8 }
  0x43   : > { %551 = vmatpush.bf16.msra.mxu0 %v1822_v22  ;;  %1843 = vmatpush.bf16.msra.mxu3 %v1822_v22  ;;  %v323_v22 = vld [vmem:[%s2044_s11 + $0x10] sm:$0xff]  ;;  %vm2729_vm15 = vmand %vm1183_vm11, %vm1241_vm8 }
  0x44   : > { %1851 = vmatpush.bf16.msra.mxu1 %v1830_v23  ;;  %vm2735_vm0 = vmand %vm1295_vm14, %vm1132_vm6 }
  0x45   : > { %699 = vrot.lane.b32.xlu2 %v2092_v15, %s1974_s15  ;;  %vm2747_vm1 = vmand %vm1240_vm12, %vm1132_vm6 }
  0x47   : > { %552 = vmatpush.bf16.msra.mxu0 %v1821_v27  ;;  %1844 = vmatpush.bf16.msra.mxu3 %v1821_v27 }
  0x48   : > { %1852 = vmatpush.bf16.msra.mxu1 %v1829_v28  ;;  %1803 = vmatmul.msk.bf16.gmra.mxu2 %vm533_vm3, %v1705_v29 }
  0x49   : > { %701 = vrot.lane.b32.xlu0 %v2079_v11, %s1974_s15 }
  0x4a   : > { %703 = vrot.lane.b32.xlu1 %v2106_v18, %s1974_s15 }
  0x4b   : > { %553 = vmatpush.bf16.msra.mxu0 %v1820_v30  ;;  %1845 = vmatpush.bf16.msra.mxu3 %v1820_v30 }
  0x4c   : > { %1853 = vmatpush.bf16.msra.mxu1 %v1828_v31 }
  0x4d   : > { %705 = vrot.lane.b32.xlu2 %v2128_v24, %s1974_s15 }
  0x4e   : > { %559 = vmatmul.bf16.vlgmr.msra.gmra.mxu3 %v1697_v39  ;;  %554 = vmatmul.bf16.vlgmr.msra.gmra.mxu0 %v1685_v40 }
  0x4f   : > { %575 = vmatpush.bf16.msrb.mxu0 %v2058_v3  ;;  %588 = vmatmul.bf16.vlgmr.msra.gmra.mxu1 %v1701_v41 }
  0x51   : > { %707 = vrot.lane.b32.xlu0 %v2149_v38, %s1974_s15 }
  0x52   : > { %709 = vrot.lane.b32.xlu1 %v2119_v21, %s1974_s15 }
  0x53   : > { %576 = vmatpush.bf16.msrb.mxu0 %v2070_v6 }
  0x55   : > { %687 = vrot.lane.b32.xlu2 %v2166_v45, %s1973_s8 }
  0x57   : > { %577 = vmatpush.bf16.msrb.mxu0 %v2088_v13 }
  0x58   : > { %1804 = vmatmul.msk.bf16.gmra.mxu2 %vm533_vm3, %v1717_v44 }
  0x59   : > { %711 = vrot.lane.b32.xlu0 %v2166_v45, %s1974_s15 }
  0x5b   : > { %578 = vmatpush.bf16.msrb.mxu0 %v2102_v17 }
  0x5e   : > { %564 = vmatmul.bf16.gmra.mxu3 %v1709_v50 }
  0x5f   : > { %579 = vmatpush.bf16.msrb.mxu0 %v2115_v20  ;;  %593 = vmatmul.bf16.gmra.mxu1 %v1713_v51 }
  0x63   : > { %580 = vmatpush.bf16.msrb.mxu0 %v1830_v23 }
  0x67   : > { %581 = vmatpush.bf16.msrb.mxu0 %v1829_v28 }
  0x68   : > { %1805 = vmatmul.msk.bf16.gmra.mxu2 %vm533_vm3, %v1729_v56 }
  0x6b   : > { %582 = vmatpush.bf16.msrb.mxu0 %v1828_v31 }
  0x6e   : > { %583 = vmatmul.bf16.vlgmr.msrb.gmra.mxu0 %v1689_v57  ;;  %569 = vmatmul.bf16.gmra.mxu3 %v1721_v62 }
  0x6f   : > { %598 = vmatmul.bf16.gmra.mxu1 %v1725_v63  ;;  %v326_v63 = vld [vmem:[%s2044_s11 + $0x28] sm:$0xff] }
  0x8f   : > { %v2193_v16 = vpop.permute.xlu2 %681 }
  0x97   : > { %v2211_v37 = vpop.permute.xlu2 %683 }
  0x98   : > { %v726_v49 = vsel %vm533_vm3, %v2149_v38, %v2211_v37  ;;  %v654_v38 = vld [vmem:[%s2834_s2 + $0x28] sm:$0xff] }
  0x9f   : > { %v700_v50 = vpop.permute.xlu2 %699 }
  0xa3   : > { %v2178_v0 = vpop.permute.xlu0 %673 }
  0xa4   : > { %v2180_v1 = vpop.permute.xlu1 %677  ;;  %v721_v52 = vsel %vm533_vm3, %v2075_v8, %v2178_v0 }
  0xa5   : > { %v723_v12 = vsel %vm533_vm3, %v2079_v11, %v2180_v1 }
  0xab   : > { %v2182_v3 = vpop.permute.xlu0 %675 }
  0xac   : > { %v2186_v5 = vpop.permute.xlu1 %679 }
  0xad   : > { %v724_v29 = vsel %vm533_vm3, %v2106_v18, %v2186_v5 }
  0xb3   : > { %v2188_v6 = vpop.permute.xlu0 %685 }
  0xb4   : > { %v698_v10 = vpop.permute.xlu1 %697 }
  0xb5   : > { %v730_v8 = vsel %vm729_vm4, %v721_v52, %v698_v10 }
  0xbb   : > { %v613_v2 = vpop.f32.mrf.mxu2  ;;  %v702_v13 = vpop.permute.xlu0 %701 }
  0xbc   : > { %v732_v20 = vsel %vm729_vm4, %v723_v12, %v702_v13  ;;  %v704_v30 = vpop.permute.xlu1 %703  ;;  %v738_v12 = vmul.f32 %v730_v8, %v649_v59 }
  0xbd   : > { %v740_v27 = vmul.f32 %v732_v20, %v651_v19  ;;  %v733_v35 = vsel %vm729_vm4, %v724_v29, %v704_v30  ;;  %v722_v19 = vsel %vm533_vm3, %v2092_v15, %v2182_v3  ;;  %v650_v15 = vld [vmem:[%s2834_s2 + $0x8] sm:$0xff] }
  0xbe   : > { %v741_v42 = vmul.f32 %v733_v35, %v652_v34  ;;  %v731_v30 = vsel %vm729_vm4, %v722_v19, %v700_v50 }
  0xc3   : > { %v2184_v4 = vpop.f32.mrf.mxu2  ;;  %v708_v51 = vpop.permute.xlu0 %707 }
  0xc4   : > { %v735_v58 = vsel %vm729_vm4, %v726_v49, %v708_v51 }
  0xcb   : > { %v618_v7 = vpop.f32.mrf.mxu2  ;;  %v555_v11 = vpop.f32.mrf.mxu0 }
  0xcc   : > { %v589_v9 = vpop.f32.mrf.mxu1 }
  0xd1   : > { %v560_v14 = vpop.f32.mrf.mxu3 }
  0xd2   : > { %v590_v17 = vadd.f32 %v589_v9, %v560_v14  ;;  %v743_v9 = vmul.f32 %v735_v58, %v654_v38  ;;  %v706_v14 = vpop.permute.xlu2 %705 }
  0xd3   : > { %v620_v26 = vpop.f32.mrf.mxu2  ;;  %v557_v46 = vpop.f32.mrf.mxu0 }
  0xd4   : > { %v619_v23 = vadd.f32 %v618_v7, %v590_v17  ;;  %v591_v25 = vpop.f32.mrf.mxu1 }
  0xd6   : > { %v2200_v28 = vadd.f32 %v619_v23, %v323_v22  ;;  %v710_v22 = vpop.permute.xlu1 %709 }
  0xd8   : > { %v748_v31 = vadd.f32 %v740_v27, %v2200_v28 }
  0xd9   : > { %v562_v32 = vpop.f32.mrf.mxu3 }
  0xda   : > { %1899 = vtanh.f32 %v748_v31  ;;  %v592_v33 = vadd.f32 %v591_v25, %v562_v32  ;;  %v322_v31 = vld [vmem:[%s2044_s11 + $0x8] sm:$0xff]  ;;  %v725_v32 = vsel %vm533_vm3, %v2128_v24, %v2193_v16  ;;  %v653_v24 = vld [vmem:[%s2834_s2 + $0x20] sm:$0xff]  ;;  %v2275_v50 = vpop.permute.xlu2 %687 }
  0xdb   : > { %v623_v41 = vpop.f32.mrf.mxu2  ;;  %v728_v58 = vsel %vm533_vm3, %v2166_v45, %v2275_v50 }
  0xdc   : > { %v621_v39 = vadd.f32 %v620_v26, %v592_v33  ;;  %v594_v40 = vpop.f32.mrf.mxu1  ;;  %v655_v33 = vld [vmem:[%s2834_s2 + $0x30] sm:$0xff] }
  0xde   : > { %v2213_v18 = vadd.f32 %v621_v39, %v324_v36  ;;  %v327_v36 = vld [vmem:[%s2044_s11 + $0x30] sm:$0xff] }
  0xe0   : > { %v2215_v43 = vpop.eup %1899  ;;  %v749_v44 = vadd.f32 %v741_v42, %v2213_v18 }
  0xe1   : > { %v565_v47 = vpop.f32.mrf.mxu3  ;;  %798 = vrot.lane.b32.xlu0 %v2215_v43, %s1974_s15 }
  0xe2   : > { %1901 = vtanh.f32 %v749_v44  ;;  %v595_v26 = vadd.f32 %v594_v40, %v565_v47  ;;  %v739_v40 = vmul.f32 %v731_v30, %v650_v15  ;;  %v325_v47 = vld [vmem:[%s2044_s11 + $0x20] sm:$0xff] }
  0xe3   : > { %v625_v53 = vpop.f32.mrf.mxu2 }
  0xe4   : > { %v596_v48 = vpop.f32.mrf.mxu1  ;;  %v624_v42 = vadd.f32 %v623_v41, %v595_v26 }
  0xe8   : > { %v2226_v54 = vpop.eup %1901 }
  0xe9   : > { %v567_v57 = vpop.f32.mrf.mxu3  ;;  %800 = vrot.lane.b32.xlu1 %v2226_v54, %s1974_s15 }
  0xea   : > { %v597_v61 = vadd.f32 %v596_v48, %v567_v57  ;;  %v734_v48 = vsel %vm729_vm4, %v725_v32, %v706_v14 }
  0xeb   : > { %v584_v55 = vpop.f32.mrf.mxu0  ;;  %v628_v29 = vpop.f32.mrf.mxu2  ;;  %v742_v57 = vmul.f32 %v734_v48, %v653_v24 }
  0xec   : > { %v585_v56 = vadd.f32 %v584_v55, %v555_v11  ;;  %v626_v7 = vadd.f32 %v625_v53, %v597_v61  ;;  %v599_v10 = vpop.f32.mrf.mxu1  ;;  %v712_v55 = vpop.permute.xlu0 %711 }
  0xee   : > { %v614_v62 = vadd.f32 %v613_v2, %v585_v56  ;;  %v2242_v17 = vadd.f32 %v626_v7, %v326_v63  ;;  %v727_v2 = vsel %vm533_vm3, %v2119_v21, %v2188_v6  ;;  %v2280_v56 = vadd.f32 %v624_v42, %v325_v47 }
  0xef   : > { %v736_v34 = vsel %vm729_vm4, %v727_v2, %v710_v22  ;;  %v737_v63 = vsel %vm729_vm4, %v728_v58, %v712_v55  ;;  %v764_v2 = vmul.f32 0.5, %v2215_v43 }
  0xf0   : > { %v2240_v13 = vadd.f32 %v614_v62, %v321_v60  ;;  %v751_v23 = vadd.f32 %v743_v9, %v2242_v17  ;;  %v328_v60 = vld [vmem:[%s2044_s11 + $0x38] sm:$0xff]  ;;  %v750_v7 = vadd.f32 %v742_v57, %v2280_v56  ;;  %s1975_s11 = smov 96  }
  0xf1   : > { %v570_v11 = vpop.f32.mrf.mxu3  ;;  %v656_v62 = vld [vmem:[%s2834_s2 + $0x38] sm:$0xff]  ;;  %v772_v22 = vadd.f32 0.5, %v764_v2 }
  0xf2   : > { %v746_v20 = vadd.f32 %v738_v12, %v2240_v13  ;;  %v600_v21 = vadd.f32 %v599_v10, %v570_v11  ;;  %v745_v14 = vmul.f32 %v737_v63, %v656_v62 }
  0xf3   : > { %v586_v25 = vpop.f32.mrf.mxu0  ;;  %v630_v59 = vpop.f32.mrf.mxu2 }
  0xf4   : > { %1903 = vtanh.f32 %v746_v20  ;;  %v587_v27 = vadd.f32 %v586_v25, %v557_v46  ;;  %v629_v39 = vadd.f32 %v628_v29, %v600_v21  ;;  %v744_v46 = vmul.f32 %v736_v34, %v655_v33  ;;  %v601_v52 = vpop.f32.mrf.mxu1 }
  0xf5   : > { %1905 = vtanh.f32 %v751_v23 }
  0xf6   : > { %v616_v35 = vadd.f32 %v2184_v4, %v587_v27  ;;  %v2273_v49 = vadd.f32 %v629_v39, %v327_v36  ;;  %v765_v27 = vmul.f32 0.5, %v2226_v54 }
  0xf8   : > { %v2266_v44 = vadd.f32 %v616_v35, %v322_v31  ;;  %v752_v53 = vadd.f32 %v744_v46, %v2273_v49  ;;  %v773_v15 = vadd.f32 0.5, %v765_v27 }
  0xf9   : > { %v572_v38 = vpop.f32.mrf.mxu3 }
  0xfa   : > { %v1904_v51 = vpop.eup %1903  ;;  %v747_v4 = vadd.f32 %v739_v40, %v2266_v44  ;;  %v602_v8 = vadd.f32 %v601_v52, %v572_v38 }
  0xfb   : > { %v1906_v41 = vpop.eup %1905  ;;  %794 = vrot.lane.b32.xlu1 %v1904_v51, %s1974_s15  ;;  %v762_v36 = vmul.f32 0.5, %v1904_v51 }
  0xfc   : > { %1907 = vtanh.f32 %v747_v4  ;;  %804 = vrot.lane.b32.xlu0 %v1906_v41, %s1974_s15  ;;  %v631_v61 = vadd.f32 %v630_v59, %v602_v8  ;;  %v767_v39 = vmul.f32 0.5, %v1906_v41  ;;  %v780_v41 = vmul.f32 %v772_v22, %v2180_v1 }
  0xfd   : > { %1909 = vtanh.f32 %v752_v53  ;;  %v770_v40 = vadd.f32 0.5, %v762_v36  ;;  %v781_v1 = vmul.f32 %v773_v15, %v2186_v5 }
  0xfe   : > { %v2292_v12 = vadd.f32 %v631_v61, %v328_v60  ;;  %1911 = vtanh.f32 %v750_v7  ;;  %v775_v47 = vadd.f32 0.5, %v767_v39 }
  0xff   : > { %v778_v5 = vmul.f32 %v770_v40, %v2178_v0  ;;  %v659_v0 = vld [vmem:[%s2835_s3 + $0x10] sm:$0xff] }
 0x100   : > { %v753_v45 = vadd.f32 %v745_v14, %v2292_v12  ;;  %v783_v59 = vmul.f32 %v775_v47, %v2211_v37 }
 0x102   : > { %v1908_v9 = vpop.eup %1907  ;;  %1913 = vtanh.f32 %v753_v45 }
 0x103   : > { %v1910_v19 = vpop.eup %1909  ;;  %796 = vrot.lane.b32.xlu2 %v1908_v9, %s1974_s15  ;;  %v763_v26 = vmul.f32 0.5, %v1908_v9 }
 0x104   : > { %806 = vrot.lane.b32.xlu1 %v1910_v19, %s1974_s15  ;;  %v1912_v20 = vpop.eup %1911  ;;  %v768_v53 = vmul.f32 0.5, %v1910_v19 }
 0x105   : > { %v771_v11 = vadd.f32 0.5, %v763_v26  ;;  %v766_v32 = vmul.f32 0.5, %v1912_v20 }
 0x106   : > { %v776_v55 = vadd.f32 0.5, %v768_v53 }
 0x107   : > { %v774_v43 = vadd.f32 0.5, %v766_v32  ;;  %v779_v61 = vmul.f32 %v771_v11, %v2182_v3  ;;  %v663_v32 = vld [vmem:[%s2835_s3 + $0x30] sm:$0xff] }
 0x108   : > { %v1914_v10 = vpop.eup %1913 }
 0x109   : > { %v769_v35 = vmul.f32 0.5, %v1914_v10  ;;  %v782_v37 = vmul.f32 %v774_v43, %v2193_v16  ;;  %v784_v16 = vmul.f32 %v776_v55, %v2188_v6  ;;  %v660_v6 = vld [vmem:[%s2835_s3 + $0x18] sm:$0xff] }
 0x10b   : > { %802 = vrot.lane.b32.xlu2 %v1912_v20, %s1974_s15  ;;  %v777_v54 = vadd.f32 0.5, %v769_v35  ;;  %v661_v35 = vld [vmem:[%s2835_s3 + $0x20] sm:$0xff] }
 0x10d   : > { %v785_v3 = vmul.f32 %v777_v54, %v2275_v50 }
 0x113   : > { %808 = vrot.lane.b32.xlu2 %v1914_v10, %s1974_s15 }
 0x153   : > { %v799_v23 = vpop.permute.xlu0 %798 }
 0x154   : > { %v820_v25 = vmul.f32 %v799_v23, %v772_v22 }
 0x156   : > { %838 = vrot.lane.b32.xlu2 %v820_v25, %s1973_s8 }
 0x15b   : > { %v801_v31 = vpop.permute.xlu1 %800 }
 0x15c   : > { %v821_v21 = vmul.f32 %v801_v31, %v773_v15 }
 0x15d   : > { %v797_v29 = vpop.permute.xlu2 %796 }
 0x15e   : > { %v819_v30 = vmul.f32 %v797_v29, %v771_v11  ;;  %840 = vrot.lane.b32.xlu0 %v821_v21, %s1973_s8  ;;  %v657_v11 = vld [vmem:[%s2835_s3] sm:$0xff]  ;;  %v662_v29 = vld [vmem:[%s2835_s3 + $0x28] sm:$0xff] }
 0x160   : > { %836 = vrot.lane.b32.xlu1 %v819_v30, %s1973_s8 }
 0x165   : > { %v803_v33 = vpop.permute.xlu2 %802 }
 0x166   : > { %v822_v34 = vmul.f32 %v803_v33, %v774_v43 }
 0x168   : > { %842 = vrot.lane.b32.xlu1 %v822_v34, %s1973_s8 }
 0x16d   : > { %v809_v42 = vpop.permute.xlu2 %808  ;;  %v795_v46 = vpop.permute.xlu1 %794 }
 0x16e   : > { %v825_v24 = vmul.f32 %v809_v42, %v777_v54  ;;  %v818_v48 = vmul.f32 %v795_v46, %v770_v40  ;;  %v805_v4 = vpop.permute.xlu0 %804  ;;  %v658_v54 = vld [vmem:[%s2835_s3 + $0x8] sm:$0xff]  ;;  %v664_v46 = vld [vmem:[%s2835_s3 + $0x38] sm:$0xff] }
 0x16f   : > { %v823_v52 = vmul.f32 %v805_v4, %v775_v47 }
 0x170   : > { %848 = vrot.lane.b32.xlu1 %v825_v24, %s1973_s8  ;;  %834 = vrot.lane.b32.xlu0 %v818_v48, %s1973_s8 }
 0x171   : > { %844 = vrot.lane.b32.xlu2 %v823_v52, %s1973_s8 }
 0x176   : > { %v807_v57 = vpop.permute.xlu1 %806 }
 0x177   : > { %v824_v51 = vmul.f32 %v807_v57, %v776_v55 }
 0x179   : > { %846 = vrot.lane.b32.xlu0 %v824_v51, %s1973_s8 }
 0x1b0   : > { %v839_v38 = vpop.permute.xlu2 %838 }
 0x1b1   : > { %v2310_v58 = vadd.f32 %v839_v38, %v780_v41 }
 0x1b3   : > { %878 = vrot.lane.b32.xlu1 %v2310_v58, %s1975_s11 }
 0x1cb   : > { %v845_v8 = vpop.permute.xlu2 %844 }
 0x1cc   : > { %v2315_v60 = vadd.f32 %v845_v8, %v783_v59 }
 0x1ce   : > { %884 = vrot.lane.b32.xlu1 %v2315_v60, %s1975_s11 }
 0x1d0   : > { %v841_v7 = vpop.permute.xlu0 %840 }
 0x1d1   : > { %v2323_v9 = vadd.f32 %v841_v7, %v781_v1 }
 0x1d2   : > { %v837_v62 = vpop.permute.xlu1 %836 }
 0x1d3   : > { %v2321_v63 = vadd.f32 %v837_v62, %v779_v61  ;;  %880 = vrot.lane.b32.xlu2 %v2323_v9, %s1975_s11 }
 0x1d5   : > { %876 = vrot.lane.b32.xlu0 %v2321_v63, %s1975_s11 }
 0x1da   : > { %v843_v14 = vpop.permute.xlu1 %842 }
 0x1db   : > { %v2330_v19 = vadd.f32 %v843_v14, %v782_v37 }
 0x1dd   : > { %882 = vrot.lane.b32.xlu0 %v2330_v19, %s1975_s11 }
 0x1e2   : > { %v849_v45 = vpop.permute.xlu1 %848  ;;  %v835_v20 = vpop.permute.xlu0 %834 }
 0x1e3   : > { %v2336_v10 = vadd.f32 %v849_v45, %v785_v3  ;;  %v2338_v2 = vadd.f32 %v835_v20, %v778_v5 }
 0x1e5   : > { %888 = vrot.lane.b32.xlu0 %v2336_v10, %s1975_s11  ;;  %874 = vrot.lane.b32.xlu2 %v2338_v2, %s1975_s11 }
 0x1eb   : > { %v847_v22 = vpop.permute.xlu0 %846 }
 0x1ec   : > { %v2345_v23 = vadd.f32 %v847_v22, %v784_v16 }
 0x1ee   : > { %886 = vrot.lane.b32.xlu2 %v2345_v23, %s1975_s11 }
 0x225   : > { %v879_v50 = vpop.permute.xlu1 %878 }
 0x226   : > { %v900_v25 = vmul.f32 %v879_v50, %v659_v0  ;;  %1052 = vst.msk [vmem:[#allocation3 + $0x10] sm:$0xff] %vm533_vm3, %v879_v50 }
 0x228   : > { %918 = vrot.lane.b32.xlu0 %v900_v25, %s1975_s11 }
 0x22d   : > { %v881_v26 = vpop.permute.xlu2 %880 }
 0x22e   : > { %v901_v27 = vmul.f32 %v881_v26, %v660_v6  ;;  %1053 = vst.msk [vmem:[#allocation3 + $0x18] sm:$0xff] %vm533_vm3, %v881_v26 }
 0x230   : > { %920 = vrot.lane.b32.xlu1 %v901_v27, %s1975_s11 }
 0x23f   : > { %v875_v15 = vpop.permute.xlu2 %874 }
 0x240   : > { %v898_v30 = vmul.f32 %v875_v15, %v657_v11  ;;  %1050 = vst.msk [vmem:[#allocation3] sm:$0xff] %vm533_vm3, %v875_v15  ;;  %v885_v31 = vpop.permute.xlu1 %884 }
 0x241   : > { %v903_v21 = vmul.f32 %v885_v31, %v662_v29  ;;  %1055 = vst.msk [vmem:[#allocation3 + $0x28] sm:$0xff] %vm533_vm3, %v885_v31 }
 0x242   : > { %914 = vrot.lane.b32.xlu1 %v898_v30, %s1975_s11 }
 0x243   : > { %924 = vrot.lane.b32.xlu0 %v903_v21, %s1975_s11 }
 0x247   : > { %v877_v43 = vpop.permute.xlu0 %876 }
 0x248   : > { %1051 = vst.msk [vmem:[#allocation3 + $0x8] sm:$0xff] %vm533_vm3, %v877_v43  ;;  %v887_v33 = vpop.permute.xlu2 %886  ;;  %v899_v42 = vmul.f32 %v877_v43, %v658_v54 }
 0x249   : > { %v904_v34 = vmul.f32 %v887_v33, %v663_v32  ;;  %1056 = vst.msk [vmem:[#allocation3 + $0x30] sm:$0xff] %vm533_vm3, %v887_v33  ;;  %v1140_v33 = vld [vmem:[#allocation2 + $0x24] sm:$0xf] }
 0x24b   : > { %926 = vrot.lane.b32.xlu1 %v904_v34, %s1975_s11 }
 0x24f   : > { %v883_v36 = vpop.permute.xlu0 %882 }
 0x250   : > { %v902_v39 = vmul.f32 %v883_v36, %v661_v35  ;;  %1054 = vst.msk [vmem:[#allocation3 + $0x20] sm:$0xff] %vm533_vm3, %v883_v36 }
 0x252   : > { %922 = vrot.lane.b32.xlu2 %v902_v39, %s1975_s11 }
 0x257   : > { %v889_v40 = vpop.permute.xlu0 %888 }
 0x258   : > { %1057 = vst.msk [vmem:[#allocation3 + $0x38] sm:$0xff] %vm533_vm3, %v889_v40  ;;  %v905_v47 = vmul.f32 %v889_v40, %v664_v46  ;;  %v1511_v40 = vld [vmem:[%s2039_s7 + $0x1] sm:$0x1] }
 0x25a   : > { %916 = vrot.lane.b32.xlu2 %v899_v42, %s1975_s11  ;;  %v1468_v42 = vld [vmem:[#allocation2 + $0x14] sm:$0xf] }
 0x262   : > { %928 = vrot.lane.b32.xlu2 %v905_v47, %s1975_s11 }
 0x29a   : > { %v919_v24 = vpop.permute.xlu0 %918 }
 0x29b   : > { %v940_v48 = vadd.f32 %v919_v24, %v2200_v28 }
 0x29d   : > { %958 = vrot.lane.b32.xlu2 %v940_v48, %s1973_s8 }
 0x2a2   : > { %v921_v4 = vpop.permute.xlu1 %920 }
 0x2a3   : > { %v941_v52 = vadd.f32 %v921_v4, %v2213_v18 }
 0x2a5   : > { %960 = vrot.lane.b32.xlu0 %v941_v52, %s1973_s8 }
 0x2ac   : > { %v923_v53 = vpop.permute.xlu2 %922 }
 0x2ad   : > { %v942_v55 = vadd.f32 %v923_v53, %v2280_v56 }
 0x2af   : > { %962 = vrot.lane.b32.xlu1 %v942_v55, %s1973_s8  ;;  %v1143_v55 = vld [vmem:[#allocation2 + $0x30] sm:$0xf] }
 0x2b4   : > { %v915_v57 = vpop.permute.xlu1 %914  ;;  %v917_v51 = vpop.permute.xlu2 %916 }
 0x2b5   : > { %v938_v41 = vadd.f32 %v915_v57, %v2240_v13  ;;  %v939_v38 = vadd.f32 %v917_v51, %v2266_v44  ;;  %v925_v59 = vpop.permute.xlu0 %924 }
 0x2b6   : > { %v943_v28 = vadd.f32 %v925_v59, %v2242_v17 }
 0x2b7   : > { %954 = vrot.lane.b32.xlu0 %v938_v41, %s1973_s8  ;;  %956 = vrot.lane.b32.xlu1 %v939_v38, %s1973_s8  ;;  %v1471_v38 = vld [vmem:[#allocation2 + $0x20] sm:$0xf] }
 0x2b8   : > { %964 = vrot.lane.b32.xlu2 %v943_v28, %s1973_s8 }
 0x2bc   : > { %v929_v18 = vpop.permute.xlu2 %928 }
 0x2bd   : > { %v945_v56 = vadd.f32 %v929_v18, %v2292_v12  ;;  %v927_v8 = vpop.permute.xlu1 %926 }
 0x2be   : > { %v944_v61 = vadd.f32 %v927_v8, %v2273_v49 }
 0x2bf   : > { %968 = vrot.lane.b32.xlu1 %v945_v56, %s1973_s8 }
 0x2c0   : > { %966 = vrot.lane.b32.xlu0 %v944_v61, %s1973_s8 }
 0x2f7   : > { %v959_v13 = vpop.permute.xlu2 %958 }
 0x2f8   : > { %v980_v17 = vsel %vm533_vm3, %v959_v13, %v2310_v58 }
 0x2f9   : > { %1915 = vtanh.f32 %v980_v17 }
 0x2ff   : > { %v1916_v44 = vpop.eup %1915 }
 0x300   : > { %1022 = vrot.lane.b32.xlu1 %v1916_v44, %s1975_s11 }
 0x312   : > { %v965_v62 = vpop.permute.xlu2 %964 }
 0x313   : > { %v983_v1 = vsel %vm533_vm3, %v965_v62, %v2315_v60 }
 0x314   : > { %1917 = vtanh.f32 %v983_v1 }
 0x317   : > { %v961_v49 = vpop.permute.xlu0 %960 }
 0x318   : > { %v981_v7 = vsel %vm533_vm3, %v961_v49, %v2323_v9 }
 0x319   : > { %1919 = vtanh.f32 %v981_v7 }
 0x31a   : > { %v2410_v12 = vpop.eup %1917 }
 0x31b   : > { %1028 = vrot.lane.b32.xlu1 %v2410_v12, %s1975_s11  ;;  %v999_v28 = vmul.f32 0.5, %v2410_v12 }
 0x31d   : > { %v1007_v13 = vadd.f32 0.5, %v999_v28  ;;  %v1146_v28 = vld [vmem:[#allocation2 + $0x3c] sm:$0xf] }
 0x31f   : > { %v1920_v37 = vpop.eup %1919 }
 0x320   : > { %1024 = vrot.lane.b32.xlu2 %v1920_v37, %s1975_s11  ;;  %v997_v27 = vmul.f32 0.5, %v1920_v37 }
 0x321   : > { %v963_v58 = vpop.permute.xlu1 %962 }
 0x322   : > { %v982_v14 = vsel %vm533_vm3, %v963_v58, %v2330_v19  ;;  %v1005_v15 = vadd.f32 0.5, %v997_v27 }
 0x323   : > { %1921 = vtanh.f32 %v982_v14 }
 0x329   : > { %v2419_v60 = vpop.eup %1921  ;;  %v955_v3 = vpop.permute.xlu0 %954 }
 0x32a   : > { %v957_v5 = vpop.permute.xlu1 %956  ;;  %v978_v45 = vsel %vm533_vm3, %v955_v3, %v2338_v2  ;;  %1026 = vrot.lane.b32.xlu0 %v2419_v60, %s1975_s11 }
 0x32b   : > { %v979_v9 = vsel %vm533_vm3, %v957_v5, %v2321_v63  ;;  %1923 = vtanh.f32 %v978_v45  ;;  %v1134_v45 = vld [vmem:[#allocation2 + $0xc] sm:$0xf] }
 0x32c   : > { %1925 = vtanh.f32 %v979_v9 }
 0x331   : > { %v1924_v20 = vpop.eup %1923 }
 0x332   : > { %v969_v19 = vpop.permute.xlu1 %968  ;;  %v2427_v16 = vpop.eup %1925  ;;  %1018 = vrot.lane.b32.xlu2 %v1924_v20, %s1975_s11  ;;  %v994_v41 = vmul.f32 0.5, %v1924_v20 }
 0x333   : > { %v985_v22 = vsel %vm533_vm3, %v969_v19, %v2336_v10  ;;  %v967_v0 = vpop.permute.xlu0 %966  ;;  %1020 = vrot.lane.b32.xlu0 %v2427_v16, %s1975_s11  ;;  %v996_v10 = vmul.f32 0.5, %v1916_v44 }
 0x334   : > { %1927 = vtanh.f32 %v985_v22  ;;  %v984_v63 = vsel %vm533_vm3, %v967_v0, %v2345_v23  ;;  %v1002_v8 = vadd.f32 0.5, %v994_v41 }
 0x335   : > { %1929 = vtanh.f32 %v984_v63  ;;  %v1004_v25 = vadd.f32 0.5, %v996_v10  ;;  %v1149_v63 = vld [vmem:[#allocation2 + $0x48] sm:$0xf] }
 0x33a   : > { %v2436_v2 = vpop.eup %1927 }
 0x33b   : > { %v2438_v50 = vpop.eup %1929  ;;  %1032 = vrot.lane.b32.xlu0 %v2436_v2, %s1975_s11 }
 0x33c   : > { %1030 = vrot.lane.b32.xlu2 %v2438_v50, %s1975_s11  ;;  %v1000_v49 = vmul.f32 0.5, %v2438_v50 }
 0x33e   : > { %v1008_v5 = vadd.f32 0.5, %v1000_v49  ;;  %v1474_v49 = vld [vmem:[#allocation2 + $0x2c] sm:$0xf] }
 0x372   : > { %v1023_v6 = vpop.permute.xlu1 %1022 }
 0x373   : > { %v2444_v26 = vmul.f32 %v1023_v6, %v1004_v25  ;;  %v998_v6 = vmul.f32 0.5, %v2419_v60 }
 0x375   : > { %1060 = vst.msk [vmem:[%s2049_s14 + $0x10] sm:$0xff] %vm533_vm3, %v2444_v26  ;;  %v1068_v23 = vpack.c.bf16 %v2444_v26, %v2444_v26 }
 0x377   : > { %1166 = vrot.lane.b32.xlu0 %v1068_v23, %s1973_s8  ;;  %v1089_v11 = vshrl.u32 %v1068_v23, 16  ;;  %v1092_v29 = vshll.u32 %v1068_v23, 16  ;;  %1324 = vst.msk [vmem:[#allocation2 + $0x1c] sm:$0xf] %vm1131_vm5, %v1068_v23 }
 0x379   : > { %v1091_v30 = vrot.slane %v1089_v11, 7  ;;  %v1199_v31 = vrot.slane %v1089_v11, 4  ;;  %v1200_v21 = vrot.slane %v1092_v29, 5  ;;  %v1477_v11 = vld [vmem:[#allocation2 + $0x38] sm:$0xf] }
 0x37a   : > { %v1025_v32 = vpop.permute.xlu2 %1024 }
 0x37b   : > { %v2459_v34 = vmul.f32 %v1025_v32, %v1005_v15  ;;  %v1094_v35 = vor.u32 %v1092_v29, %v1091_v30  ;;  %v1201_v36 = vor.u32 %v1200_v21, %v1199_v31  ;;  %v1006_v31 = vadd.f32 0.5, %v998_v6 }
 0x37d   : > { %1061 = vst.msk [vmem:[%s2049_s14 + $0x18] sm:$0xff] %vm533_vm3, %v2459_v34  ;;  %v2466_v39 = vpack.c.bf16 %v2459_v34, %v2459_v34  ;;  %1275 = vrot.lane.b32.xlu2 %v1094_v35, %s1975_s11  ;;  %v1141_v54 = vsel %vm2455_vm7, %v1094_v35, %v1140_v33  ;;  %v1202_v46 = vrot.slane %v1201_v36, 4 }
 0x37e   : > { %1142 = vst [vmem:[#allocation2 + $0x24] sm:$0xf] %v1141_v54 }
 0x37f   : > { %1325 = vst.msk [vmem:[#allocation2 + $0x28] sm:$0xf] %vm1131_vm5, %v2466_v39  ;;  %1430 = vrot.lane.b32.xlu0 %v1068_v23, %s1975_s11  ;;  %1168 = vrot.lane.b32.xlu1 %v2466_v39, %s1973_s8  ;;  %v1096_v47 = vshrl.u32 %v2466_v39, 16  ;;  %v1099_v24 = vshll.u32 %v2466_v39, 16  ;;  %v1469_v48 = vsel %vm2473_vm9, %v1202_v46, %v1468_v42 }
 0x380   : > { %1470 = vst [vmem:[#allocation2 + $0x14] sm:$0xf] %v1469_v48  ;;  %v995_v48 = vmul.f32 0.5, %v2427_v16 }
 0x381   : > { %v1098_v4 = vrot.slane %v1096_v47, 7  ;;  %v1203_v52 = vrot.slane %v1096_v47, 4  ;;  %v1204_v53 = vrot.slane %v1099_v24, 5 }
 0x383   : > { %v1101_v57 = vor.u32 %v1099_v24, %v1098_v4  ;;  %v1205_v51 = vor.u32 %v1204_v53, %v1203_v52  ;;  %v1480_v24 = vld [vmem:[#allocation2 + $0x44] sm:$0xf] }
 0x385   : > { %1386 = vrot.lane.b32.xlu2 %v1094_v35, %s1974_s15  ;;  %v1144_v59 = vsel %vm2455_vm7, %v1101_v57, %v1143_v55  ;;  %v2490_v18 = vrot.slane %v1205_v51, 4 }
 0x386   : > { %1145 = vst [vmem:[#allocation2 + $0x30] sm:$0xf] %v1144_v59  ;;  %v1003_v59 = vadd.f32 0.5, %v995_v48 }
 0x387   : > { %1223 = vrot.lane.b32.xlu1 %v1202_v46, %s1974_s15  ;;  %1277 = vrot.lane.b32.xlu0 %v1101_v57, %s1975_s11  ;;  %v1472_v56 = vsel %vm2473_vm9, %v2490_v18, %v1471_v38  ;;  %v1001_v38 = vmul.f32 0.5, %v2436_v2 }
 0x388   : > { %1473 = vst [vmem:[#allocation2 + $0x20] sm:$0xf] %v1472_v56 }
 0x38c   : > { %v1019_v61 = vpop.permute.xlu2 %1018 }
 0x38d   : > { %v2497_v17 = vmul.f32 %v1019_v61, %v1002_v8  ;;  %v1029_v44 = vpop.permute.xlu1 %1028 }
 0x38e   : > { %v2499_v62 = vmul.f32 %v1029_v44, %v1007_v13 }
 0x38f   : > { %1058 = vst.msk [vmem:[%s2049_s14] sm:$0xff] %vm533_vm3, %v2497_v17  ;;  %v2506_v1 = vpack.c.bf16 %v2497_v17, %v2497_v17  ;;  %1338 = vrot.lane.b32.xlu1 %v1202_v46, %s1973_s8  ;;  %1388 = vrot.lane.b32.xlu0 %v1101_v57, %s1974_s15  ;;  %v1512_v13 = vmul.f32 %v2497_v17, %v2497_v17 }
 0x390   : > { %1063 = vst.msk [vmem:[%s2049_s14 + $0x28] sm:$0xff] %vm533_vm3, %v2499_v62  ;;  %v2513_v12 = vpack.c.bf16 %v2499_v62, %v2499_v62 }
 0x391   : > { %1322 = vst.msk [vmem:[#allocation2 + $0x4] sm:$0xf] %vm1131_vm5, %v2506_v1  ;;  %v1075_v7 = vshrl.u32 %v2506_v1, 16  ;;  %v1078_v14 = vshll.u32 %v2506_v1, 16 }
 0x392   : > { %1327 = vst.msk [vmem:[#allocation2 + $0x40] sm:$0xf] %vm1131_vm5, %v2513_v12  ;;  %v1110_v58 = vshrl.u32 %v2513_v12, 16  ;;  %v1113_v3 = vshll.u32 %v2513_v12, 16 }
 0x393   : > { %v1077_v37 = vrot.slane %v1075_v7, 7 }
 0x394   : > { %v1211_v9 = vrot.slane %v1110_v58, 4  ;;  %v1112_v20 = vrot.slane %v1110_v58, 7  ;;  %v1212_v0 = vrot.slane %v1113_v3, 5  ;;  %v1514_v58 = vmul.f32 %v2444_v26, %v2444_v26 }
 0x395   : > { %v1080_v22 = vor.u32 %v1078_v14, %v1077_v37 }
 0x396   : > { %v1031_v19 = vpop.permute.xlu2 %1030  ;;  %v2532_v10 = vor.u32 %v1113_v3, %v1112_v20  ;;  %v1213_v23 = vor.u32 %v1212_v0, %v1211_v9  ;;  %v1009_v3 = vadd.f32 0.5, %v1001_v38 }
 0x397   : > { %v2530_v50 = vmul.f32 %v1031_v19, %v1008_v5  ;;  %v1135_v25 = vsel %vm2455_vm7, %v1080_v22, %v1134_v45  ;;  %1432 = vrot.lane.b32.xlu1 %v2466_v39, %s1975_s11  ;;  %1271 = vrot.lane.b32.xlu0 %v1080_v22, %s1975_s11  ;;  %v1152_v39 = vld [vmem:[#allocation2 + $0x54] sm:$0xf]  ;;  %v1487_v5 = vsel %vm533_vm3, %v2497_v17, 0.0  ;;  %v1490_v19 = vsel %vm533_vm3, %v2444_v26, 0.0 }
 0x398   : > { %v1150_v29 = vsel %vm2455_vm7, %v2532_v10, %v1149_v63  ;;  %1136 = vst [vmem:[#allocation2 + $0xc] sm:$0xf] %v1135_v25  ;;  %v2547_v15 = vrot.slane %v1213_v23, 4  ;;  %v1515_v22 = vmul.f32 %v2459_v34, %v2459_v34  ;;  %v1520_v63 = vsel %vm533_vm3, %v1512_v13, 0.0 }
 0x399   : > { %1064 = vst.msk [vmem:[%s2049_s14 + $0x30] sm:$0xff] %vm533_vm3, %v2530_v50  ;;  %v2542_v27 = vpack.c.bf16 %v2530_v50, %v2530_v50  ;;  %v1523_v23 = vsel %vm533_vm3, %v1514_v58, 0.0  ;;  %v1498_v13 = vsel %vm533_vm3, %v2530_v50, 0.0 }
 0x39a   : > { %v1478_v21 = vsel %vm2473_vm9, %v2547_v15, %v1477_v11  ;;  %1151 = vst [vmem:[#allocation2 + $0x48] sm:$0xf] %v1150_v29  ;;  %v1492_v11 = vsel %vm533_vm3, %v2459_v34, 0.0 }
 0x39b   : > { %1328 = vst.msk [vmem:[#allocation2 + $0x4c] sm:$0xf] %vm1131_vm5, %v2542_v27  ;;  %v1117_v60 = vshrl.u32 %v2542_v27, 16  ;;  %v1120_v30 = vshll.u32 %v2542_v27, 16 }
 0x39c   : > { %v1027_v32 = vpop.permute.xlu0 %1026  ;;  %1479 = vst [vmem:[#allocation2 + $0x38] sm:$0xf] %v1478_v21 }
 0x39d   : > { %v1119_v33 = vrot.slane %v1117_v60, 7  ;;  %v1215_v35 = vrot.slane %v1117_v60, 4  ;;  %v1216_v36 = vrot.slane %v1120_v30, 5  ;;  %v2559_v54 = vmul.f32 %v1027_v32, %v1006_v31 }
 0x39f   : > { %v2561_v42 = vor.u32 %v1120_v30, %v1119_v33  ;;  %v1217_v46 = vor.u32 %v1216_v36, %v1215_v35  ;;  %1062 = vst.msk [vmem:[%s2049_s14 + $0x20] sm:$0xff] %vm533_vm3, %v2559_v54  ;;  %v2568_v47 = vpack.c.bf16 %v2559_v54, %v2559_v54  ;;  %1162 = vrot.lane.b32.xlu1 %v2506_v1, %s1973_s8  ;;  %v1525_v33 = vsel %vm533_vm3, %v1515_v22, 0.0 }
 0x3a0   : > { %1172 = vrot.lane.b32.xlu0 %v2513_v12, %s1973_s8  ;;  %v1516_v30 = vmul.f32 %v2559_v54, %v2559_v54  ;;  %v1517_v35 = vmul.f32 %v2499_v62, %v2499_v62  ;;  %v1494_v34 = vsel %vm533_vm3, %v2559_v54, 0.0 }
 0x3a1   : > { %v1153_v4 = vsel %vm2455_vm7, %v2561_v42, %v1152_v39  ;;  %v2574_v52 = vrot.slane %v1217_v46, 4  ;;  %1326 = vst.msk [vmem:[#allocation2 + $0x34] sm:$0xf] %vm1131_vm5, %v2568_v47  ;;  %1170 = vrot.lane.b32.xlu2 %v2568_v47, %s1973_s8  ;;  %v1103_v53 = vshrl.u32 %v2568_v47, 16  ;;  %v1106_v55 = vshll.u32 %v2568_v47, 16 }
 0x3a2   : > { %1154 = vst [vmem:[#allocation2 + $0x54] sm:$0xf] %v1153_v4 }
 0x3a3   : > { %v1481_v16 = vsel %vm2473_vm9, %v2574_v52, %v1480_v24  ;;  %v1105_v57 = vrot.slane %v1103_v53, 7  ;;  %v1207_v51 = vrot.slane %v1103_v53, 4  ;;  %v1208_v41 = vrot.slane %v1106_v55, 5  ;;  %v1137_v24 = vld [vmem:[#allocation2 + $0x18] sm:$0xf] }
 0x3a4   : > { %1482 = vst [vmem:[#allocation2 + $0x44] sm:$0xf] %v1481_v16 }
 0x3a5   : > { %v1021_v56 = vpop.permute.xlu0 %1020  ;;  %v2590_v8 = vor.u32 %v1106_v55, %v1105_v57  ;;  %v1209_v61 = vor.u32 %v1208_v41, %v1207_v51  ;;  %v1496_v55 = vsel %vm533_vm3, %v2499_v62, 0.0  ;;  %v1518_v51 = vmul.f32 %v2530_v50, %v2530_v50 }
 0x3a6   : > { %v1043_v44 = vmul.f32 %v1021_v56, %v1003_v59  ;;  %v1527_v41 = vsel %vm533_vm3, %v1516_v30, 0.0  ;;  %v1465_v59 = vld [vmem:[#allocation2 + $0x8] sm:$0xf] }
 0x3a7   : > { %v1147_v37 = vsel %vm2455_vm7, %v2590_v8, %v1146_v28  ;;  %v1210_v2 = vrot.slane %v1209_v61, 4  ;;  %1279 = vrot.lane.b32.xlu1 %v2590_v8, %s1975_s11  ;;  %v1529_v28 = vsel %vm533_vm3, %v1517_v35, 0.0  ;;  %v1531_v50 = vsel %vm533_vm3, %v1518_v51, 0.0 }
 0x3a8   : > { %1059 = vst.msk [vmem:[%s2049_s14 + $0x8] sm:$0xff] %vm533_vm3, %v1043_v44  ;;  %v2603_v45 = vpack.c.bf16 %v1043_v44, %v1043_v44  ;;  %v1488_v9 = vsel %vm533_vm3, %v1043_v44, 0.0  ;;  %v1513_v20 = vmul.f32 %v1043_v44, %v1043_v44 }
 0x3a9   : > { %v1489_v0 = vadd.f32 %v1488_v9, %v1487_v5  ;;  %1225 = vrot.lane.b32.xlu2 %v2490_v18, %s1974_s15  ;;  %1148 = vst [vmem:[#allocation2 + $0x3c] sm:$0xf] %v1147_v37  ;;  %v1475_v17 = vsel %vm2473_vm9, %v1210_v2, %v1474_v49  ;;  %1227 = vrot.lane.b32.xlu0 %v1210_v2, %s1974_s15 }
 0x3aa   : > { %v1521_v25 = vsel %vm533_vm3, %v1513_v20, 0.0  ;;  %1323 = vst.msk [vmem:[#allocation2 + $0x10] sm:$0xf] %vm1131_vm5, %v2603_v45  ;;  %v1082_v26 = vshrl.u32 %v2603_v45, 16  ;;  %v1085_v6 = vshll.u32 %v2603_v45, 16 }
 0x3ab   : > { %v1491_v29 = vadd.f32 %v1490_v19, %v1489_v0  ;;  %v1522_v60 = vadd.f32 %v1521_v25, %v1520_v63  ;;  %1476 = vst [vmem:[#allocation2 + $0x2c] sm:$0xf] %v1475_v17  ;;  %v1191_v17 = vrot.slane %v1075_v7, 4  ;;  %v1192_v63 = vrot.slane %v1078_v14, 5  ;;  %v1483_v25 = vld [vmem:[#allocation2 + $0x50] sm:$0xf] }
 0x3ac   : > { %v1084_v31 = vrot.slane %v1082_v26, 7  ;;  %v1195_v21 = vrot.slane %v1082_v26, 4  ;;  %v1196_v32 = vrot.slane %v1085_v6, 5 }
 0x3ad   : > { %v1493_v36 = vadd.f32 %v1492_v11, %v1491_v29  ;;  %v1524_v39 = vadd.f32 %v1523_v23, %v1522_v60  ;;  %v1033_v46 = vpop.permute.xlu0 %1032  ;;  %v1193_v1 = vor.u32 %v1192_v63, %v1191_v17 }
 0x3ae   : > { %v1049_v48 = vmul.f32 %v1033_v46, %v1009_v3  ;;  %v1087_v4 = vor.u32 %v1085_v6, %v1084_v31  ;;  %v1197_v53 = vor.u32 %v1196_v32, %v1195_v21  ;;  %v1486_v32 = vld [vmem:[%s2039_s7] sm:$0x1] }
 0x3af   : > { %v1526_v16 = vadd.f32 %v1525_v33, %v1524_v39  ;;  %v1495_v57 = vadd.f32 %v1494_v34, %v1493_v36  ;;  %1390 = vrot.lane.b32.xlu1 %v2590_v8, %s1974_s15  ;;  %v1194_v21 = vrot.slane %v1193_v1, 4  ;;  %v1372_v1 = vld [vmem:[#allocation2 + $0x34] sm:$0xf] }
 0x3b0   : > { %1065 = vst.msk [vmem:[%s2049_s14 + $0x38] sm:$0xff] %vm533_vm3, %v1049_v48  ;;  %v2640_v38 = vpack.c.bf16 %v1049_v48, %v1049_v48  ;;  %v1138_v54 = vsel %vm2455_vm7, %v1087_v4, %v1137_v24  ;;  %v1198_v62 = vrot.slane %v1197_v53, 4  ;;  %v1519_v44 = vmul.f32 %v1049_v48, %v1049_v48 }
 0x3b1   : > { %v1497_v56 = vadd.f32 %v1496_v55, %v1495_v57  ;;  %v1528_v61 = vadd.f32 %v1527_v41, %v1526_v16  ;;  %1340 = vrot.lane.b32.xlu2 %v2490_v18, %s1973_s8  ;;  %1139 = vst [vmem:[#allocation2 + $0x18] sm:$0xf] %v1138_v54  ;;  %1342 = vrot.lane.b32.xlu0 %v1210_v2, %s1973_s8  ;;  %v1500_v3 = vsel %vm533_vm3, %v1049_v48, 0.0  ;;  %v1366_v54 = vld [vmem:[#allocation2 + $0x1c] sm:$0xf] }
 0x3b2   : > { %1329 = vst.msk [vmem:[#allocation2 + $0x58] sm:$0xf] %vm1131_vm5, %v2640_v38  ;;  %v1265_v43 = vshrl.u32 %v2640_v38, 16  ;;  %v1268_v49 = vshll.u32 %v2640_v38, 16  ;;  %v1466_v37 = vsel %vm2473_vm9, %v1198_v62, %v1465_v59  ;;  %v1533_v2 = vsel %vm533_vm3, %v1519_v44, 0.0 }
 0x3b3   : > { %v1499_v58 = vadd.f32 %v1498_v13, %v1497_v56  ;;  %v1530_v18 = vadd.f32 %v1529_v28, %v1528_v61  ;;  %1467 = vst [vmem:[#allocation2 + $0x8] sm:$0xf] %v1466_v37  ;;  %v1369_v44 = vld [vmem:[#allocation2 + $0x28] sm:$0xf] }
 0x3b4   : > { %v1330_v5 = vrot.slane %v1265_v43, 4  ;;  %v1331_v9 = vrot.slane %v1268_v49, 5  ;;  %v1267_v24 = vrot.slane %v1265_v43, 7 }
 0x3b5   : > { %v1501_v20 = vadd.f32 %v1500_v3, %v1499_v58  ;;  %v1532_v8 = vadd.f32 %v1531_v50, %v1530_v18 }
 0x3b6   : > { %v1332_v19 = vor.u32 %v1331_v9, %v1330_v5  ;;  %v1270_v34 = vor.u32 %v1268_v49, %v1267_v24 }
 0x3b7   : > { %v1502_v22 = vrot.slane %v1501_v20, 4  ;;  %v1534_v0 = vadd.f32 %v1533_v2, %v1532_v8  ;;  %1273 = vrot.lane.b32.xlu1 %v1087_v4, %s1975_s11 }
 0x3b8   : > { %v1333_v26 = vrot.slane %v1332_v19, 4 }
 0x3b9   : > { %v1503_v6 = vadd.f32 %v1502_v22, %v1501_v20  ;;  %v1535_v23 = vrot.slane %v1534_v0, 4  ;;  %1164 = vrot.lane.b32.xlu2 %v2603_v45, %s1973_s8  ;;  %1221 = vrot.lane.b32.xlu0 %v1198_v62, %s1974_s15 }
 0x3ba   : > { %v1484_v11 = vsel %vm2473_vm9, %v1333_v26, %v1483_v25 }
 0x3bb   : > { %v1504_v7 = vrot.slane %v1503_v6, 2  ;;  %v1536_v29 = vadd.f32 %v1535_v23, %v1534_v0  ;;  %1485 = vst [vmem:[#allocation2 + $0x50] sm:$0xf] %v1484_v11 }
 0x3bd   : > { %v1505_v14 = vadd.f32 %v1504_v7, %v1503_v6  ;;  %v1537_v60 = vrot.slane %v1536_v29, 2  ;;  %v1360_v6 = vld [vmem:[#allocation2 + $0x4] sm:$0xf] }
 0x3bf   : > { %v1506_v30 = vrot.slane %v1505_v14, 1  ;;  %v1538_v31 = vadd.f32 %v1537_v60, %v1536_v29  ;;  %1384 = vrot.lane.b32.xlu1 %v1087_v4, %s1974_s15 }
 0x3c1   : > { %v1507_v33 = vadd.f32 %v1506_v30, %v1505_v14  ;;  %v1539_v35 = vrot.slane %v1538_v31, 1  ;;  %1219 = vrot.lane.b32.xlu2 %v1194_v21, %s1974_s15  ;;  %1336 = vrot.lane.b32.xlu0 %v1198_v62, %s1973_s8  ;;  %v1297_v62 = vld [vmem:[#allocation2] sm:$0xf] }
 0x3c3   : > { %v1508_v36 = vadd.f32 %v1507_v33, %v1486_v32  ;;  %v1540_v39 = vadd.f32 %v1539_v35, %v1538_v31 }
 0x3c5   : > { %1510 = vst.msk [vmem:[%s2039_s7] sm:$0x1] %vm1509_vm10, %v1508_v36  ;;  %v1541_v46 = vadd.f32 %v1540_v39, %v1511_v40 }
 0x3c7   : > { %1542 = vst.msk [vmem:[%s2039_s7 + $0x1] sm:$0x1] %vm1509_vm10, %v1541_v46  ;;  %1174 = vrot.lane.b32.xlu1 %v2542_v27, %s1973_s8 }
 0x3c9   : > { %1334 = vrot.lane.b32.xlu2 %v1194_v21, %s1973_s8  ;;  %1283 = vrot.lane.b32.xlu0 %v2561_v42, %s1975_s11 }
 0x3cf   : > { %1229 = vrot.lane.b32.xlu1 %v2547_v15, %s1974_s15 }
 0x3d1   : > { %1428 = vrot.lane.b32.xlu2 %v2603_v45, %s1975_s11  ;;  %1394 = vrot.lane.b32.xlu0 %v2561_v42, %s1974_s15 }
 0x3d7   : > { %1344 = vrot.lane.b32.xlu1 %v2547_v15, %s1973_s8  ;;  %v2699_v45 = vpop.permute.xlu2 %1275 }
 0x3d9   : > { %1281 = vrot.lane.b32.xlu2 %v2532_v10, %s1975_s11  ;;  %1348 = vrot.lane.b32.xlu0 %v1333_v26, %s1973_s8 }
 0x3df   : > { %1285 = vrot.lane.b32.xlu1 %v1270_v34, %s1975_s11 }
 0x3e1   : > { %1392 = vrot.lane.b32.xlu2 %v2532_v10, %s1974_s15  ;;  %1436 = vrot.lane.b32.xlu0 %v2513_v12, %s1975_s11  ;;  %v2709_v10 = vpop.permute.xlu2 %1386 }
 0x3e7   : > { %1396 = vrot.lane.b32.xlu1 %v1270_v34, %s1974_s15 }
 0x3e9   : > { %1231 = vrot.lane.b32.xlu2 %v2574_v52, %s1974_s15  ;;  %v1167_v15 = vpop.permute.xlu0 %1166 }
 0x3ea   : > { %1186 = vst.msk [vmem:[#allocation2 + $0x24] sm:$0xf] %vm1183_vm11, %v1167_v15 }
 0x3ef   : > { %1438 = vrot.lane.b32.xlu1 %v2542_v27, %s1975_s11 }
 0x3f1   : > { %1346 = vrot.lane.b32.xlu2 %v2574_v52, %s1973_s8  ;;  %v2711_v12 = vpop.permute.xlu0 %1430  ;;  %v1169_v42 = vpop.permute.xlu1 %1168  ;;  %v1249_v27 = vld [vmem:[#allocation2 + $0x24] sm:$0xf] }
 0x3f2   : > { %1187 = vst.msk [vmem:[#allocation2 + $0x30] sm:$0xf] %vm1183_vm11, %v1169_v42 }
 0x3f9   : > { %1434 = vrot.lane.b32.xlu2 %v2568_v47, %s1975_s11  ;;  %v1224_v4 = vpop.permute.xlu1 %1223  ;;  %v1278_v53 = vpop.permute.xlu0 %1277  ;;  %v1252_v57 = vld [vmem:[#allocation2 + $0x30] sm:$0xf] }
 0x3fa   : > { %v1250_v55 = vsel %vm2718_vm13, %v1224_v4, %v1249_v27  ;;  %v1363_v27 = vld [vmem:[#allocation2 + $0x10] sm:$0xf] }
 0x3fb   : > { %v1171_v52 = vpop.permute.xlu2 %1170  ;;  %1251 = vst [vmem:[#allocation2 + $0x24] sm:$0xf] %v1250_v55 }
 0x3fc   : > { %1188 = vst.msk [vmem:[#allocation2 + $0x3c] sm:$0xf] %vm1183_vm11, %v1171_v52 }
 0x401   : > { %1440 = vrot.lane.b32.xlu2 %v2640_v38, %s1975_s11  ;;  %v1339_v59 = vpop.permute.xlu1 %1338  ;;  %v1389_v38 = vpop.permute.xlu0 %1388 }
 0x402   : > { %v1306_v28 = vld [vmem:[#allocation2 + $0x24] sm:$0xf]  ;;  %v1367_v56 = vsel %vm2729_vm15, %v1339_v59, %v1366_v54 }
 0x403   : > { %v1226_v51 = vpop.permute.xlu2 %1225  ;;  %v1307_v61 = vsel %vm2735_vm0, %v1278_v53, %v1306_v28  ;;  %1368 = vst [vmem:[#allocation2 + $0x1c] sm:$0xf] %v1367_v56  ;;  %v1255_v17 = vld [vmem:[#allocation2 + $0x3c] sm:$0xf] }
 0x404   : > { %v1253_v41 = vsel %vm2718_vm13, %v1226_v51, %v1252_v57  ;;  %1308 = vst [vmem:[#allocation2 + $0x24] sm:$0xf] %v1307_v61 }
 0x405   : > { %1254 = vst [vmem:[#allocation2 + $0x30] sm:$0xf] %v1253_v41 }
 0x409   : > { %v1433_v58 = vpop.permute.xlu1 %1432  ;;  %v1272_v18 = vpop.permute.xlu0 %1271 }
 0x40a   : > { %v1412_v37 = vld [vmem:[#allocation2 + $0x1c] sm:$0xf]  ;;  %v1298_v50 = vsel %vm2735_vm0, %v1272_v18, %v1297_v62 }
 0x40b   : > { %v1341_v43 = vpop.permute.xlu2 %1340  ;;  %v1413_v3 = vsel %vm2747_vm1, %v1389_v38, %v1412_v37  ;;  %1299 = vst [vmem:[#allocation2] sm:$0xf] %v1298_v50  ;;  %v1375_v37 = vld [vmem:[#allocation2 + $0x40] sm:$0xf]  ;;  %v1381_v50 = vld [vmem:[#allocation2 + $0x58] sm:$0xf] }
 0x40c   : > { %v1370_v49 = vsel %vm2729_vm15, %v1341_v43, %v1369_v44  ;;  %1414 = vst [vmem:[#allocation2 + $0x1c] sm:$0xf] %v1413_v3  ;;  %v1309_v22 = vld [vmem:[#allocation2 + $0x30] sm:$0xf] }
 0x40d   : > { %1371 = vst [vmem:[#allocation2 + $0x28] sm:$0xf] %v1370_v49 }
 0x40e   : > { %1452 = vst.msk [vmem:[#allocation2 + $0x1c] sm:$0xf] %vm1295_vm14, %v1433_v58  ;;  %v1378_v58 = vld [vmem:[#allocation2 + $0x4c] sm:$0xf] }
 0x411   : > { %v1163_v9 = vpop.permute.xlu1 %1162 }
 0x412   : > { %v1173_v20 = vpop.permute.xlu0 %1172  ;;  %1184 = vst.msk [vmem:[#allocation2 + $0xc] sm:$0xf] %vm1183_vm11, %v1163_v9 }
 0x413   : > { %v1165_v5 = vpop.permute.xlu2 %1164  ;;  %1189 = vst.msk [vmem:[#allocation2 + $0x48] sm:$0xf] %vm1183_vm11, %v1173_v20 }
 0x414   : > { %1185 = vst.msk [vmem:[#allocation2 + $0x18] sm:$0xf] %vm1183_vm11, %v1165_v5  ;;  %v1415_v29 = vld [vmem:[#allocation2 + $0x28] sm:$0xf] }
 0x419   : > { %v1243_v2 = vld [vmem:[#allocation2 + $0xc] sm:$0xf]  ;;  %v1280_v19 = vpop.permute.xlu1 %1279 }
 0x41a   : > { %v1310_v25 = vsel %vm2735_vm0, %v1280_v19, %v1309_v22  ;;  %v1258_v56 = vld [vmem:[#allocation2 + $0x48] sm:$0xf] }
 0x41b   : > { %v1220_v8 = vpop.permute.xlu2 %1219  ;;  %v1228_v0 = vpop.permute.xlu0 %1227  ;;  %1311 = vst [vmem:[#allocation2 + $0x30] sm:$0xf] %v1310_v25  ;;  %v1246_v35 = vld [vmem:[#allocation2 + $0x18] sm:$0xf] }
 0x41c   : > { %v1244_v63 = vsel %vm2718_vm13, %v1220_v8, %v1243_v2  ;;  %v1256_v26 = vsel %vm2718_vm13, %v1228_v0, %v1255_v17 }
 0x41d   : > { %1245 = vst [vmem:[#allocation2 + $0xc] sm:$0xf] %v1244_v63 }
 0x41e   : > { %1257 = vst [vmem:[#allocation2 + $0x3c] sm:$0xf] %v1256_v26 }
 0x421   : > { %v1391_v7 = vpop.permute.xlu1 %1390 }
 0x422   : > { %v1416_v60 = vsel %vm2747_vm1, %v1391_v7, %v1415_v29 }
 0x423   : > { %v1335_v23 = vpop.permute.xlu2 %1334  ;;  %v1343_v14 = vpop.permute.xlu0 %1342  ;;  %1417 = vst [vmem:[#allocation2 + $0x28] sm:$0xf] %v1416_v60 }
 0x424   : > { %v1361_v11 = vsel %vm2729_vm15, %v1335_v23, %v1360_v6  ;;  %v1373_v30 = vsel %vm2729_vm15, %v1343_v14, %v1372_v1  ;;  %v1300_v32 = vld [vmem:[#allocation2 + $0xc] sm:$0xf] }
 0x425   : > { %1362 = vst [vmem:[#allocation2 + $0x4] sm:$0xf] %v1361_v11  ;;  %v1312_v39 = vld [vmem:[#allocation2 + $0x3c] sm:$0xf] }
 0x426   : > { %1374 = vst [vmem:[#allocation2 + $0x34] sm:$0xf] %v1373_v30 }
 0x429   : > { %v1274_v21 = vpop.permute.xlu1 %1273 }
 0x42a   : > { %v1301_v40 = vsel %vm2735_vm0, %v1274_v21, %v1300_v32 }
 0x42b   : > { %v1429_v31 = vpop.permute.xlu2 %1428  ;;  %v1222_v33 = vpop.permute.xlu0 %1221  ;;  %1302 = vst [vmem:[#allocation2 + $0xc] sm:$0xf] %v1301_v40 }
 0x42c   : > { %v1247_v36 = vsel %vm2718_vm13, %v1222_v33, %v1246_v35  ;;  %v1406_v15 = vld [vmem:[#allocation2 + $0x4] sm:$0xf] }
 0x42d   : > { %1248 = vst [vmem:[#allocation2 + $0x18] sm:$0xf] %v1247_v36  ;;  %v1418_v57 = vld [vmem:[#allocation2 + $0x34] sm:$0xf] }
 0x431   : > { %v1385_v34 = vpop.permute.xlu1 %1384 }
 0x432   : > { %v1407_v52 = vsel %vm2747_vm1, %v1385_v34, %v1406_v15 }
 0x433   : > { %v1282_v46 = vpop.permute.xlu2 %1281  ;;  %v1337_v42 = vpop.permute.xlu0 %1336  ;;  %1408 = vst [vmem:[#allocation2 + $0x4] sm:$0xf] %v1407_v52 }
 0x434   : > { %v1313_v24 = vsel %vm2735_vm0, %v1282_v46, %v1312_v39  ;;  %v1303_v4 = vld [vmem:[#allocation2 + $0x18] sm:$0xf]  ;;  %v1364_v53 = vsel %vm2729_vm15, %v1337_v42, %v1363_v27  ;;  %1450 = vst.msk [vmem:[#allocation2 + $0x4] sm:$0xf] %vm1295_vm14, %v1429_v31 }
 0x435   : > { %1314 = vst [vmem:[#allocation2 + $0x3c] sm:$0xf] %v1313_v24  ;;  %v1304_v55 = vsel %vm2735_vm0, %v2699_v45, %v1303_v4 }
 0x436   : > { %1305 = vst [vmem:[#allocation2 + $0x18] sm:$0xf] %v1304_v55 }
 0x437   : > { %1365 = vst [vmem:[#allocation2 + $0x10] sm:$0xf] %v1364_v53 }
 0x439   : > { %v1175_v54 = vpop.permute.xlu1 %1174 }
 0x43a   : > { %1190 = vst.msk [vmem:[#allocation2 + $0x54] sm:$0xf] %vm1183_vm11, %v1175_v54 }
 0x43b   : > { %v1393_v51 = vpop.permute.xlu2 %1392  ;;  %v1284_v59 = vpop.permute.xlu0 %1283 }
 0x43c   : > { %v1419_v41 = vsel %vm2747_vm1, %v1393_v51, %v1418_v57 }
 0x43d   : > { %1420 = vst [vmem:[#allocation2 + $0x34] sm:$0xf] %v1419_v41 }
 0x43e   : > { %v1409_v38 = vld [vmem:[#allocation2 + $0x10] sm:$0xf] }
 0x43f   : > { %v1410_v28 = vsel %vm2747_vm1, %v2709_v10, %v1409_v38 }
 0x440   : > { %1411 = vst [vmem:[#allocation2 + $0x10] sm:$0xf] %v1410_v28 }
 0x441   : > { %1451 = vst.msk [vmem:[#allocation2 + $0x10] sm:$0xf] %vm1295_vm14, %v2711_v12  ;;  %v1230_v61 = vpop.permute.xlu1 %1229  ;;  %v1261_v44 = vld [vmem:[#allocation2 + $0x54] sm:$0xf] }
 0x442   : > { %v1259_v43 = vsel %vm2718_vm13, %v1230_v61, %v1258_v56 }
 0x443   : > { %v1232_v45 = vpop.permute.xlu2 %1231  ;;  %v1395_v62 = vpop.permute.xlu0 %1394  ;;  %1260 = vst [vmem:[#allocation2 + $0x48] sm:$0xf] %v1259_v43 }
 0x444   : > { %v1262_v49 = vsel %vm2718_vm13, %v1232_v45, %v1261_v44 }
 0x445   : > { %1263 = vst [vmem:[#allocation2 + $0x54] sm:$0xf] %v1262_v49 }
 0x449   : > { %v1345_v12 = vpop.permute.xlu1 %1344 }
 0x44a   : > { %v1315_v5 = vld [vmem:[#allocation2 + $0x48] sm:$0xf]  ;;  %v1376_v9 = vsel %vm2729_vm15, %v1345_v12, %v1375_v37 }
 0x44b   : > { %v1347_v18 = vpop.permute.xlu2 %1346  ;;  %v1349_v3 = vpop.permute.xlu0 %1348  ;;  %v1316_v20 = vsel %vm2735_vm0, %v1284_v59, %v1315_v5  ;;  %1377 = vst [vmem:[#allocation2 + $0x40] sm:$0xf] %v1376_v9 }
 0x44c   : > { %v1379_v10 = vsel %vm2729_vm15, %v1347_v18, %v1378_v58  ;;  %v1382_v48 = vsel %vm2729_vm15, %v1349_v3, %v1381_v50  ;;  %1317 = vst [vmem:[#allocation2 + $0x48] sm:$0xf] %v1316_v20  ;;  %v1318_v19 = vld [vmem:[#allocation2 + $0x54] sm:$0xf] }
 0x44d   : > { %1380 = vst [vmem:[#allocation2 + $0x4c] sm:$0xf] %v1379_v10 }
 0x44e   : > { %1383 = vst [vmem:[#allocation2 + $0x58] sm:$0xf] %v1382_v48 }
 0x451   : > { %v1286_v2 = vpop.permute.xlu1 %1285 }
 0x452   : > { %v1421_v0 = vld [vmem:[#allocation2 + $0x40] sm:$0xf]  ;;  %v1319_v17 = vsel %vm2735_vm0, %v1286_v2, %v1318_v19 }
 0x453   : > { %v1435_v8 = vpop.permute.xlu2 %1434  ;;  %v1437_v22 = vpop.permute.xlu0 %1436  ;;  %v1422_v47 = vsel %vm2747_vm1, %v1395_v62, %v1421_v0  ;;  %1320 = vst [vmem:[#allocation2 + $0x54] sm:$0xf] %v1319_v17 }
 0x454   : > { %1453 = vst.msk [vmem:[#allocation2 + $0x28] sm:$0xf] %vm1295_vm14, %v1435_v8  ;;  %v1424_v25 = vld [vmem:[#allocation2 + $0x4c] sm:$0xf] }
 0x455   : > { %1454 = vst.msk [vmem:[#allocation2 + $0x34] sm:$0xf] %vm1295_vm14, %v1437_v22 }
 0x456   : > { %1423 = vst [vmem:[#allocation2 + $0x40] sm:$0xf] %v1422_v47 }
 0x459   : > { %v1397_v63 = vpop.permute.xlu1 %1396 }
 0x45a   : > { %v1425_v26 = vsel %vm2747_vm1, %v1397_v63, %v1424_v25 }
 0x45b   : > { %v1441_v6 = vpop.permute.xlu2 %1440  ;;  %1426 = vst [vmem:[#allocation2 + $0x4c] sm:$0xf] %v1425_v26 }
 0x45c   : > { %1456 = vst.msk [vmem:[#allocation2 + $0x4c] sm:$0xf] %vm1295_vm14, %v1441_v6 }
 0x461   : > { %v1439_v23 = vpop.permute.xlu1 %1438 }
 0x462   : > { %1455 = vst.msk [vmem:[#allocation2 + $0x40] sm:$0xf] %vm1295_vm14, %v1439_v23 }
 0x463 PF: > { %s16_s22 = sadd.s32 1, %s1969_s22   ;;  %s2850_s18 = smov %s1961_s20 }
 0x464   : > { %p13_p8 = scmp.ge.s32.totalorder %s16_s22, 18   ;;  %s2851_s19 = smov %s1965_s21 }
 0x465   : > { %s2852_s20 = smov %s2855_s23  ;;  %s2853_s21 = smov %s2859_s24 }
 0x466   :  { %15 = sbr.rel (!%p13_p8) target bundleno = 3 (0x3), region = 83 }

// kernel: seq2seq_forward.5
= control target key start
LH: loop header
LB: loop body
LE: loop exit
PB: predicated region body
PF: predicated region fallthrough
CT: control target
= control target key end

     0   :  { %11 = vsyncpa [#allocation5], 0  ;;  %s2731_s0 = inlined_call_operand.vmem [shape: f32[8,2,64,16], index: 0, kind: input, shape index: {}]   ;;  %s2732_s1 = inlined_call_operand.vmem [shape: bf16[36,16], index: 1, kind: input, shape index: {}]   ;;  %s2733_s2 = inlined_call_operand.vmem [shape: f32[64,12], index: 2, kind: input, shape index: {}]   ;;  %s2734_s3 = inlined_call_operand.vmem [shape: f32[64,4], index: 3, kind: input, shape index: {}]   ;;  %s2735_s4 = inlined_call_operand.vmem [shape: f32[8,2,64,4], index: 4, kind: output, shape index: {0}]   ;;  %s2736_s5 = inlined_call_operand.hbm [shape: f32[2,2,4], index: 5, kind: output, shape index: {1}]  }
   0x1   :  { %13 = vsyncpa [#allocation5 + $0x1], 0  ;;  %s1821_s18 = smov 0   ;;  %s1823_s19 = smov 0  }
   0x2   :  { %s1825_s20 = smov 0   ;;  %s1827_s21 = smov 0  }
   0x3   :  { %s1829_s22 = smov 0   ;;  %s1831_s23 = smov 0  }
   0x4   :  { %s1833_s24 = smov 0   ;;  %s1835_s25 = smov 0  }
   0x5 LB: > { %2739 = sst [smem:[#allocation7_spill]] %s1772_s24  ;;  %s1506_s26 = sadd.s32 4294967295, %s1776_s25   ;;  %s1776_s25 = sphi %s1835_s25, %s19_s25   ;;  %s1772_s24 = sphi %s1833_s24, %s2758_s24   ;;  %s1768_s23 = sphi %s1831_s23, %s2763_s23   ;;  %s1764_s22 = sphi %s1829_s22, %s2756_s22   ;;  %s1760_s21 = sphi %s1827_s21, %s2762_s21   ;;  %s1756_s20 = sphi %s1825_s20, %s2761_s20   ;;  %s1752_s19 = sphi %s1823_s19, %s2760_s19   ;;  %s1748_s18 = sphi %s1821_s18, %s2759_s18  }
   0x6   : > { %s1507_s27 = sadd.s32 4294967294, %s1776_s25   ;;  %s28_s28 = sadd.s32 1, %s1768_s23 }
   0x7   : > { %p29_p0 = scmp.ge.s32.totalorder %s28_s28, 8  ;;  %s31_s29 = sadd.s32 1, %s1772_s24 }
   0x8   : > { %p167_p1 = scmp.ne.s32.totalorder %s1756_s20, %s1752_s19  ;;  %p168_p2 = scmp.eq.s32.totalorder %s1506_s26, 15 }
   0x9   : > { %s2765_s28 = smov (%p29_p0, %s28_s28), 0  ;;  %s2767_s29 = smov (!%p29_p0, %s31_s29), %s1772_s24 }
   0xa   : > { %2740 = sst [smem:[#allocation8_spill]] %s2765_s28  ;;  %p1870_p3 = por %p168_p2, %p167_p1 }
   0xb   : > { %p173_p4 = scmp.ne.s32.totalorder %s1752_s19, %s1748_s18  ;;  %p33_p5 = scmp.ge.s32.totalorder %s2767_s29, 2 }
   0xc   : > { %p174_p6 = scmp.eq.s32.totalorder %s1507_s27, 15  ;;  %p1510_p7 = scmp.ge.s32.totalorder %s1776_s25, 1 }
   0xd   : > { %p213_p8 = scmp.lt.s32.totalorder %s1776_s25, 17  ;;  %s2769_s29 = smov (%p33_p5, %s2767_s29), 0 }
   0xe   : > { %2742 = sst [smem:[#allocation9_spill]] %s2769_s29  ;;  %p1880_p9 = por %p174_p6, %p173_p4 }
   0xf   : > { %p214_p10 = pnand %p1510_p7, %p213_p8  ;;  %s154_s7 = ssub.s32 %s1772_s24, %s2769_s29 }
  0x10   : > { %s157_s8 = sadd.s32 1, %s1756_s20  ;;  %p155_p11 = scmp.eq.s32.totalorder %s154_s7, 0 }
  0x11   : > { %217 = sbr.rel (%p214_p10) target bundleno = 1143 (0x477), region = 36  ;;  %s251_s10 = sand.u32 (!%p214_p10), 1, %s1752_s19  }
  0x12   : > { %s1888_s9 = scalar_select %p155_p11, %s1756_s20, %s157_s8  }
  0x13   : > { %p254_p12 = scmp.lt.s32.totalorder (!%p214_p10), %s1760_s21, 7  ;;  %s1511_s11 = sshll.u32 (!%p214_p10), %s251_s10, 1 }
  0x14   : > { %p256_p13 = scmp.lt.s32.totalorder (!%p214_p10), %s1764_s22, 1  ;;  %s1907_s24 = scalar_lea.vmem (!%p214_p10), [#allocation4], %s1511_s11 }
  0x15   : > { %p1518_p0 = scmp.ne.s32.totalorder (!%p214_p10), %s1760_s21, 0 }
  0x16   : > { %s255_s12 = scalar_select %p254_p12, %s1760_s21, 7 }
  0x17   : > { %s257_s13 = scalar_select %p256_p13, %s1764_s22, 1 }
  0x18   : > { %s1513_s14 = sshll.u32 %s255_s12, 4  ;;  %276 = sbr.rel (%p1518_p0) target bundleno = 47 (0x2f), region = 40 }
  0x19   : > { %s1512_s15 = sshll.u32 %s257_s13, 3 }
  0x1a   : > { %s260_s16 = sadd.s32 %s1513_s14, %s1512_s15 }
  0x1b   : > { %s1514_s17 = sshll.u32 %s260_s16, 3 }
  0x1c   : > { %s1900_s7 = scalar_lea.vmem %s2731_s0, %s1514_s17  ;;  %s1905_s28 = scalar_lea.vmem %s2735_s4, %s1514_s17 }
  0x1d   : > { %vm277_vm0 = vcmask 289792   ;;  %v1778_v0 = vmov 0   ;;  %vm286_vm1 = vcmask 31744   ;;  %v1779_v1 = vmov 0.0  }
  0x1e   : > { %278 = vst.msk [vmem:[#allocation2] sm:$0xf] %vm277_vm0, %v1778_v0  ;;  %vm295_vm2 = vcmask 25600  }
  0x1f   : > { %279 = vst.msk [vmem:[#allocation2 + $0x4] sm:$0xf] %vm277_vm0, %v1778_v0 }
  0x20   : > { %280 = vst.msk [vmem:[#allocation2 + $0x8] sm:$0xf] %vm277_vm0, %v1778_v0 }
  0x21   : > { %281 = vst.msk [vmem:[#allocation2 + $0xc] sm:$0xf] %vm277_vm0, %v1778_v0 }
  0x22   : > { %282 = vst.msk [vmem:[#allocation2 + $0x10] sm:$0xf] %vm277_vm0, %v1778_v0 }
  0x23   : > { %283 = vst.msk [vmem:[#allocation2 + $0x14] sm:$0xf] %vm277_vm0, %v1778_v0 }
  0x24   : > { %284 = vst.msk [vmem:[#allocation2 + $0x18] sm:$0xf] %vm277_vm0, %v1778_v0 }
  0x25   : > { %285 = vst.msk [vmem:[#allocation2 + $0x1c] sm:$0xf] %vm277_vm0, %v1778_v0 }
  0x26   : > { %287 = vst.msk [vmem:[#allocation3] sm:$0xff] %vm286_vm1, %v1779_v1 }
  0x27   : > { %288 = vst.msk [vmem:[#allocation3 + $0x8] sm:$0xff] %vm286_vm1, %v1779_v1 }
  0x28   : > { %289 = vst.msk [vmem:[#allocation3 + $0x10] sm:$0xff] %vm286_vm1, %v1779_v1 }
  0x29   : > { %290 = vst.msk [vmem:[#allocation3 + $0x18] sm:$0xff] %vm286_vm1, %v1779_v1 }
  0x2a   : > { %291 = vst.msk [vmem:[#allocation3 + $0x20] sm:$0xff] %vm286_vm1, %v1779_v1 }
  0x2b   : > { %292 = vst.msk [vmem:[#allocation3 + $0x28] sm:$0xff] %vm286_vm1, %v1779_v1 }
  0x2c   : > { %293 = vst.msk [vmem:[#allocation3 + $0x30] sm:$0xff] %vm286_vm1, %v1779_v1 }
  0x2d   : > { %294 = vst.msk [vmem:[#allocation3 + $0x38] sm:$0xff] %vm286_vm1, %v1779_v1 }
  0x2e   : > { %296 = vst.msk [vmem:[%s1907_s24] sm:$0x3] %vm295_vm2, %v1779_v1 }
  0x2f PF: > { %v1911_v2 = vld [vmem:[#allocation3 + $0x10] sm:$0xff]  ;;  %v1913_v3 = vld [vmem:[#allocation3] sm:$0xff]  ;;  %s1780_s11 = smov 4   ;;  %vm366_vm3 = vcmask 1041408   ;;  %v1928_v10 = vld [vmem:[#allocation3 + $0x8] sm:$0xff]  ;;  %vm353_vm4 = vcmask 293888  }
  0x30   : > { %v317_v4 = vld [vmem:[%s2732_s1 + $0x10] sm:$0x3]  ;;  %443 = vrot.lane.b32.xlu1 %v1911_v2, %s1780_s11  ;;  %439 = vrot.lane.b32.xlu0 %v1913_v3, %s1780_s11  ;;  %v1926_v9 = vld [vmem:[#allocation3 + $0x18] sm:$0xff]  ;;  %v1556_v11 = vld [vmem:[%s2732_s1 + $0x8] sm:$0xff]  ;;  %s1781_s16 = smov 8   ;;  %vm487_vm5 = vcmask 31744  }
  0x31   : > { %v347_v5 = vunpack.c.l.b16 %v317_v4  ;;  %v1922_v7 = vld [vmem:[#allocation3 + $0x20] sm:$0xff]  ;;  %v1552_v15 = vld [vmem:[#allocation2 + $0x8] sm:$0xff]  ;;  %v1553_v16 = vld [vmem:[#allocation2 + $0x10] sm:$0xff]  ;;  %vm496_vm6 = vcmask 64512   ;;  %s1782_s12 = smov 120   ;;  %s1784_s26 = smov 12  }
  0x32   : > { %447 = vrot.lane.b32.xlu2 %v1922_v7, %s1780_s11  ;;  %v1937_v12 = vld [vmem:[#allocation3 + $0x28] sm:$0xff]  ;;  %v1555_v13 = vld [vmem:[%s2732_s1] sm:$0xff]  ;;  %v1554_v17 = vld [vmem:[#allocation2 + $0x18] sm:$0xff]  ;;  %s1785_s29 = smov 116   ;;  %vm906_vm7 = vcmask 27648   ;;  %vm1324_vm10 = vcmask 24576  }
  0x33   : > { %v350_v6 = vpack.c.b16 %v347_v5, %v347_v5  ;;  %v1551_v14 = vld [vmem:[#allocation2] sm:$0xff]  ;;  %v413_v18 = vld [vmem:[#allocation3 + $0x30] sm:$0xff]  ;;  %v416_v51 = vld [vmem:[%s2733_s2 + $0x8] sm:$0xff]  ;;  %vm907_vm8 = vsmask.f32 7938  ;;  %vm958_vm11 = vcmask 60448  }
  0x34   : > { %v1958_v19 = vld [vmem:[#allocation3 + $0x38] sm:$0xff]  ;;  %v417_v33 = vld [vmem:[%s2733_s2 + $0x10] sm:$0xff]  ;;  %v415_v35 = vld [vmem:[%s2733_s2] sm:$0xff]  ;;  %vm1070_vm12 = vcmask 126048   ;;  %vm1121_vm14 = vcmask 158848   ;;  %vm1015_vm15 = vcmask 93248  }
  0x35   : > { %v368_v8 = vsel %vm366_vm3, %v350_v6, 0  ;;  %v305_v37 = vld [vmem:[%s1900_s7] sm:$0xff]  ;;  %v307_v38 = vld [vmem:[%s1900_s7 + $0x10] sm:$0xff]  ;;  %v418_v55 = vld [vmem:[%s2733_s2 + $0x18] sm:$0xff]  ;;  %vm1016_vm0 = vsmask.f32 3328 }
  0x36   : > { %375 = vmatpush.bf16.msra.mxu0 %v368_v8  ;;  %1557 = vmatpush.bf16.msra.mxu1 %v368_v8  ;;  %v306_v57 = vld [vmem:[%s1900_s7 + $0x8] sm:$0xff]  ;;  %v308_v58 = vld [vmem:[%s1900_s7 + $0x18] sm:$0xff]  ;;  %v309_v59 = vld [vmem:[%s1900_s7 + $0x20] sm:$0xff]  ;;  %s1383_s17 = sshll.u32 %s1907_s24, 4  ;;  %s1384_s17 = int_to_ptr.vmem [resolvable:$true] %s1383_s17 }
  0x37   : > { %1558 = vmatpush.bf16.msra.mxu2 %v368_v8  ;;  %1559 = vmatpush.bf16.msra.mxu3 %v368_v8  ;;  %v421_v0 = vld [vmem:[%s2733_s2 + $0x30] sm:$0xff]  ;;  %v419_v5 = vld [vmem:[%s2733_s2 + $0x20] sm:$0xff]  ;;  %vm2240_vm9 = vmand %vm906_vm7, %vm907_vm8 }
  0x38   : > { %445 = vrot.lane.b32.xlu1 %v1926_v9, %s1780_s11  ;;  %441 = vrot.lane.b32.xlu0 %v1928_v10, %s1780_s11  ;;  %vm2508_vm13 = vmand %vm1070_vm12, %vm907_vm8 }
  0x39   : > { %vm2535_vm1 = vmand %vm1015_vm15, %vm1016_vm0 }
  0x3a   : > { %376 = vmatpush.bf16.msra.mxu0 %v1556_v11  ;;  %1560 = vmatpush.bf16.msra.mxu1 %v1556_v11 }
  0x3b   : > { %1561 = vmatpush.bf16.msra.mxu2 %v1556_v11  ;;  %1562 = vmatpush.bf16.msra.mxu3 %v1556_v11 }
  0x3c   : > { %449 = vrot.lane.b32.xlu2 %v1937_v12, %s1780_s11 }
  0x3e   : > { %377 = vmatpush.bf16.msra.mxu0 %v1555_v13  ;;  %1563 = vmatpush.bf16.msra.mxu1 %v1555_v13 }
  0x3f   : > { %1564 = vmatpush.bf16.msra.mxu2 %v1555_v13  ;;  %1565 = vmatpush.bf16.msra.mxu3 %v1555_v13 }
  0x40   : > { %465 = vrot.lane.b32.xlu1 %v1928_v10, %s1781_s16  ;;  %463 = vrot.lane.b32.xlu0 %v1913_v3, %s1781_s16 }
  0x41   : > { %1543 = vmatmul.msk.bf16.vlgmr.msra.gmra.mxu0 %vm353_vm4, %v1551_v14  ;;  %1544 = vmatmul.msk.bf16.vlgmr.msra.gmra.mxu1 %vm353_vm4, %v1552_v15 }
  0x42   : > { %1545 = vmatmul.msk.bf16.vlgmr.msra.gmra.mxu2 %vm353_vm4, %v1553_v16  ;;  %1546 = vmatmul.msk.bf16.vlgmr.msra.gmra.mxu3 %vm353_vm4, %v1554_v17 }
  0x44   : > { %467 = vrot.lane.b32.xlu2 %v1911_v2, %s1781_s16 }
  0x48   : > { %471 = vrot.lane.b32.xlu1 %v1922_v7, %s1781_s16  ;;  %469 = vrot.lane.b32.xlu0 %v1926_v9, %s1781_s16 }
  0x4c   : > { %473 = vrot.lane.b32.xlu2 %v1937_v12, %s1781_s16 }
  0x50   : > { %451 = vrot.lane.b32.xlu0 %v413_v18, %s1780_s11  ;;  %475 = vrot.lane.b32.xlu1 %v413_v18, %s1781_s16 }
  0x54   : > { %453 = vrot.lane.b32.xlu2 %v1958_v19, %s1780_s11 }
  0x58   : > { %477 = vrot.lane.b32.xlu0 %v1958_v19, %s1781_s16 }
  0x8c   : > { %v1968_v22 = vpop.permute.xlu2 %447 }
  0x8d   : > { %v492_v62 = vsel %vm487_vm5, %v1922_v7, %v1968_v22 }
  0x96   : > { %v1974_v25 = vpop.permute.xlu2 %449 }
  0x97   : > { %v493_v11 = vsel %vm487_vm5, %v1937_v12, %v1974_v25  ;;  %v420_v12 = vld [vmem:[%s2733_s2 + $0x28] sm:$0xff] }
  0x9e   : > { %v468_v28 = vpop.permute.xlu2 %467 }
  0xa2   : > { %v1964_v20 = vpop.permute.xlu1 %443  ;;  %v1966_v21 = vpop.permute.xlu0 %439 }
  0xa3   : > { %v490_v29 = vsel %vm487_vm5, %v1911_v2, %v1964_v20  ;;  %v488_v32 = vsel %vm487_vm5, %v1913_v3, %v1966_v21  ;;  %v311_v2 = vld [vmem:[%s1900_s7 + $0x30] sm:$0xff] }
  0xa4   : > { %v499_v34 = vsel %vm496_vm6, %v490_v29, %v468_v28 }
  0xa5   : > { %v507_v41 = vmul.f32 %v499_v34, %v417_v33 }
  0xa6   : > { %v474_v43 = vpop.permute.xlu2 %473 }
  0xaa   : > { %v1970_v23 = vpop.permute.xlu1 %445  ;;  %v1972_v24 = vpop.permute.xlu0 %441 }
  0xab   : > { %v489_v46 = vsel %vm487_vm5, %v1928_v10, %v1972_v24  ;;  %v491_v50 = vsel %vm487_vm5, %v1926_v9, %v1970_v23 }
  0xae   : > { %v2035_v10 = vpop.permute.xlu2 %453 }
  0xaf   : > { %v495_v28 = vsel %vm487_vm5, %v1958_v19, %v2035_v10  ;;  %v422_v19 = vld [vmem:[%s2733_s2 + $0x38] sm:$0xff] }
  0xb2   : > { %v466_v26 = vpop.permute.xlu1 %465  ;;  %v464_v27 = vpop.permute.xlu0 %463 }
  0xb3   : > { %v497_v36 = vsel %vm496_vm6, %v488_v32, %v464_v27  ;;  %v498_v52 = vsel %vm496_vm6, %v489_v46, %v466_v26  ;;  %v310_v32 = vld [vmem:[%s1900_s7 + $0x28] sm:$0xff] }
  0xb4   : > { %v505_v42 = vmul.f32 %v497_v36, %v415_v35  ;;  %v506_v63 = vmul.f32 %v498_v52, %v416_v51 }
  0xba   : > { %v472_v30 = vpop.permute.xlu1 %471  ;;  %v470_v31 = vpop.permute.xlu0 %469 }
  0xbb   : > { %v500_v56 = vsel %vm496_vm6, %v491_v50, %v470_v31  ;;  %v501_v6 = vsel %vm496_vm6, %v492_v62, %v472_v30  ;;  %v502_v31 = vsel %vm496_vm6, %v493_v11, %v474_v43 }
  0xbc   : > { %v508_v8 = vmul.f32 %v500_v56, %v418_v55  ;;  %v509_v27 = vmul.f32 %v501_v6, %v419_v5 }
  0xbe   : > { %v379_v39 = vpop.f32.mrf.mxu0  ;;  %v384_v40 = vpop.f32.mrf.mxu1 }
  0xbf   : > { %v1992_v44 = vadd.f32 %v379_v39, %v305_v37  ;;  %v1994_v45 = vadd.f32 %v384_v40, %v307_v38  ;;  %v312_v39 = vld [vmem:[%s1900_s7 + $0x38] sm:$0xff]  ;;  %s1783_s7 = smov 124  }
  0xc1   : > { %v513_v47 = vadd.f32 %v505_v42, %v1992_v44  ;;  %v515_v48 = vadd.f32 %v507_v41, %v1994_v45  ;;  %v510_v42 = vmul.f32 %v502_v31, %v420_v12 }
  0xc2   : > { %v2001_v49 = vpop.permute.xlu0 %451  ;;  %v476_v54 = vpop.permute.xlu1 %475 }
  0xc3   : > { %1650 = vtanh.f32 %v513_v47  ;;  %v494_v53 = vsel %vm487_vm5, %v413_v18, %v2001_v49 }
  0xc4   : > { %1652 = vtanh.f32 %v515_v48  ;;  %v503_v1 = vsel %vm496_vm6, %v494_v53, %v476_v54 }
  0xc5   : > { %v389_v60 = vpop.f32.mrf.mxu2  ;;  %v394_v61 = vpop.f32.mrf.mxu3  ;;  %v511_v15 = vmul.f32 %v503_v1, %v421_v0 }
  0xc6   : > { %v381_v3 = vpop.f32.mrf.mxu0  ;;  %v386_v4 = vpop.f32.mrf.mxu1  ;;  %v2040_v13 = vadd.f32 %v389_v60, %v309_v59  ;;  %v2042_v16 = vadd.f32 %v394_v61, %v311_v2 }
  0xc7   : > { %v2031_v9 = vadd.f32 %v381_v3, %v306_v57  ;;  %v2033_v7 = vadd.f32 %v386_v4, %v308_v58 }
  0xc8   : > { %v517_v34 = vadd.f32 %v509_v27, %v2040_v13  ;;  %v519_v36 = vadd.f32 %v511_v15, %v2042_v16 }
  0xc9   : > { %v1651_v14 = vpop.eup %1650  ;;  %v514_v17 = vadd.f32 %v506_v63, %v2031_v9  ;;  %v516_v18 = vadd.f32 %v508_v8, %v2033_v7 }
  0xca   : > { %v1653_v26 = vpop.eup %1652  ;;  %v478_v29 = vpop.permute.xlu0 %477  ;;  %v529_v30 = vmul.f32 0.5, %v1651_v14 }
  0xcb   : > { %v531_v33 = vmul.f32 0.5, %v1653_v26  ;;  %1654 = vtanh.f32 %v514_v17  ;;  %v504_v38 = vsel %vm496_vm6, %v495_v28, %v478_v29 }
  0xcc   : > { %v2055_v35 = vadd.f32 0.5, %v529_v30  ;;  %1656 = vtanh.f32 %v516_v18  ;;  %v512_v47 = vmul.f32 %v504_v38, %v422_v19 }
  0xcd   : > { %v391_v37 = vpop.f32.mrf.mxu2  ;;  %v396_v40 = vpop.f32.mrf.mxu3  ;;  %v539_v41 = vadd.f32 0.5, %v531_v33  ;;  %1658 = vtanh.f32 %v517_v34 }
  0xce   : > { %v2063_v43 = vadd.f32 %v391_v37, %v310_v32  ;;  %561 = vrot.lane.b32.xlu1 %v2055_v35, %s1782_s12  ;;  %v2069_v48 = vadd.f32 %v396_v40, %v312_v39  ;;  %1660 = vtanh.f32 %v519_v36 }
  0xcf   : > { %565 = vrot.lane.b32.xlu0 %v539_v41, %s1782_s12  ;;  %v547_v33 = vmul.f32 %v539_v41, %v1964_v20  ;;  %v545_v20 = vmul.f32 %v2055_v35, %v1966_v21 }
  0xd0   : > { %v518_v46 = vadd.f32 %v510_v42, %v2063_v43  ;;  %v520_v53 = vadd.f32 %v512_v47, %v2069_v48 }
  0xd1   : > { %v1655_v50 = vpop.eup %1654 }
  0xd2   : > { %1662 = vtanh.f32 %v518_v46  ;;  %v1657_v51 = vpop.eup %1656  ;;  %v530_v52 = vmul.f32 0.5, %v1655_v50 }
  0xd3   : > { %v532_v54 = vmul.f32 0.5, %v1657_v51  ;;  %v1659_v56 = vpop.eup %1658  ;;  %1664 = vtanh.f32 %v520_v53 }
  0xd4   : > { %v538_v55 = vadd.f32 0.5, %v530_v52  ;;  %v1661_v58 = vpop.eup %1660  ;;  %v533_v61 = vmul.f32 0.5, %v1659_v56 }
  0xd5   : > { %v2072_v57 = vadd.f32 0.5, %v532_v54  ;;  %v535_v62 = vmul.f32 0.5, %v1661_v58 }
  0xd6   : > { %563 = vrot.lane.b32.xlu2 %v538_v55, %s1782_s12  ;;  %v541_v0 = vadd.f32 0.5, %v533_v61  ;;  %v427_v61 = vld [vmem:[%s2734_s3 + $0x20] sm:$0xff] }
  0xd7   : > { %567 = vrot.lane.b32.xlu1 %v2072_v57, %s1782_s12  ;;  %v543_v2 = vadd.f32 0.5, %v535_v62  ;;  %v548_v54 = vmul.f32 %v2072_v57, %v1970_v23  ;;  %v428_v23 = vld [vmem:[%s2734_s3 + $0x28] sm:$0xff] }
  0xd8   : > { %v1663_v59 = vpop.eup %1662  ;;  %v549_v40 = vmul.f32 %v541_v0, %v1968_v22 }
  0xd9   : > { %v534_v60 = vmul.f32 0.5, %v1663_v59  ;;  %v1665_v1 = vpop.eup %1664  ;;  %v551_v21 = vmul.f32 %v543_v2, %v2001_v49  ;;  %v425_v49 = vld [vmem:[%s2734_s3 + $0x10] sm:$0xff] }
  0xda   : > { %v536_v3 = vmul.f32 0.5, %v1665_v1 }
  0xdb   : > { %v542_v63 = vadd.f32 0.5, %v534_v60 }
  0xdc   : > { %v544_v4 = vadd.f32 0.5, %v536_v3 }
  0xdd   : > { %571 = vrot.lane.b32.xlu0 %v542_v63, %s1782_s12  ;;  %v550_v19 = vmul.f32 %v542_v63, %v1974_v25 }
  0xde   : > { %569 = vrot.lane.b32.xlu2 %v541_v0, %s1782_s12  ;;  %v552_v51 = vmul.f32 %v544_v4, %v2035_v10  ;;  %v423_v10 = vld [vmem:[%s2734_s3] sm:$0xff] }
  0xdf   : > { %573 = vrot.lane.b32.xlu1 %v543_v2, %s1782_s12 }
  0xe6   : > { %575 = vrot.lane.b32.xlu2 %v544_v4, %s1782_s12  ;;  %s1786_s12 = smov 16  }
 0x130   : > { %v564_v5 = vpop.permute.xlu2 %563 }
 0x131   : > { %v586_v6 = vmul.f32 %v564_v5, %v538_v55  ;;  %v426_v5 = vld [vmem:[%s2734_s3 + $0x18] sm:$0xff] }
 0x133   : > { %603 = vrot.lane.b32.xlu1 %v586_v6, %s1780_s11 }
 0x138   : > { %v570_v8 = vpop.permute.xlu2 %569 }
 0x139   : > { %v589_v11 = vmul.f32 %v570_v8, %v541_v0 }
 0x13b   : > { %609 = vrot.lane.b32.xlu1 %v589_v11, %s1780_s11 }
 0x140   : > { %v562_v14 = vpop.permute.xlu1 %561  ;;  %v576_v18 = vpop.permute.xlu2 %575 }
 0x141   : > { %v566_v15 = vpop.permute.xlu0 %565  ;;  %v585_v17 = vmul.f32 %v562_v14, %v2055_v35  ;;  %v592_v27 = vmul.f32 %v576_v18, %v544_v4  ;;  %v424_v4 = vld [vmem:[%s2734_s3 + $0x8] sm:$0xff] }
 0x142   : > { %v587_v26 = vmul.f32 %v566_v15, %v539_v41  ;;  %v546_v41 = vmul.f32 %v538_v55, %v1972_v24  ;;  %v430_v15 = vld [vmem:[%s2734_s3 + $0x38] sm:$0xff] }
 0x143   : > { %601 = vrot.lane.b32.xlu0 %v585_v17, %s1780_s11  ;;  %615 = vrot.lane.b32.xlu1 %v592_v27, %s1780_s11 }
 0x144   : > { %605 = vrot.lane.b32.xlu2 %v587_v26, %s1780_s11 }
 0x149   : > { %v568_v28 = vpop.permute.xlu1 %567 }
 0x14a   : > { %v588_v29 = vmul.f32 %v568_v28, %v2072_v57 }
 0x14c   : > { %607 = vrot.lane.b32.xlu0 %v588_v29, %s1780_s11 }
 0x14f   : > { %v572_v30 = vpop.permute.xlu0 %571 }
 0x150   : > { %v590_v12 = vmul.f32 %v572_v30, %v542_v63  ;;  %v429_v63 = vld [vmem:[%s2734_s3 + $0x30] sm:$0xff] }
 0x151   : > { %v574_v31 = vpop.permute.xlu1 %573 }
 0x152   : > { %611 = vrot.lane.b32.xlu2 %v590_v12, %s1780_s11  ;;  %v591_v32 = vmul.f32 %v574_v31, %v543_v2 }
 0x154   : > { %613 = vrot.lane.b32.xlu0 %v591_v32, %s1780_s11 }
 0x19e   : > { %v606_v34 = vpop.permute.xlu2 %605 }
 0x19f   : > { %v2092_v36 = vadd.f32 %v606_v34, %v547_v33 }
 0x1a1   : > { %645 = vrot.lane.b32.xlu1 %v2092_v36, %s1783_s7 }
 0x1a5   : > { %v604_v37 = vpop.permute.xlu1 %603 }
 0x1a6   : > { %v2111_v50 = vadd.f32 %v604_v37, %v546_v41 }
 0x1ac   : > { %v612_v38 = vpop.permute.xlu2 %611 }
 0x1ad   : > { %v2097_v39 = vadd.f32 %v612_v38, %v550_v19  ;;  %v610_v42 = vpop.permute.xlu1 %609 }
 0x1ae   : > { %v2100_v46 = vadd.f32 %v610_v42, %v549_v40 }
 0x1af   : > { %651 = vrot.lane.b32.xlu1 %v2097_v39, %s1783_s7 }
 0x1b0   : > { %649 = vrot.lane.b32.xlu0 %v2100_v46, %s1783_s7 }
 0x1b5   : > { %v602_v25 = vpop.permute.xlu0 %601  ;;  %v616_v22 = vpop.permute.xlu1 %615 }
 0x1b6   : > { %v2109_v47 = vadd.f32 %v602_v25, %v545_v20  ;;  %v2118_v52 = vadd.f32 %v616_v22, %v552_v51 }
 0x1b8   : > { %641 = vrot.lane.b32.xlu2 %v2109_v47, %s1783_s7  ;;  %643 = vrot.lane.b32.xlu0 %v2111_v50, %s1783_s7 }
 0x1be   : > { %v608_v53 = vpop.permute.xlu0 %607 }
 0x1bf   : > { %v2129_v55 = vadd.f32 %v608_v53, %v548_v54  ;;  %v713_v53 = vmul.f32 0.5, %v2109_v47 }
 0x1c0   : > { %655 = vrot.lane.b32.xlu0 %v2118_v52, %s1783_s7 }
 0x1c6   : > { %v614_v24 = vpop.permute.xlu0 %613 }
 0x1c7   : > { %v2123_v35 = vadd.f32 %v614_v24, %v551_v21  ;;  %v714_v21 = vmul.f32 0.5, %v2111_v50  ;;  %v720_v50 = vmul.f32 0.5, %v2118_v52 }
 0x1c9   : > { %653 = vrot.lane.b32.xlu2 %v2123_v35, %s1783_s7 }
 0x1d1   : > { %647 = vrot.lane.b32.xlu2 %v2129_v55, %s1783_s7 }
 0x212   : > { %v642_v56 = vpop.permute.xlu2 %641 }
 0x213   : > { %v646_v58 = vpop.permute.xlu1 %645  ;;  %v665_v59 = vmul.f32 %v642_v56, %v423_v10  ;;  %825 = vst.msk [vmem:[#allocation3] sm:$0xff] %vm487_vm5, %v642_v56 }
 0x214   : > { %v667_v60 = vmul.f32 %v646_v58, %v425_v49  ;;  %827 = vst.msk [vmem:[#allocation3 + $0x10] sm:$0xff] %vm487_vm5, %v646_v58 }
 0x215   : > { %681 = vrot.lane.b32.xlu1 %v665_v59, %s1784_s26 }
 0x216   : > { %685 = vrot.lane.b32.xlu0 %v667_v60, %s1784_s26 }
 0x221   : > { %v652_v57 = vpop.permute.xlu1 %651 }
 0x222   : > { %v670_v62 = vmul.f32 %v652_v57, %v428_v23  ;;  %830 = vst.msk [vmem:[#allocation3 + $0x28] sm:$0xff] %vm487_vm5, %v652_v57  ;;  %v650_v0 = vpop.permute.xlu0 %649 }
 0x223   : > { %v669_v1 = vmul.f32 %v650_v0, %v427_v61  ;;  %829 = vst.msk [vmem:[#allocation3 + $0x20] sm:$0xff] %vm487_vm5, %v650_v0  ;;  %v654_v2 = vpop.permute.xlu2 %653 }
 0x224   : > { %691 = vrot.lane.b32.xlu0 %v670_v62, %s1784_s26  ;;  %v671_v3 = vmul.f32 %v654_v2, %v429_v63  ;;  %831 = vst.msk [vmem:[#allocation3 + $0x30] sm:$0xff] %vm487_vm5, %v654_v2  ;;  %v719_v2 = vmul.f32 0.5, %v2123_v35 }
 0x225   : > { %689 = vrot.lane.b32.xlu2 %v669_v1, %s1784_s26 }
 0x226   : > { %693 = vrot.lane.b32.xlu1 %v671_v3, %s1784_s26 }
 0x22a   : > { %v644_v6 = vpop.permute.xlu0 %643 }
 0x22b   : > { %v648_v8 = vpop.permute.xlu2 %647  ;;  %v666_v11 = vmul.f32 %v644_v6, %v424_v4  ;;  %826 = vst.msk [vmem:[#allocation3 + $0x8] sm:$0xff] %vm487_vm5, %v644_v6  ;;  %v716_v6 = vmul.f32 0.5, %v2129_v55 }
 0x22c   : > { %v668_v14 = vmul.f32 %v648_v8, %v426_v5  ;;  %828 = vst.msk [vmem:[#allocation3 + $0x18] sm:$0xff] %vm487_vm5, %v648_v8 }
 0x22d   : > { %683 = vrot.lane.b32.xlu2 %v666_v11, %s1784_s26 }
 0x22e   : > { %687 = vrot.lane.b32.xlu1 %v668_v14, %s1784_s26 }
 0x232   : > { %v656_v17 = vpop.permute.xlu0 %655 }
 0x233   : > { %v672_v18 = vmul.f32 %v656_v17, %v430_v15  ;;  %832 = vst.msk [vmem:[#allocation3 + $0x38] sm:$0xff] %vm487_vm5, %v656_v17 }
 0x235   : > { %695 = vrot.lane.b32.xlu2 %v672_v18, %s1784_s26 }
 0x27f   : > { %v690_v26 = vpop.permute.xlu2 %689 }
 0x280   : > { %v709_v27 = vadd.f32 %v690_v26, %v2040_v13 }
 0x282   : > { %737 = vrot.lane.b32.xlu1 %v709_v27, %s1785_s29 }
 0x287   : > { %v682_v28 = vpop.permute.xlu1 %681  ;;  %v684_v30 = vpop.permute.xlu2 %683 }
 0x288   : > { %v705_v29 = vadd.f32 %v682_v28, %v1992_v44  ;;  %v686_v12 = vpop.permute.xlu0 %685  ;;  %v706_v31 = vadd.f32 %v684_v30, %v2031_v9 }
 0x289   : > { %v707_v32 = vadd.f32 %v686_v12, %v1994_v45  ;;  %v715_v45 = vmul.f32 0.5, %v2092_v36 }
 0x28a   : > { %729 = vrot.lane.b32.xlu0 %v705_v29, %s1785_s29  ;;  %731 = vrot.lane.b32.xlu1 %v706_v31, %s1785_s29 }
 0x28b   : > { %733 = vrot.lane.b32.xlu2 %v707_v32, %s1785_s29 }
 0x28f   : > { %v696_v33 = vpop.permute.xlu2 %695 }
 0x290   : > { %v712_v34 = vadd.f32 %v696_v33, %v2069_v48 }
 0x292   : > { %743 = vrot.lane.b32.xlu1 %v712_v34, %s1785_s29 }
 0x296   : > { %v692_v37 = vpop.permute.xlu0 %691 }
 0x297   : > { %v710_v13 = vadd.f32 %v692_v37, %v2063_v43  ;;  %v718_v43 = vmul.f32 0.5, %v2097_v39 }
 0x298   : > { %v694_v19 = vpop.permute.xlu1 %693 }
 0x299   : > { %739 = vrot.lane.b32.xlu2 %v710_v13, %s1785_s29  ;;  %v711_v44 = vadd.f32 %v694_v19, %v2042_v16  ;;  %v717_v16 = vmul.f32 0.5, %v2100_v46  ;;  %v909_v13 = vld [vmem:[#allocation2 + $0x4] sm:$0xf] }
 0x29b   : > { %741 = vrot.lane.b32.xlu0 %v711_v44, %s1785_s29 }
 0x2a0   : > { %v688_v38 = vpop.permute.xlu1 %687 }
 0x2a1   : > { %v708_v9 = vadd.f32 %v688_v38, %v2033_v7 }
 0x2a3   : > { %735 = vrot.lane.b32.xlu0 %v708_v9, %s1785_s29  ;;  %v915_v9 = vld [vmem:[#allocation2 + $0xc] sm:$0xf] }
 0x2e5   : > { %v734_v40 = vpop.permute.xlu2 %733 }
 0x2e6   : > { %v755_v42 = vsel %vm487_vm5, %v734_v40, %v715_v45 }
 0x2e7   : > { %1666 = vtanh.f32 %v755_v42 }
 0x2ed   : > { %v1667_v48 = vpop.eup %1666 }
 0x2ee   : > { %v771_v20 = vmul.f32 0.5, %v1667_v48 }
 0x2f0   : > { %v779_v41 = vadd.f32 0.5, %v771_v20 }
 0x2f2   : > { %797 = vrot.lane.b32.xlu1 %v779_v41, %s1783_s7 }
 0x2f3   : > { %v740_v25 = vpop.permute.xlu2 %739 }
 0x2f4   : > { %v758_v22 = vsel %vm487_vm5, %v740_v25, %v718_v43  ;;  %v738_v7 = vpop.permute.xlu1 %737 }
 0x2f5   : > { %1668 = vtanh.f32 %v758_v22  ;;  %v757_v36 = vsel %vm487_vm5, %v738_v7, %v717_v16 }
 0x2f6   : > { %1670 = vtanh.f32 %v757_v36 }
 0x2fb   : > { %v1669_v51 = vpop.eup %1668 }
 0x2fc   : > { %v774_v24 = vmul.f32 0.5, %v1669_v51  ;;  %v730_v54 = vpop.permute.xlu0 %729  ;;  %v1671_v39 = vpop.eup %1670 }
 0x2fd   : > { %v732_v10 = vpop.permute.xlu1 %731  ;;  %v753_v49 = vsel %vm487_vm5, %v730_v54, %v713_v53  ;;  %v773_v56 = vmul.f32 0.5, %v1671_v39 }
 0x2fe   : > { %v754_v46 = vsel %vm487_vm5, %v732_v10, %v714_v21  ;;  %1672 = vtanh.f32 %v753_v49  ;;  %v2192_v58 = vadd.f32 0.5, %v774_v24 }
 0x2ff   : > { %1674 = vtanh.f32 %v754_v46  ;;  %v2196_v59 = vadd.f32 0.5, %v773_v56 }
 0x300   : > { %803 = vrot.lane.b32.xlu1 %v2192_v58, %s1783_s7 }
 0x301   : > { %801 = vrot.lane.b32.xlu0 %v2196_v59, %s1783_s7 }
 0x304   : > { %v1673_v47 = vpop.eup %1672 }
 0x305   : > { %v1675_v60 = vpop.eup %1674  ;;  %v769_v23 = vmul.f32 0.5, %v1673_v47  ;;  %v744_v57 = vpop.permute.xlu1 %743 }
 0x306   : > { %v770_v61 = vmul.f32 0.5, %v1675_v60  ;;  %v760_v62 = vsel %vm487_vm5, %v744_v57, %v720_v50  ;;  %v921_v57 = vld [vmem:[#allocation2 + $0x14] sm:$0xf] }
 0x307   : > { %1676 = vtanh.f32 %v760_v62  ;;  %v777_v63 = vadd.f32 0.5, %v769_v23 }
 0x308   : > { %v2202_v0 = vadd.f32 0.5, %v770_v61 }
 0x309   : > { %793 = vrot.lane.b32.xlu2 %v777_v63, %s1783_s7 }
 0x30a   : > { %795 = vrot.lane.b32.xlu0 %v2202_v0, %s1783_s7 }
 0x30d   : > { %v1677_v1 = vpop.eup %1676  ;;  %v742_v52 = vpop.permute.xlu0 %741 }
 0x30e   : > { %v776_v3 = vmul.f32 0.5, %v1677_v1  ;;  %v759_v4 = vsel %vm487_vm5, %v742_v52, %v719_v2  ;;  %v924_v52 = vld [vmem:[#allocation2 + $0x18] sm:$0xf] }
 0x30f   : > { %1678 = vtanh.f32 %v759_v4 }
 0x310   : > { %v2209_v5 = vadd.f32 0.5, %v776_v3 }
 0x312   : > { %807 = vrot.lane.b32.xlu0 %v2209_v5, %s1783_s7 }
 0x315   : > { %v1679_v8 = vpop.eup %1678  ;;  %v736_v11 = vpop.permute.xlu0 %735 }
 0x316   : > { %v775_v14 = vmul.f32 0.5, %v1679_v8  ;;  %v756_v15 = vsel %vm487_vm5, %v736_v11, %v716_v6 }
 0x317   : > { %1680 = vtanh.f32 %v756_v15 }
 0x318   : > { %v783_v35 = vadd.f32 0.5, %v775_v14  ;;  %v927_v14 = vld [vmem:[#allocation2 + $0x1c] sm:$0xf] }
 0x31a   : > { %805 = vrot.lane.b32.xlu2 %v783_v35, %s1783_s7 }
 0x31d   : > { %v1681_v17 = vpop.eup %1680 }
 0x31e   : > { %v772_v18 = vmul.f32 0.5, %v1681_v17 }
 0x320   : > { %v2216_v26 = vadd.f32 0.5, %v772_v18 }
 0x322   : > { %799 = vrot.lane.b32.xlu2 %v2216_v26, %s1783_s7  ;;  %s1787_s7 = smov 24  }
 0x363   : > { %v794_v27 = vpop.permute.xlu2 %793 }
 0x364   : > { %v798_v55 = vpop.permute.xlu1 %797  ;;  %v817_v28 = vmul.f32 %v794_v27, %v777_v63 }
 0x365   : > { %v819_v29 = vmul.f32 %v798_v55, %v779_v41 }
 0x366   : > { %833 = vst.msk [vmem:[%s1905_s28] sm:$0xff] %vm487_vm5, %v817_v28  ;;  %v2222_v30 = vpack.c.bf16 %v817_v28, %v817_v28  ;;  %v1327_v21 = vmul.f32 %v817_v28, %v817_v28  ;;  %v1302_v46 = vsel %vm487_vm5, %v817_v28, 0.0 }
 0x367   : > { %835 = vst.msk [vmem:[%s1905_s28 + $0x10] sm:$0xff] %vm487_vm5, %v819_v29  ;;  %v2226_v12 = vpack.c.bf16 %v819_v29, %v819_v29  ;;  %v1329_v53 = vmul.f32 %v819_v29, %v819_v29  ;;  %v1305_v47 = vsel %vm487_vm5, %v819_v29, 0.0 }
 0x368   : > { %937 = vrot.lane.b32.xlu1 %v2222_v30, %s1780_s11  ;;  %1097 = vrot.lane.b32.xlu2 %v2222_v30, %s1786_s12  ;;  %v850_v31 = vshrl.u32 %v2222_v30, 16  ;;  %v853_v34 = vshll.u32 %v2222_v30, 16  ;;  %v1335_v63 = vsel %vm487_vm5, %v1327_v21, 0.0 }
 0x369   : > { %941 = vrot.lane.b32.xlu0 %v2226_v12, %s1780_s11  ;;  %v864_v32 = vshrl.u32 %v2226_v12, 16  ;;  %v867_v44 = vshll.u32 %v2226_v12, 16  ;;  %v1338_v62 = vsel %vm487_vm5, %v1329_v53, 0.0 }
 0x36a   : > { %v852_v33 = vrot.slane %v850_v31, 7 }
 0x36b   : > { %v866_v19 = vrot.slane %v864_v32, 7  ;;  %v2286_v24 = vrot.slane %v864_v32, 4  ;;  %v2291_v39 = vrot.slane %v867_v44, 5 }
 0x36c   : > { %v855_v38 = vor.u32 %v853_v34, %v852_v33 }
 0x36d   : > { %v2247_v45 = vor.u32 %v867_v44, %v866_v19  ;;  %v976_v8 = vor.u32 %v2291_v39, %v2286_v24 }
 0x36e   : > { %v910_v40 = vsel %vm2240_vm9, %v855_v38, %v909_v13 }
 0x36f   : > { %911 = vst [vmem:[#allocation2 + $0x4] sm:$0xf] %v910_v40  ;;  %v916_v42 = vsel %vm2240_vm9, %v2247_v45, %v915_v9 }
 0x370   : > { %1101 = vrot.lane.b32.xlu1 %v2226_v12, %s1786_s12  ;;  %917 = vst [vmem:[#allocation2 + $0xc] sm:$0xf] %v916_v42 }
 0x371   : > { %1046 = vrot.lane.b32.xlu0 %v855_v38, %s1784_s26 }
 0x372   : > { %v804_v48 = vpop.permute.xlu1 %803 }
 0x373   : > { %v2258_v20 = vmul.f32 %v804_v48, %v2192_v58  ;;  %v802_v41 = vpop.permute.xlu0 %801 }
 0x374   : > { %v806_v25 = vpop.permute.xlu2 %805  ;;  %v821_v16 = vmul.f32 %v802_v41, %v2196_v59 }
 0x375   : > { %838 = vst.msk [vmem:[%s1905_s28 + $0x28] sm:$0xff] %vm487_vm5, %v2258_v20  ;;  %v2265_v43 = vpack.c.bf16 %v2258_v20, %v2258_v20  ;;  %v2268_v22 = vmul.f32 %v806_v25, %v783_v35  ;;  %v1332_v4 = vmul.f32 %v2258_v20, %v2258_v20 }
 0x376   : > { %837 = vst.msk [vmem:[%s1905_s28 + $0x20] sm:$0xff] %vm487_vm5, %v821_v16  ;;  %v2272_v7 = vpack.c.bf16 %v821_v16, %v821_v16  ;;  %v1309_v28 = vsel %vm487_vm5, %v821_v16, 0.0  ;;  %v1331_v13 = vmul.f32 %v821_v16, %v821_v16 }
 0x377   : > { %839 = vst.msk [vmem:[%s1905_s28 + $0x30] sm:$0xff] %vm487_vm5, %v2268_v22  ;;  %v2279_v36 = vpack.c.bf16 %v2268_v22, %v2268_v22  ;;  %v885_v51 = vshrl.u32 %v2265_v43, 16  ;;  %v888_v56 = vshll.u32 %v2265_v43, 16 }
 0x378   : > { %945 = vrot.lane.b32.xlu2 %v2272_v7, %s1780_s11  ;;  %v878_v54 = vshrl.u32 %v2272_v7, 16  ;;  %v881_v59 = vshll.u32 %v2272_v7, 16 }
 0x379   : > { %1105 = vrot.lane.b32.xlu0 %v2272_v7, %s1786_s12  ;;  %949 = vrot.lane.b32.xlu1 %v2279_v36, %s1780_s11  ;;  %v892_v10 = vshrl.u32 %v2279_v36, 16  ;;  %v887_v49 = vrot.slane %v885_v51, 7  ;;  %v895_v23 = vshll.u32 %v2279_v36, 16  ;;  %v2348_v38 = vrot.slane %v885_v51, 4 }
 0x37a   : > { %v880_v58 = vrot.slane %v878_v54, 7  ;;  %v2356_v21 = vrot.slane %v888_v56, 5 }
 0x37b   : > { %v894_v60 = vrot.slane %v892_v10, 7  ;;  %v2303_v61 = vor.u32 %v888_v56, %v887_v49  ;;  %v918_v56 = vld [vmem:[#allocation2 + $0x10] sm:$0xf] }
 0x37c   : > { %v796_v50 = vpop.permute.xlu0 %795  ;;  %v800_v1 = vpop.permute.xlu2 %799  ;;  %v2310_v3 = vor.u32 %v881_v59, %v880_v58 }
 0x37d   : > { %v818_v2 = vmul.f32 %v796_v50, %v2202_v0  ;;  %v820_v6 = vmul.f32 %v800_v1, %v2216_v26  ;;  %v2319_v11 = vor.u32 %v895_v23, %v894_v60  ;;  %v925_v55 = vsel %vm2240_vm9, %v2303_v61, %v924_v52 }
 0x37e   : > { %v922_v17 = vsel %vm2240_vm9, %v2310_v3, %v921_v57  ;;  %926 = vst [vmem:[#allocation2 + $0x18] sm:$0xf] %v925_v55  ;;  %v2370_v50 = vrot.slane %v976_v8, 4  ;;  %v1342_v60 = vsel %vm487_vm5, %v1331_v13, 0.0  ;;  %v966_v55 = vrot.slane %v850_v31, 4 }
 0x37f   : > { %834 = vst.msk [vmem:[%s1905_s28 + $0x8] sm:$0xff] %vm487_vm5, %v818_v2  ;;  %v2323_v0 = vpack.c.bf16 %v818_v2, %v818_v2  ;;  %v1303_v15 = vsel %vm487_vm5, %v818_v2, 0.0  ;;  %v1328_v35 = vmul.f32 %v818_v2, %v818_v2  ;;  %v2331_v18 = vpack.c.bf16 %v820_v6, %v820_v6 }
 0x380   : > { %836 = vst.msk [vmem:[%s1905_s28 + $0x18] sm:$0xff] %vm487_vm5, %v820_v6  ;;  %v1330_v26 = vmul.f32 %v820_v6, %v820_v6  ;;  %v1304_v27 = vadd.f32 %v1303_v15, %v1302_v46  ;;  %1050 = vrot.lane.b32.xlu2 %v2247_v45, %s1784_s26  ;;  %v928_v32 = vsel %vm2240_vm9, %v2319_v11, %v927_v14  ;;  %v1307_v9 = vsel %vm487_vm5, %v820_v6, 0.0 }
 0x381   : > { %v1336_v29 = vsel %vm487_vm5, %v1328_v35, 0.0  ;;  %1099 = vrot.lane.b32.xlu0 %v2323_v0, %s1786_s12  ;;  %923 = vst [vmem:[#allocation2 + $0x14] sm:$0xf] %v922_v17  ;;  %v857_v33 = vshrl.u32 %v2323_v0, 16  ;;  %1186 = vrot.lane.b32.xlu1 %v2247_v45, %s1787_s7  ;;  %v860_v42 = vshll.u32 %v2323_v0, 16  ;;  %v871_v48 = vshrl.u32 %v2331_v18, 16 }
 0x382   : > { %v1306_v19 = vadd.f32 %v1305_v47, %v1304_v27  ;;  %v1337_v44 = vadd.f32 %v1336_v29, %v1335_v63  ;;  %929 = vst [vmem:[#allocation2 + $0x1c] sm:$0xf] %v928_v32  ;;  %v1340_v41 = vsel %vm487_vm5, %v1330_v26, 0.0  ;;  %v912_v45 = vld [vmem:[#allocation2 + $0x8] sm:$0xf]  ;;  %v874_v49 = vshll.u32 %v2331_v18, 16 }
 0x383   : > { %v859_v40 = vrot.slane %v857_v33, 7  ;;  %v873_v39 = vrot.slane %v871_v48, 7  ;;  %v1311_v46 = vsel %vm487_vm5, %v2258_v20, 0.0  ;;  %v1313_v2 = vsel %vm487_vm5, %v2268_v22, 0.0 }
 0x384   : > { %v1308_v25 = vadd.f32 %v1307_v9, %v1306_v19  ;;  %v1339_v16 = vadd.f32 %v1338_v62, %v1337_v44  ;;  %v808_v53 = vpop.permute.xlu0 %807  ;;  %v1344_v62 = vsel %vm487_vm5, %v1332_v4, 0.0  ;;  %v988_v6 = vor.u32 %v2356_v21, %v2348_v38 }
 0x385   : > { %v2359_v51 = vmul.f32 %v808_v53, %v2209_v5  ;;  %v2363_v24 = vor.u32 %v860_v42, %v859_v40  ;;  %v1333_v5 = vmul.f32 %v2268_v22, %v2268_v22  ;;  %v2383_v20 = vor.u32 %v874_v49, %v873_v39  ;;  %v1326_v53 = vld [vmem:[%s1907_s24 + $0x1] sm:$0x1] }
 0x386   : > { %v1341_v58 = vadd.f32 %v1340_v41, %v1339_v16  ;;  %v1310_v47 = vadd.f32 %v1309_v28, %v1308_v25  ;;  %v967_v28 = vrot.slane %v853_v34, 5  ;;  %v1301_v41 = vld [vmem:[%s1907_s24] sm:$0x1] }
 0x387   : > { %840 = vst.msk [vmem:[%s1905_s28 + $0x38] sm:$0xff] %vm487_vm5, %v2359_v51  ;;  %v913_v57 = vsel %vm2240_vm9, %v2363_v24, %v912_v45  ;;  %v1334_v52 = vmul.f32 %v2359_v51, %v2359_v51  ;;  %s1788_s28 = smov 20   ;;  %v919_v4 = vsel %vm2240_vm9, %v2383_v20, %v918_v56  ;;  %v1346_v22 = vsel %vm487_vm5, %v1333_v5, 0.0 }
 0x388   : > { %v1312_v63 = vadd.f32 %v1311_v46, %v1310_v47  ;;  %v1343_v1 = vadd.f32 %v1342_v60, %v1341_v58  ;;  %914 = vst [vmem:[#allocation2 + $0x8] sm:$0xf] %v913_v57  ;;  %1109 = vrot.lane.b32.xlu2 %v2279_v36, %s1786_s12  ;;  %v1315_v15 = vsel %vm487_vm5, %v2359_v51, 0.0  ;;  %v968_v44 = vor.u32 %v967_v28, %v966_v55 }
 0x389   : > { %1138 = vrot.lane.b32.xlu0 %v2370_v50, %s1788_s28  ;;  %943 = vrot.lane.b32.xlu1 %v2331_v18, %s1780_s11  ;;  %920 = vst [vmem:[#allocation2 + $0x10] sm:$0xf] %v919_v4  ;;  %v1348_v26 = vsel %vm487_vm5, %v1334_v52, 0.0  ;;  %v982_v58 = vrot.slane %v878_v54, 4  ;;  %v983_v47 = vrot.slane %v881_v59, 5  ;;  %v990_v60 = vrot.slane %v892_v10, 4 }
 0x38a   : > { %v1314_v8 = vadd.f32 %v1313_v2, %v1312_v63  ;;  %v1345_v14 = vadd.f32 %v1344_v62, %v1343_v1  ;;  %v969_v40 = vrot.slane %v968_v44, 4  ;;  %v991_v54 = vrot.slane %v895_v23, 5 }
 0x38b   : > { %v984_v56 = vor.u32 %v983_v47, %v982_v58  ;;  %v2455_v10 = vpack.c.bf16 %v2359_v51, %v2359_v51  ;;  %v978_v23 = vrot.slane %v871_v48, 4  ;;  %v970_v51 = vrot.slane %v857_v33, 4 }
 0x38c   : > { %v1347_v35 = vadd.f32 %v1346_v22, %v1345_v14  ;;  %v1316_v17 = vadd.f32 %v1315_v15, %v1314_v8  ;;  %v992_v59 = vor.u32 %v991_v54, %v990_v60  ;;  %v971_v62 = vrot.slane %v860_v42, 5 }
 0x38d   : > { %v2433_v5 = vrot.slane %v984_v56, 4  ;;  %v1043_v1 = vshll.u32 %v2455_v10, 16  ;;  %v989_v52 = vrot.slane %v988_v6, 4 }
 0x38e   : > { %v1317_v37 = vrot.slane %v1316_v17, 4  ;;  %v1349_v27 = vadd.f32 %v1348_v26, %v1347_v35  ;;  %v972_v63 = vor.u32 %v971_v62, %v970_v51 }
 0x390   : > { %v1318_v29 = vadd.f32 %v1317_v37, %v1316_v17  ;;  %v1350_v32 = vrot.slane %v1349_v27, 4  ;;  %939 = vrot.lane.b32.xlu2 %v2323_v0, %s1780_s11  ;;  %v973_v42 = vrot.slane %v972_v63, 4  ;;  %v1131_v37 = vrot.slane %v1043_v1, 5 }
 0x391   : > { %1058 = vrot.lane.b32.xlu0 %v2319_v11, %s1784_s26  ;;  %998 = vrot.lane.b32.xlu1 %v2370_v50, %s1781_s16 }
 0x392   : > { %v1319_v13 = vrot.slane %v1318_v29, 2  ;;  %v1351_v19 = vadd.f32 %v1350_v32, %v1349_v27 }
 0x394   : > { %v1320_v31 = vadd.f32 %v1319_v13, %v1318_v29  ;;  %v1352_v9 = vrot.slane %v1351_v19, 2 }
 0x396   : > { %v1321_v30 = vrot.slane %v1320_v31, 1  ;;  %v1353_v34 = vadd.f32 %v1352_v9, %v1351_v19 }
 0x398   : > { %v1322_v25 = vadd.f32 %v1321_v30, %v1320_v31  ;;  %v1354_v16 = vrot.slane %v1353_v34, 1  ;;  %994 = vrot.lane.b32.xlu2 %v969_v40, %s1781_s16 }
 0x399   : > { %1190 = vrot.lane.b32.xlu0 %v2310_v3, %s1787_s7  ;;  %1134 = vrot.lane.b32.xlu1 %v969_v40, %s1788_s28 }
 0x39a   : > { %v1323_v45 = vadd.f32 %v1322_v25, %v1301_v41  ;;  %v1355_v39 = vadd.f32 %v1354_v16, %v1353_v34 }
 0x39c   : > { %1325 = vst.msk [vmem:[%s1907_s24] sm:$0x1] %vm1324_vm10, %v1323_v45  ;;  %v1356_v46 = vadd.f32 %v1355_v39, %v1326_v53 }
 0x39e   : > { %1357 = vst.msk [vmem:[%s1907_s24 + $0x1] sm:$0x1] %vm1324_vm10, %v1356_v46 }
 0x3a0   : > { %1103 = vrot.lane.b32.xlu2 %v2331_v18, %s1786_s12 }
 0x3a1   : > { %947 = vrot.lane.b32.xlu0 %v2265_v43, %s1780_s11  ;;  %1054 = vrot.lane.b32.xlu1 %v2310_v3, %s1784_s26  ;;  %v2445_v3 = vrot.slane %v992_v59, 4  ;;  %s1789_s11 = smov 28  }
 0x3a8   : > { %1194 = vrot.lane.b32.xlu2 %v2319_v11, %s1787_s7  ;;  %v979_v11 = vrot.slane %v874_v49, 5  ;;  %v1040_v49 = vshrl.u32 %v2455_v10, 16 }
 0x3a9   : > { %1002 = vrot.lane.b32.xlu0 %v2433_v5, %s1781_s16  ;;  %1048 = vrot.lane.b32.xlu1 %v2363_v24, %s1784_s26 }
 0x3aa   : > { %v980_v57 = vor.u32 %v979_v11, %v978_v23  ;;  %v1042_v33 = vrot.slane %v1040_v49, 7 }
 0x3ac   : > { %v2471_v48 = vrot.slane %v980_v57, 4  ;;  %v1045_v2 = vor.u32 %v1043_v1, %v1042_v33 }
 0x3b0   : > { %1006 = vrot.lane.b32.xlu2 %v2445_v3, %s1781_s16 }
 0x3b1   : > { %1052 = vrot.lane.b32.xlu0 %v2383_v20, %s1784_s26  ;;  %1107 = vrot.lane.b32.xlu1 %v2265_v43, %s1786_s12 }
 0x3b8   : > { %1142 = vrot.lane.b32.xlu2 %v2433_v5, %s1788_s28 }
 0x3b9   : > { %1111 = vrot.lane.b32.xlu0 %v2455_v10, %s1786_s12  ;;  %1146 = vrot.lane.b32.xlu1 %v2445_v3, %s1788_s28  ;;  %s1702_s12 = scalar_lea.hbm %s2736_s5, 4 }
 0x3c0   : > { %1188 = vrot.lane.b32.xlu2 %v2383_v20, %s1787_s7 }
 0x3c1   : > { %1184 = vrot.lane.b32.xlu0 %v2363_v24, %s1787_s7  ;;  %1140 = vrot.lane.b32.xlu1 %v2471_v48, %s1788_s28 }
 0x3c2   : > { %v1098_v20 = vpop.permute.xlu2 %1097 }
 0x3c8   : > { %1000 = vrot.lane.b32.xlu2 %v2471_v48, %s1781_s16 }
 0x3c9   : > { %996 = vrot.lane.b32.xlu0 %v973_v42, %s1781_s16  ;;  %1060 = vrot.lane.b32.xlu1 %v1045_v2, %s1784_s26 }
 0x3d0   : > { %1136 = vrot.lane.b32.xlu2 %v973_v42, %s1788_s28 }
 0x3d1   : > { %1196 = vrot.lane.b32.xlu0 %v1045_v2, %s1787_s7  ;;  %1192 = vrot.lane.b32.xlu1 %v2303_v61, %s1787_s7 }
 0x3d2   : > { %v946_v24 = vpop.permute.xlu2 %945 }
 0x3d3   : > { %963 = vst.msk [vmem:[#allocation2 + $0x14] sm:$0xf] %vm958_vm11, %v946_v24 }
 0x3d8   : > { %1056 = vrot.lane.b32.xlu2 %v2303_v61, %s1784_s26  ;;  %s1548_s26 = sshll.u32 %s1764_s22, 1  ;;  %s1368_s22 = scalar_lea.sflag [#allocation5], %s251_s10 }
 0x3d9   : > { %1232 = vrot.lane.b32.xlu0 %v2331_v18, %s1789_s11  ;;  %1004 = vrot.lane.b32.xlu1 %v989_v52, %s1781_s16  ;;  %v1072_v18 = vld [vmem:[#allocation2] sm:$0xf]  ;;  %s1790_s16 = smov 32   ;;  %s1381_s15 = scalar_lea.hbm %s2736_s5, %s1548_s26 }
 0x3da   : > { %v938_v4 = vpop.permute.xlu1 %937  ;;  %v2501_v8 = vpop.permute.xlu2 %1050  ;;  %s1385_s27 = sshll.u32 %s1381_s15, 4  ;;  %s1386_s27 = int_to_ptr.hbm [resolvable:$true] %s1385_s27 }
 0x3db   : > { %959 = vst.msk [vmem:[#allocation2 + $0x4] sm:$0xf] %vm958_vm11, %v938_v4  ;;  %v942_v14 = vpop.permute.xlu0 %941  ;;  %s1696_s8 = sshra.s32 %s1386_s27, 4  ;;  %s1697_s8 = int_to_ptr.hbm [resolvable:$true] %s1696_s8 }
 0x3dc   : > { %961 = vst.msk [vmem:[#allocation2 + $0xc] sm:$0xf] %vm958_vm11, %v942_v14  ;;  %s1698_s21 = scalar_lea.hbm %s1697_s8, 2  ;;  %p1703_p5 = scmp.lt.s32.totalorder %s1697_s8, %s2736_s5 }
 0x3dd   : > { %p1699_p1 = scmp.ne.s32.totalorder %s1697_s8, %s1698_s21  ;;  %p1704_p6 = scmp.lt.s32.totalorder %s1702_s12, %s1698_s21 }
 0x3df   : > { %p1700_p2 = pnand %p1699_p1, %p1870_p3  ;;  %p1705_p7 = por %p1704_p6, %p1703_p5 }
 0x3e0   : > { %1230 = vrot.lane.b32.xlu2 %v2226_v12, %s1789_s11 }
 0x3e1   : > { %1144 = vrot.lane.b32.xlu0 %v989_v52, %s1788_s28  ;;  %1228 = vrot.lane.b32.xlu1 %v2323_v0, %s1789_s11  ;;  %p1701_p4 = pneg %p1700_p2 }
 0x3e2   : > { %v2514_v38 = vpop.permute.xlu1 %1101  ;;  %v2516_v21 = vpop.permute.xlu2 %1109 }
 0x3e3   : > { %v1047_v6 = vpop.permute.xlu0 %1046  ;;  %p1706_p8 = pnand %p1705_p7, %p1701_p4 }
 0x3e4   : > { %v1073_v12 = vsel %vm2508_vm13, %v1047_v6, %v1072_v18 }
 0x3e5   : > { %1074 = vst [vmem:[#allocation2] sm:$0xf] %v1073_v12 }
 0x3e6   : > { %1122 = vst.msk [vmem:[#allocation2] sm:$0xf] %vm1121_vm14, %v1098_v20 }
 0x3e8   : > { %1236 = vrot.lane.b32.xlu2 %v2265_v43, %s1789_s11 }
 0x3e9   : > { %1238 = vrot.lane.b32.xlu0 %v2279_v36, %s1789_s11  ;;  %1234 = vrot.lane.b32.xlu1 %v2272_v7, %s1789_s11  ;;  %v1018_v7 = vld [vmem:[#allocation2 + $0x4] sm:$0xf] }
 0x3ea   : > { %v940_v0 = vpop.permute.xlu2 %939 }
 0x3eb   : > { %v2527_v22 = vpop.permute.xlu0 %1105  ;;  %v950_v15 = vpop.permute.xlu1 %949  ;;  %960 = vst.msk [vmem:[#allocation2 + $0x8] sm:$0xf] %vm958_vm11, %v940_v0 }
 0x3ec   : > { %965 = vst.msk [vmem:[#allocation2 + $0x1c] sm:$0xf] %vm958_vm11, %v950_v15 }
 0x3f0   : > { %1257 = vrot.lane.b32.xlu2 %v973_v42, %s1790_s16 }
 0x3f1   : > { %1259 = vrot.lane.b32.xlu0 %v2370_v50, %s1790_s16  ;;  %1240 = vrot.lane.b32.xlu1 %v2455_v10, %s1789_s11  ;;  %v1130_v50 = vrot.slane %v1040_v49, 4 }
 0x3f2   : > { %v995_v36 = vpop.permute.xlu2 %994 }
 0x3f3   : > { %v2541_v35 = vpop.permute.xlu0 %1099  ;;  %v2543_v17 = vpop.permute.xlu1 %1186  ;;  %v1019_v26 = vsel %vm2535_vm1, %v995_v36, %v1018_v7 }
 0x3f4   : > { %1020 = vst [vmem:[#allocation2 + $0x4] sm:$0xf] %v1019_v26 }
 0x3f8   : > { %1263 = vrot.lane.b32.xlu2 %v2433_v5, %s1790_s16 }
 0x3f9   : > { %1265 = vrot.lane.b32.xlu0 %v989_v52, %s1790_s16  ;;  %1261 = vrot.lane.b32.xlu1 %v2471_v48, %s1790_s16 }
 0x3fa   : > { %1709 = shalt.err (!%p1706_p8)
}
 0x3fb   : > { %1566 = dma.vmem_to_hbm [thread:$0]  (%p1870_p3), %s1384_s17, 32, %s1386_s27, %s1368_s22   ;;  %v1104_v27 = vpop.permute.xlu2 %1103  ;;  %v2571_v55 = vpop.permute.xlu0 %1138  ;;  %v1132_v28 = vor.u32 %v1131_v37, %v1130_v50  ;;  %v1024_v31 = vld [vmem:[#allocation2 + $0xc] sm:$0xf]  ;;  %vm1158_vm2 = vcmask 191648   ;;  %v1036_v34 = vld [vmem:[#allocation2 + $0x1c] sm:$0xf] }
 0x3fc   : > { %v944_v29 = vpop.permute.xlu1 %943  ;;  %vm2585_vm3 = vmand %vm1158_vm2, %vm1016_vm0  ;;  %v1160_v16 = vld [vmem:[#allocation2] sm:$0xf]  ;;  %v1030_v56 = vld [vmem:[#allocation2 + $0x14] sm:$0xf]  ;;  %vm1205_vm4 = vcmask 224448   ;;  %vm1249_vm6 = vcmask 257248  }
 0x3fd   : > { %962 = vst.msk [vmem:[#allocation2 + $0x10] sm:$0xf] %vm958_vm11, %v944_v29  ;;  %v1133_v32 = vrot.slane %v1132_v28, 4  ;;  %v1075_v60 = vld [vmem:[#allocation2 + $0x4] sm:$0xf]  ;;  %vm2618_vm5 = vmand %vm1205_vm4, %vm907_vm8  ;;  %vm1278_vm7 = vcmask 290048  }
 0x3fe   : > { %v1021_v37 = vld [vmem:[#allocation2 + $0x8] sm:$0xf]  ;;  %vm2673_vm8 = vmand %vm1278_vm7, %vm1016_vm0 }
 0x400   : > { %1148 = vrot.lane.b32.xlu2 %v1133_v32, %s1788_s28 }
 0x401   : > { %1267 = vrot.lane.b32.xlu1 %v2445_v3, %s1790_s16 }
 0x403   : > { %v2577_v13 = vpop.permute.xlu2 %1194  ;;  %v2579_v19 = vpop.permute.xlu0 %1058 }
 0x404   : > { %v999_v44 = vpop.permute.xlu1 %998  ;;  %v1027_v10 = vld [vmem:[#allocation2 + $0x10] sm:$0xf] }
 0x405   : > { %v1025_v9 = vsel %vm2535_vm1, %v999_v44, %v1024_v31 }
 0x406   : > { %1026 = vst [vmem:[#allocation2 + $0xc] sm:$0xf] %v1025_v9 }
 0x408   : > { %1269 = vrot.lane.b32.xlu2 %v1133_v32, %s1790_s16 }
 0x40b   : > { %v1007_v40 = vpop.permute.xlu2 %1006  ;;  %v2589_v41 = vpop.permute.xlu0 %1190 }
 0x40c   : > { %v1135_v25 = vpop.permute.xlu1 %1134  ;;  %v1037_v53 = vsel %vm2535_vm1, %v1007_v40, %v1036_v34 }
 0x40d   : > { %v1161_v45 = vsel %vm2585_vm3, %v1135_v25, %v1160_v16  ;;  %1038 = vst [vmem:[#allocation2 + $0x1c] sm:$0xf] %v1037_v53  ;;  %v1081_v11 = vld [vmem:[#allocation2 + $0xc] sm:$0xf] }
 0x40e   : > { %1162 = vst [vmem:[#allocation2] sm:$0xf] %v1161_v45 }
 0x413   : > { %v1143_v39 = vpop.permute.xlu2 %1142  ;;  %v948_v46 = vpop.permute.xlu0 %947 }
 0x414   : > { %v1055_v58 = vpop.permute.xlu1 %1054  ;;  %964 = vst.msk [vmem:[#allocation2 + $0x18] sm:$0xf] %vm958_vm11, %v948_v46  ;;  %v1093_v28 = vld [vmem:[#allocation2 + $0x1c] sm:$0xf] }
 0x415   : > { %v1207_v0 = vld [vmem:[#allocation2] sm:$0xf] }
 0x41b   : > { %v2596_v47 = vpop.permute.xlu2 %1188  ;;  %v1003_v5 = vpop.permute.xlu0 %1002 }
 0x41c   : > { %v1049_v54 = vpop.permute.xlu1 %1048  ;;  %v1031_v59 = vsel %vm2535_vm1, %v1003_v5, %v1030_v56 }
 0x41d   : > { %v1076_v3 = vsel %vm2508_vm13, %v1049_v54, %v1075_v60  ;;  %1032 = vst [vmem:[#allocation2 + $0x14] sm:$0xf] %v1031_v59 }
 0x41e   : > { %1077 = vst [vmem:[#allocation2 + $0x4] sm:$0xf] %v1076_v3 }
 0x41f   : > { %1123 = vst.msk [vmem:[#allocation2 + $0x4] sm:$0xf] %vm1121_vm14, %v2541_v35 }
 0x423   : > { %v1001_v23 = vpop.permute.xlu2 %1000  ;;  %v1053_v57 = vpop.permute.xlu0 %1052 }
 0x424   : > { %v1028_v51 = vsel %vm2535_vm1, %v1001_v23, %v1027_v10  ;;  %v1108_v62 = vpop.permute.xlu1 %1107  ;;  %v1082_v48 = vsel %vm2508_vm13, %v1053_v57, %v1081_v11  ;;  %v1087_v4 = vld [vmem:[#allocation2 + $0x14] sm:$0xf] }
 0x425   : > { %1029 = vst [vmem:[#allocation2 + $0x10] sm:$0xf] %v1028_v51 }
 0x426   : > { %1083 = vst [vmem:[#allocation2 + $0xc] sm:$0xf] %v1082_v48  ;;  %v1163_v63 = vld [vmem:[#allocation2 + $0x4] sm:$0xf] }
 0x427   : > { %1125 = vst.msk [vmem:[#allocation2 + $0xc] sm:$0xf] %vm1121_vm14, %v1104_v27 }
 0x42b   : > { %v1137_v49 = vpop.permute.xlu2 %1136  ;;  %v1112_v33 = vpop.permute.xlu0 %1111 }
 0x42c   : > { %v1084_v1 = vld [vmem:[#allocation2 + $0x10] sm:$0xf]  ;;  %v1164_v42 = vsel %vm2585_vm3, %v1137_v49, %v1163_v63  ;;  %v2611_v2 = vpop.permute.xlu1 %1146 }
 0x42d   : > { %v1085_v20 = vsel %vm2508_vm13, %v1055_v58, %v1084_v1  ;;  %1165 = vst [vmem:[#allocation2 + $0x4] sm:$0xf] %v1164_v42  ;;  %v1033_v58 = vld [vmem:[#allocation2 + $0x18] sm:$0xf] }
 0x42e   : > { %1086 = vst [vmem:[#allocation2 + $0x10] sm:$0xf] %v1085_v20  ;;  %v1169_v12 = vld [vmem:[#allocation2 + $0xc] sm:$0xf] }
 0x42f   : > { %1126 = vst.msk [vmem:[#allocation2 + $0x10] sm:$0xf] %vm1121_vm14, %v2527_v22 }
 0x433   : > { %v1057_v52 = vpop.permute.xlu2 %1056  ;;  %v1185_v14 = vpop.permute.xlu0 %1184 }
 0x434   : > { %v1088_v18 = vsel %vm2508_vm13, %v1057_v52, %v1087_v4  ;;  %v1141_v6 = vpop.permute.xlu1 %1140  ;;  %v1210_v15 = vld [vmem:[#allocation2 + $0x4] sm:$0xf]  ;;  %v1208_v7 = vsel %vm2618_vm5, %v1185_v14, %v1207_v0 }
 0x435   : > { %1089 = vst [vmem:[#allocation2 + $0x14] sm:$0xf] %v1088_v18  ;;  %v1170_v22 = vsel %vm2585_vm3, %v1141_v6, %v1169_v12  ;;  %v1211_v36 = vsel %vm2618_vm5, %v2543_v17, %v1210_v15 }
 0x436   : > { %1127 = vst.msk [vmem:[#allocation2 + $0x14] sm:$0xf] %vm1121_vm14, %v1108_v62  ;;  %v1172_v35 = vld [vmem:[#allocation2 + $0x10] sm:$0xf] }
 0x437   : > { %1171 = vst [vmem:[#allocation2 + $0xc] sm:$0xf] %v1170_v22  ;;  %v1173_v26 = vsel %vm2585_vm3, %v1143_v39, %v1172_v35 }
 0x438   : > { %1209 = vst [vmem:[#allocation2] sm:$0xf] %v1208_v7 }
 0x439   : > { %1212 = vst [vmem:[#allocation2 + $0x4] sm:$0xf] %v1211_v36 }
 0x43a   : > { %1174 = vst [vmem:[#allocation2 + $0x10] sm:$0xf] %v1173_v26 }
 0x43b   : > { %v1231_v50 = vpop.permute.xlu2 %1230  ;;  %v997_v27 = vpop.permute.xlu0 %996 }
 0x43c   : > { %1251 = vst.msk [vmem:[#allocation2 + $0x4] sm:$0xf] %vm1249_vm6, %v1231_v50  ;;  %v1061_v29 = vpop.permute.xlu1 %1060  ;;  %v1022_v32 = vsel %vm2535_vm1, %v997_v27, %v1021_v37 }
 0x43d   : > { %v1094_v17 = vsel %vm2508_vm13, %v1061_v29, %v1093_v28  ;;  %1023 = vst [vmem:[#allocation2 + $0x8] sm:$0xf] %v1022_v32  ;;  %v1175_v54 = vld [vmem:[#allocation2 + $0x14] sm:$0xf] }
 0x43e   : > { %v1216_v44 = vld [vmem:[#allocation2 + $0xc] sm:$0xf]  ;;  %1095 = vst [vmem:[#allocation2 + $0x1c] sm:$0xf] %v1094_v17 }
 0x43f   : > { %v1217_v31 = vsel %vm2618_vm5, %v2589_v41, %v1216_v44  ;;  %1129 = vst.msk [vmem:[#allocation2 + $0x1c] sm:$0xf] %vm1121_vm14, %v1112_v33 }
 0x440   : > { %1218 = vst [vmem:[#allocation2 + $0xc] sm:$0xf] %v1217_v31 }
 0x441   : > { %v1219_v16 = vld [vmem:[#allocation2 + $0x10] sm:$0xf] }
 0x443   : > { %v1237_v9 = vpop.permute.xlu2 %1236  ;;  %v2643_v34 = vpop.permute.xlu0 %1196  ;;  %v1283_v1 = vld [vmem:[#allocation2 + $0x4] sm:$0xf] }
 0x444   : > { %v1078_v40 = vld [vmem:[#allocation2 + $0x8] sm:$0xf]  ;;  %v1193_v25 = vpop.permute.xlu1 %1192 }
 0x445   : > { %v1079_v53 = vsel %vm2508_vm13, %v2501_v8, %v1078_v40  ;;  %v1220_v45 = vsel %vm2618_vm5, %v1193_v25, %v1219_v16 }
 0x446   : > { %1080 = vst [vmem:[#allocation2 + $0x8] sm:$0xf] %v1079_v53  ;;  %v1181_v57 = vld [vmem:[#allocation2 + $0x1c] sm:$0xf] }
 0x447   : > { %1124 = vst.msk [vmem:[#allocation2 + $0x8] sm:$0xf] %vm1121_vm14, %v2514_v38 }
 0x448   : > { %1221 = vst [vmem:[#allocation2 + $0x10] sm:$0xf] %v1220_v45 }
 0x449   : > { %1254 = vst.msk [vmem:[#allocation2 + $0x10] sm:$0xf] %vm1249_vm6, %v1237_v9 }
 0x44b   : > { %v1258_v41 = vpop.permute.xlu2 %1257  ;;  %v1233_v39 = vpop.permute.xlu0 %1232 }
 0x44c   : > { %v1005_v46 = vpop.permute.xlu1 %1004 }
 0x44d   : > { %v1034_v56 = vsel %vm2535_vm1, %v1005_v46, %v1033_v58 }
 0x44e   : > { %v1166_v5 = vld [vmem:[#allocation2 + $0x8] sm:$0xf]  ;;  %1035 = vst [vmem:[#allocation2 + $0x18] sm:$0xf] %v1034_v56 }
 0x44f   : > { %v1167_v8 = vsel %vm2585_vm3, %v2571_v55, %v1166_v5 }
 0x450   : > { %1168 = vst [vmem:[#allocation2 + $0x8] sm:$0xf] %v1167_v8 }
 0x453   : > { %v1264_v60 = vpop.permute.xlu2 %1263  ;;  %v1145_v38 = vpop.permute.xlu0 %1144 }
 0x454   : > { %v1229_v59 = vpop.permute.xlu1 %1228  ;;  %v1176_v3 = vsel %vm2585_vm3, %v1145_v38, %v1175_v54 }
 0x455   : > { %v1090_v10 = vld [vmem:[#allocation2 + $0x18] sm:$0xf]  ;;  %1250 = vst.msk [vmem:[#allocation2] sm:$0xf] %vm1249_vm6, %v1229_v59 }
 0x456   : > { %v1091_v43 = vsel %vm2508_vm13, %v2579_v19, %v1090_v10  ;;  %1177 = vst [vmem:[#allocation2 + $0x14] sm:$0xf] %v1176_v3 }
 0x457   : > { %v1213_v23 = vld [vmem:[#allocation2 + $0x8] sm:$0xf]  ;;  %1092 = vst [vmem:[#allocation2 + $0x18] sm:$0xf] %v1091_v43 }
 0x458   : > { %v1214_v55 = vsel %vm2618_vm5, %v2596_v47, %v1213_v23  ;;  %1128 = vst.msk [vmem:[#allocation2 + $0x18] sm:$0xf] %vm1121_vm14, %v2516_v21 }
 0x459   : > { %1215 = vst [vmem:[#allocation2 + $0x8] sm:$0xf] %v1214_v55 }
 0x45a   : > { %1252 = vst.msk [vmem:[#allocation2 + $0x8] sm:$0xf] %vm1249_vm6, %v1233_v39 }
 0x45b   : > { %v1149_v11 = vpop.permute.xlu2 %1148  ;;  %v1239_v51 = vpop.permute.xlu0 %1238 }
 0x45c   : > { %v1182_v61 = vsel %vm2585_vm3, %v1149_v11, %v1181_v57  ;;  %v1235_v19 = vpop.permute.xlu1 %1234  ;;  %v1280_v47 = vld [vmem:[#allocation2] sm:$0xf] }
 0x45d   : > { %v1222_v48 = vld [vmem:[#allocation2 + $0x14] sm:$0xf]  ;;  %1183 = vst [vmem:[#allocation2 + $0x1c] sm:$0xf] %v1182_v61  ;;  %v1281_v63 = vsel %vm2673_vm8, %v1258_v41, %v1280_v47 }
 0x45e   : > { %v1223_v21 = vsel %vm2618_vm5, %v2577_v13, %v1222_v48  ;;  %1253 = vst.msk [vmem:[#allocation2 + $0xc] sm:$0xf] %vm1249_vm6, %v1235_v19 }
 0x45f   : > { %v1178_v49 = vld [vmem:[#allocation2 + $0x18] sm:$0xf]  ;;  %1224 = vst [vmem:[#allocation2 + $0x14] sm:$0xf] %v1223_v21 }
 0x460   : > { %v1179_v33 = vsel %vm2585_vm3, %v2611_v2, %v1178_v49  ;;  %1255 = vst.msk [vmem:[#allocation2 + $0x14] sm:$0xf] %vm1249_vm6, %v1239_v51  ;;  %v1292_v2 = vld [vmem:[#allocation2 + $0x10] sm:$0xf] }
 0x461   : > { %1180 = vst [vmem:[#allocation2 + $0x18] sm:$0xf] %v1179_v33  ;;  %v1286_v12 = vld [vmem:[#allocation2 + $0x8] sm:$0xf] }
 0x462   : > { %1282 = vst [vmem:[#allocation2] sm:$0xf] %v1281_v63 }
 0x463   : > { %v1260_v42 = vpop.permute.xlu0 %1259  ;;  %v1270_v22 = vpop.permute.xlu2 %1269 }
 0x464   : > { %v1241_v20 = vpop.permute.xlu1 %1240  ;;  %v1284_v13 = vsel %vm2673_vm8, %v1260_v42, %v1283_v1 }
 0x465   : > { %v1289_v52 = vld [vmem:[#allocation2 + $0xc] sm:$0xf]  ;;  %1285 = vst [vmem:[#allocation2 + $0x4] sm:$0xf] %v1284_v13 }
 0x466   : > { %v1290_v4 = vsel %vm2673_vm8, %v1264_v60, %v1289_v52 }
 0x467   : > { %1291 = vst [vmem:[#allocation2 + $0xc] sm:$0xf] %v1290_v4  ;;  %v1295_v35 = vld [vmem:[#allocation2 + $0x14] sm:$0xf] }
 0x468   : > { %v1225_v14 = vld [vmem:[#allocation2 + $0x18] sm:$0xf] }
 0x469   : > { %v1226_v30 = vsel %vm2618_vm5, %v2643_v34, %v1225_v14 }
 0x46a   : > { %1227 = vst [vmem:[#allocation2 + $0x18] sm:$0xf] %v1226_v30 }
 0x46b   : > { %1256 = vst.msk [vmem:[#allocation2 + $0x18] sm:$0xf] %vm1249_vm6, %v1241_v20  ;;  %v1266_v18 = vpop.permute.xlu0 %1265 }
 0x46c   : > { %v1262_v6 = vpop.permute.xlu1 %1261  ;;  %v1293_v0 = vsel %vm2673_vm8, %v1266_v18, %v1292_v2 }
 0x46d   : > { %v1287_v15 = vsel %vm2673_vm8, %v1262_v6, %v1286_v12  ;;  %1294 = vst [vmem:[#allocation2 + $0x10] sm:$0xf] %v1293_v0 }
 0x46e   : > { %1288 = vst [vmem:[#allocation2 + $0x8] sm:$0xf] %v1287_v15 }
 0x472   : > { %v1298_v7 = vld [vmem:[#allocation2 + $0x18] sm:$0xf] }
 0x473   : > { %v1299_v24 = vsel %vm2673_vm8, %v1270_v22, %v1298_v7 }
 0x474   : > { %1300 = vst [vmem:[#allocation2 + $0x18] sm:$0xf] %v1299_v24  ;;  %v1268_v36 = vpop.permute.xlu1 %1267 }
 0x475   : > { %v1296_v26 = vsel %vm2673_vm8, %v1268_v36, %v1295_v35 }
 0x476   : > { %1297 = vst [vmem:[#allocation2 + $0x14] sm:$0xf] %v1296_v26 }
 0x477 PF: > { %p1572_p3 = scmp.ge.s32.totalorder %s1776_s25, 2  ;;  %s1409_s30 = sand.u32 1, %s1748_s18  }
 0x478   : > { %s1410_s10 = scalar_lea.sflag [#allocation5], %s1409_s30 }
 0x479   : > { %p1569_p10 = pnand %p1572_p3, %p1880_p9 }
 0x47b   : > { %p1570_p11 = pneg %p1569_p10 }
 0x47d   : > { %1743 = dma.done.wait (%p1570_p11), %s1410_s10, 32  }
 0x47e   : > { %1745 = vsyncadd (%p1570_p11), %s1410_s10, 4294967264  ;;  %s19_s25 = sadd.s32 1, %s1776_s25   ;;  %s2756_s22 = sld [smem:[#allocation7_spill]] }
 0x47f   : > { %p16_p12 = scmp.ge.s32.totalorder %s19_s25, 18   ;;  %s2757_s28 = sld [smem:[#allocation8_spill]] }
 0x480   : > { %s2758_s24 = sld [smem:[#allocation9_spill]]  ;;  %s2759_s18 = smov %s1752_s19 }
 0x481   : > { %s2760_s19 = smov %s1756_s20  ;;  %s2761_s20 = smov %s1888_s9 }
 0x482   : > { %s2762_s21 = smov %s1768_s23  ;;  %18 = sbr.rel (!%p16_p12) target bundleno = 5 (0x5), region = 88 }
 0x485   : > { %s2763_s23 = smov %s2757_s28 }
 0x487   :  { %1416 = vsyncpa [#allocation5], 1 }
 0x488   :  { %1418 = vsyncpa [#allocation5 + $0x1], 1 }

</bundles_post_ra>
